<compile_context>
chip_gen: v7x
topology: tpu7x:2x2x1
jax: 0.10.0
libtpu: 0.0.40
codegen_flags: <defaults>
</compile_context>

<pallas_src>
import jax
import jax.numpy as jnp
from jax.experimental import pallas as pl
from jax.experimental.pallas import tpu as pltpu

NUM_LAYERS = 20
_OUT_PAD_LANES = 128  # lane-dense padded width for the (B, 1) output


def mlp20_layer_dims(input_d: int, ratio: int = 2):
    d, r = input_d, ratio
    # (in, out) for each Linear in the Sequential, in order (matches the PyTorch model).
    return [
        (d, d * r), (d * r, d * r), (d * r, d * r),
        (d * r, d * r ** 2), (d * r ** 2, d * r ** 2), (d * r ** 2, d * r ** 2),
        (d * r ** 2, d * r ** 3), (d * r ** 3, d * r ** 3), (d * r ** 3, d * r ** 3),
        (d * r ** 3, d * r ** 3), (d * r ** 3, d * r ** 3),
        (d * r ** 3, d * r ** 2), (d * r ** 2, d * r ** 2), (d * r ** 2, d * r ** 2),
        (d * r ** 2, d * r), (d * r, d * r), (d * r, d * r), (d * r, d * r),
        (d * r, d), (d, 1),
    ]


def _fused_mlp_kernel(x_ref, *rest):
    """rest = (w_0, ..., w_19, bias_stack, out)."""
    w_refs = rest[:NUM_LAYERS]
    b_ref = rest[NUM_LAYERS]        # (NUM_LAYERS, max_dout) f32, zero-padded rows
    o_ref = rest[NUM_LAYERS + 1]    # (B, _OUT_PAD_LANES) f32

    h_bf = x_ref[...]               # (B, d) bf16 flattened input
    y = None                        # f32 activation of the most recent layer
    for i in range(NUM_LAYERS - 1):               # layers 0..18: Linear + ReLU
        w = w_refs[i][...]                        # (din_i, dout_i) bf16
        dout = w.shape[1]
        y = jnp.dot(h_bf, w, preferred_element_type=jnp.float32)   # MXU, f32 acc
        y = y + b_ref[i:i + 1, :dout]             # bias in f32
        y = jnp.maximum(y, 0.0)                   # ReLU in f32
        h_bf = y.astype(jnp.bfloat16)             # bf16 feed for next MXU matmul

    # Final layer 19: Linear(d, 1), no ReLU.  Done as a lane reduction on the
    # f32 activation of layer 18 (avoids a degenerate N=1 MXU push).
    w_last = w_refs[NUM_LAYERS - 1][...].astype(jnp.float32)        # (1, d)
    r = jnp.sum(y * w_last, axis=-1, keepdims=True)                 # (B, 1)
    r = r + b_ref[NUM_LAYERS - 1:NUM_LAYERS, 0:1]                   # scalar bias
    # Lane-dense padded store; wrapper slices column 0.
    o_ref[...] = jnp.broadcast_to(r, o_ref.shape).astype(o_ref.dtype)


def mlp20_pallas(x_flat_bf16, weights_bf16, bias_stack):
    B = x_flat_bf16.shape[0]
    n_in = 1 + NUM_LAYERS + 1
    out_pad = pl.pallas_call(
        _fused_mlp_kernel,
        out_shape=jax.ShapeDtypeStruct((B, _OUT_PAD_LANES), jnp.float32),
        in_specs=[pl.BlockSpec(memory_space=pltpu.MemorySpace.VMEM)] * n_in,
        out_specs=pl.BlockSpec(memory_space=pltpu.MemorySpace.VMEM),
        compiler_params=pltpu.CompilerParams(vmem_limit_bytes=32 * 1024 * 1024),
    )(x_flat_bf16, *weights_bf16, bias_stack)
    return out_pad[:, 0:1]   # back to the (B, 1) result


@jax.jit
def mlp20_forward(x, weights, bias_stack):
    B = x.shape[0]
    h = x.reshape(B, -1).astype(jnp.bfloat16)   # nn.Flatten + cast for the MXU
    return mlp20_pallas(h, weights, bias_stack)


def init_params(key, input_d: int, ratio: int = 2, dtype=jnp.float32):
    """Deterministic init mimicking PyTorch Linear's U(-1/sqrt(fan_in), +).
    Weights are stored as (in, out) so the kernel computes y = x @ W + b."""
    params = []
    for (din, dout) in mlp20_layer_dims(input_d, ratio):
        key, kw, kb = jax.random.split(key, 3)
        bound = 1.0 / jnp.sqrt(jnp.float32(din))
        w = jax.random.uniform(kw, (din, dout), dtype, -bound, bound)
        b = jax.random.uniform(kb, (dout,), dtype, -bound, bound)
        params.append((w, b))
    return params


def pack_params(params):
    """Pack per-layer (w, b) into fused-kernel operands:
       * 20 bf16 weight matrices (last one stored as a (1, d) row for the
         lane-reduction tail),
       * one (20, max_dout) f32 zero-padded bias stack."""
    n = len(params)
    max_dout = max(w.shape[1] for (w, _) in params)
    weights = []
    bias_stack = jnp.zeros((n, max_dout), jnp.float32)
    for i, (w, b) in enumerate(params):
        if i < n - 1:
            weights.append(w.astype(jnp.bfloat16))
        else:
            weights.append(w.T.astype(jnp.bfloat16))      # (1, d) row vector
        bias_stack = bias_stack.at[i, : b.shape[0]].set(b.astype(jnp.float32))
    return weights, bias_stack


def reference_forward(x, params):
    """Pure-JAX reference with matching numerics (bf16 matmul inputs, f32 acc)."""
    B = x.shape[0]
    h = x.reshape(B, -1).astype(jnp.bfloat16)
    y = None
    for i in range(NUM_LAYERS - 1):
        w, b = params[i]
        y = jnp.dot(h, w.astype(jnp.bfloat16), preferred_element_type=jnp.float32)
        y = jnp.maximum(y + b, 0.0)
        h = y.astype(jnp.bfloat16)
    w, b = params[NUM_LAYERS - 1]
    w_row = w.T.astype(jnp.bfloat16).astype(jnp.float32)   # (1, d)
    return jnp.sum(y * w_row, axis=-1, keepdims=True) + b


if __name__ == "__main__":
    key = jax.random.PRNGKey(0)
    kx, kp = jax.random.split(key)

    batch, C, H, W = 8, 4, 4, 4
    input_d = C * H * W          # 64 after nn.Flatten
    ratio = 2

    x = jax.random.normal(kx, (batch, C, H, W), jnp.float32)
    params = init_params(kp, input_d, ratio)
    weights, bias_stack = pack_params(params)

    out = mlp20_forward(x, weights, bias_stack)
    out = jax.block_until_ready(out)
    assert out.shape == (batch, 1), out.shape
    assert bool(jnp.all(jnp.isfinite(out)))

    # Sanity check against a matching-precision pure-JAX reference.
    ref = jax.block_until_ready(reference_forward(x, params))
    err = float(jnp.max(jnp.abs(out - ref)))
    scale = float(jnp.max(jnp.abs(ref))) + 1e-6
    assert err <= 2e-2 * scale, (err, scale)

    print("KERNEL_OK")
</pallas_src>

<mosaic_0001>
module attributes {stable_mosaic.version = 11 : i64} {
  func.func @_fused_mlp_kernel(%arg0: memref<8x64xbf16, #tpu.memory_space<vmem>>, %arg1: memref<64x128xbf16, #tpu.memory_space<vmem>>, %arg2: memref<128x128xbf16, #tpu.memory_space<vmem>>, %arg3: memref<128x128xbf16, #tpu.memory_space<vmem>>, %arg4: memref<128x256xbf16, #tpu.memory_space<vmem>>, %arg5: memref<256x256xbf16, #tpu.memory_space<vmem>>, %arg6: memref<256x256xbf16, #tpu.memory_space<vmem>>, %arg7: memref<256x512xbf16, #tpu.memory_space<vmem>>, %arg8: memref<512x512xbf16, #tpu.memory_space<vmem>>, %arg9: memref<512x512xbf16, #tpu.memory_space<vmem>>, %arg10: memref<512x512xbf16, #tpu.memory_space<vmem>>, %arg11: memref<512x512xbf16, #tpu.memory_space<vmem>>, %arg12: memref<512x256xbf16, #tpu.memory_space<vmem>>, %arg13: memref<256x256xbf16, #tpu.memory_space<vmem>>, %arg14: memref<256x256xbf16, #tpu.memory_space<vmem>>, %arg15: memref<256x128xbf16, #tpu.memory_space<vmem>>, %arg16: memref<128x128xbf16, #tpu.memory_space<vmem>>, %arg17: memref<128x128xbf16, #tpu.memory_space<vmem>>, %arg18: memref<128x128xbf16, #tpu.memory_space<vmem>>, %arg19: memref<128x64xbf16, #tpu.memory_space<vmem>>, %arg20: memref<1x64xbf16, #tpu.memory_space<vmem>>, %arg21: memref<20x512xf32, #tpu.memory_space<vmem>>, %arg22: memref<8x128xf32, #tpu.memory_space<vmem>>) attributes {dimension_semantics = [], scalar_prefetch = 0 : i64, scratch_operands = 0 : i64, tpu.core_type = #tpu.core_type<tc>} {
    %c0 = arith.constant 0 : index
    %c0_0 = arith.constant 0 : index
    %0 = vector.load %arg0[%c0, %c0_0] : memref<8x64xbf16, #tpu.memory_space<vmem>>, vector<8x64xbf16>
    %c0_1 = arith.constant 0 : index
    %c0_2 = arith.constant 0 : index
    %1 = vector.load %arg1[%c0_1, %c0_2] : memref<64x128xbf16, #tpu.memory_space<vmem>>, vector<64x128xbf16>
    %cst = arith.constant dense<0.000000e+00> : vector<8x128xf32>
    %2 = tpu.matmul %0, %1, %cst {dimension_numbers = #tpu.dot_dimension_numbers<[1], [0], [0], [1], [0, 0, 1, 1], [], []>} : vector<8x64xbf16>, vector<64x128xbf16>, vector<8x128xf32> -> vector<8x128xf32>
    %c0_3 = arith.constant 0 : index
    %c0_4 = arith.constant 0 : index
    %3 = vector.load %arg21[%c0_3, %c0_4] : memref<20x512xf32, #tpu.memory_space<vmem>>, vector<1x128xf32>
    %4 = vector.broadcast %3 : vector<1x128xf32> to vector<8x128xf32>
    %5 = arith.addf %2, %4 : vector<8x128xf32>
    %cst_5 = arith.constant 0.000000e+00 : f32
    %6 = vector.broadcast %cst_5 : f32 to vector<8x128xf32>
    %7 = arith.maximumf %5, %6 : vector<8x128xf32>
    %8 = arith.truncf %7 : vector<8x128xf32> to vector<8x128xbf16>
    %c0_6 = arith.constant 0 : index
    %c0_7 = arith.constant 0 : index
    %9 = vector.load %arg2[%c0_6, %c0_7] : memref<128x128xbf16, #tpu.memory_space<vmem>>, vector<128x128xbf16>
    %cst_8 = arith.constant dense<0.000000e+00> : vector<8x128xf32>
    %10 = tpu.matmul %8, %9, %cst_8 {dimension_numbers = #tpu.dot_dimension_numbers<[1], [0], [0], [1], [0, 0, 1, 1], [], []>} : vector<8x128xbf16>, vector<128x128xbf16>, vector<8x128xf32> -> vector<8x128xf32>
    %c1 = arith.constant 1 : index
    %c0_9 = arith.constant 0 : index
    %11 = vector.load %arg21[%c1, %c0_9] : memref<20x512xf32, #tpu.memory_space<vmem>>, vector<1x128xf32>
    %12 = vector.broadcast %11 : vector<1x128xf32> to vector<8x128xf32>
    %13 = arith.addf %10, %12 : vector<8x128xf32>
    %cst_10 = arith.constant 0.000000e+00 : f32
    %14 = vector.broadcast %cst_10 : f32 to vector<8x128xf32>
    %15 = arith.maximumf %13, %14 : vector<8x128xf32>
    %16 = arith.truncf %15 : vector<8x128xf32> to vector<8x128xbf16>
    %c0_11 = arith.constant 0 : index
    %c0_12 = arith.constant 0 : index
    %17 = vector.load %arg3[%c0_11, %c0_12] : memref<128x128xbf16, #tpu.memory_space<vmem>>, vector<128x128xbf16>
    %cst_13 = arith.constant dense<0.000000e+00> : vector<8x128xf32>
    %18 = tpu.matmul %16, %17, %cst_13 {dimension_numbers = #tpu.dot_dimension_numbers<[1], [0], [0], [1], [0, 0, 1, 1], [], []>} : vector<8x128xbf16>, vector<128x128xbf16>, vector<8x128xf32> -> vector<8x128xf32>
    %c2 = arith.constant 2 : index
    %c0_14 = arith.constant 0 : index
    %19 = vector.load %arg21[%c2, %c0_14] : memref<20x512xf32, #tpu.memory_space<vmem>>, vector<1x128xf32>
    %20 = vector.broadcast %19 : vector<1x128xf32> to vector<8x128xf32>
    %21 = arith.addf %18, %20 : vector<8x128xf32>
    %cst_15 = arith.constant 0.000000e+00 : f32
    %22 = vector.broadcast %cst_15 : f32 to vector<8x128xf32>
    %23 = arith.maximumf %21, %22 : vector<8x128xf32>
    %24 = arith.truncf %23 : vector<8x128xf32> to vector<8x128xbf16>
    %c0_16 = arith.constant 0 : index
    %c0_17 = arith.constant 0 : index
    %25 = vector.load %arg4[%c0_16, %c0_17] : memref<128x256xbf16, #tpu.memory_space<vmem>>, vector<128x256xbf16>
    %cst_18 = arith.constant dense<0.000000e+00> : vector<8x256xf32>
    %26 = tpu.matmul %24, %25, %cst_18 {dimension_numbers = #tpu.dot_dimension_numbers<[1], [0], [0], [1], [0, 0, 1, 1], [], []>} : vector<8x128xbf16>, vector<128x256xbf16>, vector<8x256xf32> -> vector<8x256xf32>
    %c3 = arith.constant 3 : index
    %c0_19 = arith.constant 0 : index
    %27 = vector.load %arg21[%c3, %c0_19] : memref<20x512xf32, #tpu.memory_space<vmem>>, vector<1x256xf32>
    %28 = vector.broadcast %27 : vector<1x256xf32> to vector<8x256xf32>
    %29 = arith.addf %26, %28 : vector<8x256xf32>
    %cst_20 = arith.constant 0.000000e+00 : f32
    %30 = vector.broadcast %cst_20 : f32 to vector<8x256xf32>
    %31 = arith.maximumf %29, %30 : vector<8x256xf32>
    %32 = arith.truncf %31 : vector<8x256xf32> to vector<8x256xbf16>
    %c0_21 = arith.constant 0 : index
    %c0_22 = arith.constant 0 : index
    %33 = vector.load %arg5[%c0_21, %c0_22] : memref<256x256xbf16, #tpu.memory_space<vmem>>, vector<256x256xbf16>
    %cst_23 = arith.constant dense<0.000000e+00> : vector<8x256xf32>
    %34 = tpu.matmul %32, %33, %cst_23 {dimension_numbers = #tpu.dot_dimension_numbers<[1], [0], [0], [1], [0, 0, 1, 1], [], []>} : vector<8x256xbf16>, vector<256x256xbf16>, vector<8x256xf32> -> vector<8x256xf32>
    %c4 = arith.constant 4 : index
    %c0_24 = arith.constant 0 : index
    %35 = vector.load %arg21[%c4, %c0_24] : memref<20x512xf32, #tpu.memory_space<vmem>>, vector<1x256xf32>
    %36 = vector.broadcast %35 : vector<1x256xf32> to vector<8x256xf32>
    %37 = arith.addf %34, %36 : vector<8x256xf32>
    %cst_25 = arith.constant 0.000000e+00 : f32
    %38 = vector.broadcast %cst_25 : f32 to vector<8x256xf32>
    %39 = arith.maximumf %37, %38 : vector<8x256xf32>
    %40 = arith.truncf %39 : vector<8x256xf32> to vector<8x256xbf16>
    %c0_26 = arith.constant 0 : index
    %c0_27 = arith.constant 0 : index
    %41 = vector.load %arg6[%c0_26, %c0_27] : memref<256x256xbf16, #tpu.memory_space<vmem>>, vector<256x256xbf16>
    %cst_28 = arith.constant dense<0.000000e+00> : vector<8x256xf32>
    %42 = tpu.matmul %40, %41, %cst_28 {dimension_numbers = #tpu.dot_dimension_numbers<[1], [0], [0], [1], [0, 0, 1, 1], [], []>} : vector<8x256xbf16>, vector<256x256xbf16>, vector<8x256xf32> -> vector<8x256xf32>
    %c5 = arith.constant 5 : index
    %c0_29 = arith.constant 0 : index
    %43 = vector.load %arg21[%c5, %c0_29] : memref<20x512xf32, #tpu.memory_space<vmem>>, vector<1x256xf32>
    %44 = vector.broadcast %43 : vector<1x256xf32> to vector<8x256xf32>
    %45 = arith.addf %42, %44 : vector<8x256xf32>
    %cst_30 = arith.constant 0.000000e+00 : f32
    %46 = vector.broadcast %cst_30 : f32 to vector<8x256xf32>
    %47 = arith.maximumf %45, %46 : vector<8x256xf32>
    %48 = arith.truncf %47 : vector<8x256xf32> to vector<8x256xbf16>
    %c0_31 = arith.constant 0 : index
    %c0_32 = arith.constant 0 : index
    %49 = vector.load %arg7[%c0_31, %c0_32] : memref<256x512xbf16, #tpu.memory_space<vmem>>, vector<256x512xbf16>
    %cst_33 = arith.constant dense<0.000000e+00> : vector<8x512xf32>
    %50 = tpu.matmul %48, %49, %cst_33 {dimension_numbers = #tpu.dot_dimension_numbers<[1], [0], [0], [1], [0, 0, 1, 1], [], []>} : vector<8x256xbf16>, vector<256x512xbf16>, vector<8x512xf32> -> vector<8x512xf32>
    %c6 = arith.constant 6 : index
    %c0_34 = arith.constant 0 : index
    %51 = vector.load %arg21[%c6, %c0_34] : memref<20x512xf32, #tpu.memory_space<vmem>>, vector<1x512xf32>
    %52 = vector.broadcast %51 : vector<1x512xf32> to vector<8x512xf32>
    %53 = arith.addf %50, %52 : vector<8x512xf32>
    %cst_35 = arith.constant 0.000000e+00 : f32
    %54 = vector.broadcast %cst_35 : f32 to vector<8x512xf32>
    %55 = arith.maximumf %53, %54 : vector<8x512xf32>
    %56 = arith.truncf %55 : vector<8x512xf32> to vector<8x512xbf16>
    %c0_36 = arith.constant 0 : index
    %c0_37 = arith.constant 0 : index
    %57 = vector.load %arg8[%c0_36, %c0_37] : memref<512x512xbf16, #tpu.memory_space<vmem>>, vector<512x512xbf16>
    %cst_38 = arith.constant dense<0.000000e+00> : vector<8x512xf32>
    %58 = tpu.matmul %56, %57, %cst_38 {dimension_numbers = #tpu.dot_dimension_numbers<[1], [0], [0], [1], [0, 0, 1, 1], [], []>} : vector<8x512xbf16>, vector<512x512xbf16>, vector<8x512xf32> -> vector<8x512xf32>
    %c7 = arith.constant 7 : index
    %c0_39 = arith.constant 0 : index
    %59 = vector.load %arg21[%c7, %c0_39] : memref<20x512xf32, #tpu.memory_space<vmem>>, vector<1x512xf32>
    %60 = vector.broadcast %59 : vector<1x512xf32> to vector<8x512xf32>
    %61 = arith.addf %58, %60 : vector<8x512xf32>
    %cst_40 = arith.constant 0.000000e+00 : f32
    %62 = vector.broadcast %cst_40 : f32 to vector<8x512xf32>
    %63 = arith.maximumf %61, %62 : vector<8x512xf32>
    %64 = arith.truncf %63 : vector<8x512xf32> to vector<8x512xbf16>
    %c0_41 = arith.constant 0 : index
    %c0_42 = arith.constant 0 : index
    %65 = vector.load %arg9[%c0_41, %c0_42] : memref<512x512xbf16, #tpu.memory_space<vmem>>, vector<512x512xbf16>
    %cst_43 = arith.constant dense<0.000000e+00> : vector<8x512xf32>
    %66 = tpu.matmul %64, %65, %cst_43 {dimension_numbers = #tpu.dot_dimension_numbers<[1], [0], [0], [1], [0, 0, 1, 1], [], []>} : vector<8x512xbf16>, vector<512x512xbf16>, vector<8x512xf32> -> vector<8x512xf32>
    %c8 = arith.constant 8 : index
    %c0_44 = arith.constant 0 : index
    %67 = vector.load %arg21[%c8, %c0_44] : memref<20x512xf32, #tpu.memory_space<vmem>>, vector<1x512xf32>
    %68 = vector.broadcast %67 : vector<1x512xf32> to vector<8x512xf32>
    %69 = arith.addf %66, %68 : vector<8x512xf32>
    %cst_45 = arith.constant 0.000000e+00 : f32
    %70 = vector.broadcast %cst_45 : f32 to vector<8x512xf32>
    %71 = arith.maximumf %69, %70 : vector<8x512xf32>
    %72 = arith.truncf %71 : vector<8x512xf32> to vector<8x512xbf16>
    %c0_46 = arith.constant 0 : index
    %c0_47 = arith.constant 0 : index
    %73 = vector.load %arg10[%c0_46, %c0_47] : memref<512x512xbf16, #tpu.memory_space<vmem>>, vector<512x512xbf16>
    %cst_48 = arith.constant dense<0.000000e+00> : vector<8x512xf32>
    %74 = tpu.matmul %72, %73, %cst_48 {dimension_numbers = #tpu.dot_dimension_numbers<[1], [0], [0], [1], [0, 0, 1, 1], [], []>} : vector<8x512xbf16>, vector<512x512xbf16>, vector<8x512xf32> -> vector<8x512xf32>
    %c9 = arith.constant 9 : index
    %c0_49 = arith.constant 0 : index
    %75 = vector.load %arg21[%c9, %c0_49] : memref<20x512xf32, #tpu.memory_space<vmem>>, vector<1x512xf32>
    %76 = vector.broadcast %75 : vector<1x512xf32> to vector<8x512xf32>
    %77 = arith.addf %74, %76 : vector<8x512xf32>
    %cst_50 = arith.constant 0.000000e+00 : f32
    %78 = vector.broadcast %cst_50 : f32 to vector<8x512xf32>
    %79 = arith.maximumf %77, %78 : vector<8x512xf32>
    %80 = arith.truncf %79 : vector<8x512xf32> to vector<8x512xbf16>
    %c0_51 = arith.constant 0 : index
    %c0_52 = arith.constant 0 : index
    %81 = vector.load %arg11[%c0_51, %c0_52] : memref<512x512xbf16, #tpu.memory_space<vmem>>, vector<512x512xbf16>
    %cst_53 = arith.constant dense<0.000000e+00> : vector<8x512xf32>
    %82 = tpu.matmul %80, %81, %cst_53 {dimension_numbers = #tpu.dot_dimension_numbers<[1], [0], [0], [1], [0, 0, 1, 1], [], []>} : vector<8x512xbf16>, vector<512x512xbf16>, vector<8x512xf32> -> vector<8x512xf32>
    %c10 = arith.constant 10 : index
    %c0_54 = arith.constant 0 : index
    %83 = vector.load %arg21[%c10, %c0_54] : memref<20x512xf32, #tpu.memory_space<vmem>>, vector<1x512xf32>
    %84 = vector.broadcast %83 : vector<1x512xf32> to vector<8x512xf32>
    %85 = arith.addf %82, %84 : vector<8x512xf32>
    %cst_55 = arith.constant 0.000000e+00 : f32
    %86 = vector.broadcast %cst_55 : f32 to vector<8x512xf32>
    %87 = arith.maximumf %85, %86 : vector<8x512xf32>
    %88 = arith.truncf %87 : vector<8x512xf32> to vector<8x512xbf16>
    %c0_56 = arith.constant 0 : index
    %c0_57 = arith.constant 0 : index
    %89 = vector.load %arg12[%c0_56, %c0_57] : memref<512x256xbf16, #tpu.memory_space<vmem>>, vector<512x256xbf16>
    %cst_58 = arith.constant dense<0.000000e+00> : vector<8x256xf32>
    %90 = tpu.matmul %88, %89, %cst_58 {dimension_numbers = #tpu.dot_dimension_numbers<[1], [0], [0], [1], [0, 0, 1, 1], [], []>} : vector<8x512xbf16>, vector<512x256xbf16>, vector<8x256xf32> -> vector<8x256xf32>
    %c11 = arith.constant 11 : index
    %c0_59 = arith.constant 0 : index
    %91 = vector.load %arg21[%c11, %c0_59] : memref<20x512xf32, #tpu.memory_space<vmem>>, vector<1x256xf32>
    %92 = vector.broadcast %91 : vector<1x256xf32> to vector<8x256xf32>
    %93 = arith.addf %90, %92 : vector<8x256xf32>
    %cst_60 = arith.constant 0.000000e+00 : f32
    %94 = vector.broadcast %cst_60 : f32 to vector<8x256xf32>
    %95 = arith.maximumf %93, %94 : vector<8x256xf32>
    %96 = arith.truncf %95 : vector<8x256xf32> to vector<8x256xbf16>
    %c0_61 = arith.constant 0 : index
    %c0_62 = arith.constant 0 : index
    %97 = vector.load %arg13[%c0_61, %c0_62] : memref<256x256xbf16, #tpu.memory_space<vmem>>, vector<256x256xbf16>
    %cst_63 = arith.constant dense<0.000000e+00> : vector<8x256xf32>
    %98 = tpu.matmul %96, %97, %cst_63 {dimension_numbers = #tpu.dot_dimension_numbers<[1], [0], [0], [1], [0, 0, 1, 1], [], []>} : vector<8x256xbf16>, vector<256x256xbf16>, vector<8x256xf32> -> vector<8x256xf32>
    %c12 = arith.constant 12 : index
    %c0_64 = arith.constant 0 : index
    %99 = vector.load %arg21[%c12, %c0_64] : memref<20x512xf32, #tpu.memory_space<vmem>>, vector<1x256xf32>
    %100 = vector.broadcast %99 : vector<1x256xf32> to vector<8x256xf32>
    %101 = arith.addf %98, %100 : vector<8x256xf32>
    %cst_65 = arith.constant 0.000000e+00 : f32
    %102 = vector.broadcast %cst_65 : f32 to vector<8x256xf32>
    %103 = arith.maximumf %101, %102 : vector<8x256xf32>
    %104 = arith.truncf %103 : vector<8x256xf32> to vector<8x256xbf16>
    %c0_66 = arith.constant 0 : index
    %c0_67 = arith.constant 0 : index
    %105 = vector.load %arg14[%c0_66, %c0_67] : memref<256x256xbf16, #tpu.memory_space<vmem>>, vector<256x256xbf16>
    %cst_68 = arith.constant dense<0.000000e+00> : vector<8x256xf32>
    %106 = tpu.matmul %104, %105, %cst_68 {dimension_numbers = #tpu.dot_dimension_numbers<[1], [0], [0], [1], [0, 0, 1, 1], [], []>} : vector<8x256xbf16>, vector<256x256xbf16>, vector<8x256xf32> -> vector<8x256xf32>
    %c13 = arith.constant 13 : index
    %c0_69 = arith.constant 0 : index
    %107 = vector.load %arg21[%c13, %c0_69] : memref<20x512xf32, #tpu.memory_space<vmem>>, vector<1x256xf32>
    %108 = vector.broadcast %107 : vector<1x256xf32> to vector<8x256xf32>
    %109 = arith.addf %106, %108 : vector<8x256xf32>
    %cst_70 = arith.constant 0.000000e+00 : f32
    %110 = vector.broadcast %cst_70 : f32 to vector<8x256xf32>
    %111 = arith.maximumf %109, %110 : vector<8x256xf32>
    %112 = arith.truncf %111 : vector<8x256xf32> to vector<8x256xbf16>
    %c0_71 = arith.constant 0 : index
    %c0_72 = arith.constant 0 : index
    %113 = vector.load %arg15[%c0_71, %c0_72] : memref<256x128xbf16, #tpu.memory_space<vmem>>, vector<256x128xbf16>
    %cst_73 = arith.constant dense<0.000000e+00> : vector<8x128xf32>
    %114 = tpu.matmul %112, %113, %cst_73 {dimension_numbers = #tpu.dot_dimension_numbers<[1], [0], [0], [1], [0, 0, 1, 1], [], []>} : vector<8x256xbf16>, vector<256x128xbf16>, vector<8x128xf32> -> vector<8x128xf32>
    %c14 = arith.constant 14 : index
    %c0_74 = arith.constant 0 : index
    %115 = vector.load %arg21[%c14, %c0_74] : memref<20x512xf32, #tpu.memory_space<vmem>>, vector<1x128xf32>
    %116 = vector.broadcast %115 : vector<1x128xf32> to vector<8x128xf32>
    %117 = arith.addf %114, %116 : vector<8x128xf32>
    %cst_75 = arith.constant 0.000000e+00 : f32
    %118 = vector.broadcast %cst_75 : f32 to vector<8x128xf32>
    %119 = arith.maximumf %117, %118 : vector<8x128xf32>
    %120 = arith.truncf %119 : vector<8x128xf32> to vector<8x128xbf16>
    %c0_76 = arith.constant 0 : index
    %c0_77 = arith.constant 0 : index
    %121 = vector.load %arg16[%c0_76, %c0_77] : memref<128x128xbf16, #tpu.memory_space<vmem>>, vector<128x128xbf16>
    %cst_78 = arith.constant dense<0.000000e+00> : vector<8x128xf32>
    %122 = tpu.matmul %120, %121, %cst_78 {dimension_numbers = #tpu.dot_dimension_numbers<[1], [0], [0], [1], [0, 0, 1, 1], [], []>} : vector<8x128xbf16>, vector<128x128xbf16>, vector<8x128xf32> -> vector<8x128xf32>
    %c15 = arith.constant 15 : index
    %c0_79 = arith.constant 0 : index
    %123 = vector.load %arg21[%c15, %c0_79] : memref<20x512xf32, #tpu.memory_space<vmem>>, vector<1x128xf32>
    %124 = vector.broadcast %123 : vector<1x128xf32> to vector<8x128xf32>
    %125 = arith.addf %122, %124 : vector<8x128xf32>
    %cst_80 = arith.constant 0.000000e+00 : f32
    %126 = vector.broadcast %cst_80 : f32 to vector<8x128xf32>
    %127 = arith.maximumf %125, %126 : vector<8x128xf32>
    %128 = arith.truncf %127 : vector<8x128xf32> to vector<8x128xbf16>
    %c0_81 = arith.constant 0 : index
    %c0_82 = arith.constant 0 : index
    %129 = vector.load %arg17[%c0_81, %c0_82] : memref<128x128xbf16, #tpu.memory_space<vmem>>, vector<128x128xbf16>
    %cst_83 = arith.constant dense<0.000000e+00> : vector<8x128xf32>
    %130 = tpu.matmul %128, %129, %cst_83 {dimension_numbers = #tpu.dot_dimension_numbers<[1], [0], [0], [1], [0, 0, 1, 1], [], []>} : vector<8x128xbf16>, vector<128x128xbf16>, vector<8x128xf32> -> vector<8x128xf32>
    %c16 = arith.constant 16 : index
    %c0_84 = arith.constant 0 : index
    %131 = vector.load %arg21[%c16, %c0_84] : memref<20x512xf32, #tpu.memory_space<vmem>>, vector<1x128xf32>
    %132 = vector.broadcast %131 : vector<1x128xf32> to vector<8x128xf32>
    %133 = arith.addf %130, %132 : vector<8x128xf32>
    %cst_85 = arith.constant 0.000000e+00 : f32
    %134 = vector.broadcast %cst_85 : f32 to vector<8x128xf32>
    %135 = arith.maximumf %133, %134 : vector<8x128xf32>
    %136 = arith.truncf %135 : vector<8x128xf32> to vector<8x128xbf16>
    %c0_86 = arith.constant 0 : index
    %c0_87 = arith.constant 0 : index
    %137 = vector.load %arg18[%c0_86, %c0_87] : memref<128x128xbf16, #tpu.memory_space<vmem>>, vector<128x128xbf16>
    %cst_88 = arith.constant dense<0.000000e+00> : vector<8x128xf32>
    %138 = tpu.matmul %136, %137, %cst_88 {dimension_numbers = #tpu.dot_dimension_numbers<[1], [0], [0], [1], [0, 0, 1, 1], [], []>} : vector<8x128xbf16>, vector<128x128xbf16>, vector<8x128xf32> -> vector<8x128xf32>
    %c17 = arith.constant 17 : index
    %c0_89 = arith.constant 0 : index
    %139 = vector.load %arg21[%c17, %c0_89] : memref<20x512xf32, #tpu.memory_space<vmem>>, vector<1x128xf32>
    %140 = vector.broadcast %139 : vector<1x128xf32> to vector<8x128xf32>
    %141 = arith.addf %138, %140 : vector<8x128xf32>
    %cst_90 = arith.constant 0.000000e+00 : f32
    %142 = vector.broadcast %cst_90 : f32 to vector<8x128xf32>
    %143 = arith.maximumf %141, %142 : vector<8x128xf32>
    %144 = arith.truncf %143 : vector<8x128xf32> to vector<8x128xbf16>
    %c0_91 = arith.constant 0 : index
    %c0_92 = arith.constant 0 : index
    %145 = vector.load %arg19[%c0_91, %c0_92] : memref<128x64xbf16, #tpu.memory_space<vmem>>, vector<128x64xbf16>
    %cst_93 = arith.constant dense<0.000000e+00> : vector<8x64xf32>
    %146 = tpu.matmul %144, %145, %cst_93 {dimension_numbers = #tpu.dot_dimension_numbers<[1], [0], [0], [1], [0, 0, 1, 1], [], []>} : vector<8x128xbf16>, vector<128x64xbf16>, vector<8x64xf32> -> vector<8x64xf32>
    %c18 = arith.constant 18 : index
    %c0_94 = arith.constant 0 : index
    %147 = vector.load %arg21[%c18, %c0_94] : memref<20x512xf32, #tpu.memory_space<vmem>>, vector<1x64xf32>
    %148 = vector.broadcast %147 : vector<1x64xf32> to vector<8x64xf32>
    %149 = arith.addf %146, %148 : vector<8x64xf32>
    %cst_95 = arith.constant 0.000000e+00 : f32
    %150 = vector.broadcast %cst_95 : f32 to vector<8x64xf32>
    %151 = arith.maximumf %149, %150 : vector<8x64xf32>
    %c0_96 = arith.constant 0 : index
    %c0_97 = arith.constant 0 : index
    %152 = vector.load %arg20[%c0_96, %c0_97] : memref<1x64xbf16, #tpu.memory_space<vmem>>, vector<1x64xbf16>
    %153 = arith.extf %152 : vector<1x64xbf16> to vector<1x64xf32>
    %154 = vector.broadcast %153 : vector<1x64xf32> to vector<8x64xf32>
    %155 = arith.mulf %151, %154 : vector<8x64xf32>
    %cst_98 = arith.constant dense<0.000000e+00> : vector<8xf32>
    %156 = vector.multi_reduction <add>, %155, %cst_98 [1] : vector<8x64xf32> to vector<8xf32>
    %157 = vector.shape_cast %156 : vector<8xf32> to vector<8x1xf32>
    %c19 = arith.constant 19 : index
    %c0_99 = arith.constant 0 : index
    %158 = vector.load %arg21[%c19, %c0_99] : memref<20x512xf32, #tpu.memory_space<vmem>>, vector<1x1xf32>
    %159 = vector.broadcast %158 : vector<1x1xf32> to vector<8x1xf32>
    %160 = arith.addf %157, %159 : vector<8x1xf32>
    %161 = vector.shape_cast %160 : vector<8x1xf32> to vector<8x1xf32>
    %162 = vector.broadcast %161 : vector<8x1xf32> to vector<8x128xf32>
    %c0_100 = arith.constant 0 : index
    %c0_101 = arith.constant 0 : index
    %163 = vector.load %arg22[%c0_100, %c0_101] : memref<8x128xf32, #tpu.memory_space<vmem>>, vector<8x128xf32>
    tpu.vector_store %arg22[%c0_100, %c0_101], %162 {strides = array<i32>} : memref<8x128xf32, #tpu.memory_space<vmem>>, vector<8x128xf32>,
    return
  }
}

</mosaic_0001>

<bundles_post_ra>
// kernel: mlp20_forward.1
= control target key start
LH: loop header
LB: loop body
LE: loop exit
PB: predicated region body
PF: predicated region fallthrough
CT: control target
= control target key end

     0   :  { %s10743_s0 = inlined_call_operand.vmem [shape: bf16[8,64], index: 0, kind: input, shape index: {}]   ;;  %s10744_s1 = inlined_call_operand.hbm [shape: bf16[64,128], index: 1, kind: input, shape index: {}]   ;;  %s10745_s2 = inlined_call_operand.hbm [shape: bf16[128,128], index: 2, kind: input, shape index: {}]   ;;  %s10746_s3 = inlined_call_operand.hbm [shape: bf16[128,128], index: 3, kind: input, shape index: {}]   ;;  %s10747_s4 = inlined_call_operand.hbm [shape: bf16[128,256], index: 4, kind: input, shape index: {}]   ;;  %s10748_s5 = inlined_call_operand.hbm [shape: bf16[256,256], index: 5, kind: input, shape index: {}]   ;;  %s10749_s6 = inlined_call_operand.hbm [shape: bf16[256,256], index: 6, kind: input, shape index: {}]   ;;  %s10750_s7 = inlined_call_operand.hbm [shape: bf16[256,512], index: 7, kind: input, shape index: {}]   ;;  %s10751_s8 = inlined_call_operand.hbm [shape: bf16[512,512], index: 8, kind: input, shape index: {}]   ;;  %s10752_s9 = inlined_call_operand.hbm [shape: bf16[512,512], index: 9, kind: input, shape index: {}]   ;;  %s10753_s10 = inlined_call_operand.hbm [shape: bf16[512,512], index: 10, kind: input, shape index: {}]   ;;  %s10754_s11 = inlined_call_operand.hbm [shape: bf16[512,512], index: 11, kind: input, shape index: {}]   ;;  %s10755_s12 = inlined_call_operand.hbm [shape: bf16[512,256], index: 12, kind: input, shape index: {}]   ;;  %s10756_s13 = inlined_call_operand.vmem [shape: bf16[256,256], index: 13, kind: input, shape index: {}]   ;;  %s10757_s14 = inlined_call_operand.hbm [shape: bf16[256,256], index: 14, kind: input, shape index: {}]   ;;  %s10758_s15 = inlined_call_operand.hbm [shape: bf16[256,128], index: 15, kind: input, shape index: {}]   ;;  %s10759_s16 = inlined_call_operand.hbm [shape: bf16[128,128], index: 16, kind: input, shape index: {}]   ;;  %s10760_s17 = inlined_call_operand.hbm [shape: bf16[128,128], index: 17, kind: input, shape index: {}]   ;;  %s10761_s18 = inlined_call_operand.hbm [shape: bf16[128,128], index: 18, kind: input, shape index: {}]   ;;  %s10762_s19 = inlined_call_operand.vmem [shape: bf16[128,64], index: 19, kind: input, shape index: {}]   ;;  %s10763_s20 = inlined_call_operand.vmem [shape: bf16[1,64], index: 20, kind: input, shape index: {}]   ;;  %s10764_s21 = inlined_call_operand.hbm [shape: f32[20,512], index: 21, kind: input, shape index: {}]   ;;  %s10765_s22 = inlined_call_operand.vmem [shape: f32[8,128], index: 22, kind: output, shape index: {}]  }
   0x1   :  { %10776 = sst [smem:[#allocation40_spill]] %s10743_s0 }
   0x2   :  { %10777 = sst [smem:[#allocation41_spill]] %s10744_s1 }
   0x3   :  { %10778 = sst [smem:[#allocation42_spill]] %s10745_s2 }
   0x4   :  { %10779 = sst [smem:[#allocation43_spill]] %s10746_s3 }
   0x5   :  { %10780 = sst [smem:[#allocation44_spill]] %s10747_s4 }
   0x6   :  { %10781 = sst [smem:[#allocation45_spill]] %s10748_s5 }
   0x7   :  { %10782 = sst [smem:[#allocation46_spill]] %s10749_s6 }
   0x8   :  { %10783 = sst [smem:[#allocation47_spill]] %s10763_s20 }
   0x9   :  { %10784 = sst [smem:[#allocation48_spill]] %s10765_s22 }
   0xa   :  { %27 = vsyncpa [#allocation3], 0 }
   0xb   :  { %28 = vsyncpa [#allocation5], 0 }
   0xc   :  { %29 = vsyncpa [#allocation8], 0 }
   0xd   :  { %30 = vsyncpa [#allocation11], 0 }
   0xe   :  { %31 = vsyncpa [#allocation14], 0 }
   0xf   :  { %32 = vsyncpa [#allocation17], 0 }
  0x10   :  { %33 = vsyncpa [#allocation20], 0 }
  0x11   :  { %34 = vsyncpa [#allocation23], 0 }
  0x12   :  { %35 = vsyncpa [#allocation26], 0 }
  0x13   :  { %36 = vsyncpa [#allocation29], 0  ;;  %s10036_s3 = smov [#allocation4]   ;;  %s10037_s29 = smov [#allocation7]  }
  0x14   :  { %s56_s28 = sshll.u32 %s10036_s3, 4  ;;  %s80_s30 = sshll.u32 %s10037_s29, 4  ;;  %s57_s28 = int_to_ptr.vmem [resolvable:$true] %s56_s28  ;;  %s10180_s30 = int_to_ptr.vmem [resolvable:$true] %s80_s30 }
  0x15   :  { %s10785_s23 = sld [smem:[#allocation42_spill]] }
  0x1b   :  { %s9620_s1 = scalar_lea.hbm %s10785_s23, 1024 }
  0x1c   :  { %p9621_p0 = scmp.ne.s32.totalorder %s10785_s23, %s9620_s1  ;;  %p9624_p1 = scmp.lt.u32.totalorder %s9620_s1, %s10785_s23 }
  0x1e   :  { %p9626_p2 = pnand %p9624_p1, %p9621_p0 }
  0x20   :  { %9629 = shalt.err (!%p9626_p2)
}
  0x21   :  { %s9630_s26 = scalar_lea.vmem %s57_s28, 1024  ;;  %p9635_p4 = scmp.lt.s32.totalorder %s57_s28, %s57_s28 }
  0x22   :  { %p9631_p3 = scmp.ne.s32.totalorder %s57_s28, %s9630_s26  ;;  %p9636_p5 = scmp.lt.s32.totalorder %s9630_s26, %s9630_s26 }
  0x24   :  { %p9637_p6 = por %p9636_p5, %p9635_p4 }
  0x26   :  { %p9638_p7 = pnand %p9637_p6, %p9631_p3 }
  0x28   :  { %9641 = shalt.err (!%p9638_p7)
}
  0x29   :  { %s10772_s2 = smov 64   ;;  %s10774_s27 = smov 4  }
  0x2a   :  { %62 = dma.hbm_to_vmem [thread:$0]  %s10785_s23, 1024, %s57_s28, [#allocation5], %s10772_s2, %s10772_s2, %s10774_s27  }
  0x2b   :  { %s10786_s1 = sld [smem:[#allocation44_spill]] }
  0x31   :  { %s9642_s5 = scalar_lea.hbm %s10786_s1, 2048 }
  0x32   :  { %p9643_p8 = scmp.ne.s32.totalorder %s10786_s1, %s9642_s5  ;;  %p9646_p9 = scmp.lt.u32.totalorder %s9642_s5, %s10786_s1 }
  0x34   :  { %p9648_p10 = pnand %p9646_p9, %p9643_p8 }
  0x36   :  { %9651 = shalt.err (!%p9648_p10)
}
  0x37   :  { %s9652_s22 = scalar_lea.vmem %s10180_s30, 2048  ;;  %p9657_p12 = scmp.lt.s32.totalorder %s10180_s30, %s10180_s30 }
  0x38   :  { %p9653_p11 = scmp.ne.s32.totalorder %s10180_s30, %s9652_s22  ;;  %p9658_p13 = scmp.lt.s32.totalorder %s9652_s22, %s9652_s22 }
  0x3a   :  { %p9659_p0 = por %p9658_p13, %p9657_p12 }
  0x3c   :  { %p9660_p1 = pnand %p9659_p0, %p9653_p11 }
  0x3e   :  { %9663 = shalt.err (!%p9660_p1)
}
  0x3f   :  { %s10040_s28 = smov 128   ;;  %s10041_s23 = smov 8  }
  0x40   :  { %86 = dma.hbm_to_vmem [thread:$0]  %s10786_s1, 2048, %s10180_s30, [#allocation8], %s10040_s28, %s10040_s28, %s10041_s23  }
  0x41   :  { %s10042_s4 = smov [#allocation10]   ;;  %s10787_s6 = sld [smem:[#allocation46_spill]] }
  0x42   :  { %s104_s0 = sshll.u32 %s10042_s4, 4  ;;  %s105_s0 = int_to_ptr.vmem [resolvable:$true] %s104_s0 }
  0x47   :  { %s9664_s22 = scalar_lea.hbm %s10787_s6, 4096 }
  0x48   :  { %p9665_p2 = scmp.ne.s32.totalorder %s10787_s6, %s9664_s22  ;;  %p9668_p3 = scmp.lt.u32.totalorder %s9664_s22, %s10787_s6 }
  0x4a   :  { %p9670_p4 = pnand %p9668_p3, %p9665_p2 }
  0x4c   :  { %9673 = shalt.err (!%p9670_p4)
}
  0x4d   :  { %s9674_s20 = scalar_lea.vmem %s105_s0, 4096  ;;  %p9679_p6 = scmp.lt.s32.totalorder %s105_s0, %s105_s0 }
  0x4e   :  { %p9675_p5 = scmp.ne.s32.totalorder %s105_s0, %s9674_s20  ;;  %p9680_p7 = scmp.lt.s32.totalorder %s9674_s20, %s9674_s20 }
  0x50   :  { %p9681_p8 = por %p9680_p7, %p9679_p6 }
  0x52   :  { %p9682_p9 = pnand %p9681_p8, %p9675_p5 }
  0x54   :  { %9685 = shalt.err (!%p9682_p9)
}
  0x55   :  { %110 = dma.hbm_to_vmem [thread:$0]  %s10787_s6, 4096, %s105_s0, [#allocation11], %s10040_s28, %s10040_s28, %s10041_s23  }
  0x56   :  { %s10043_s3 = smov [#allocation13]   ;;  %s10044_s2 = smov [#allocation16]  }
  0x57   :  { %s128_s29 = sshll.u32 %s10043_s3, 4  ;;  %s152_s27 = sshll.u32 %s10044_s2, 4  ;;  %s129_s29 = int_to_ptr.vmem [resolvable:$true] %s128_s29  ;;  %s153_s27 = int_to_ptr.vmem [resolvable:$true] %s152_s27 }
  0x58   :  { %s9686_s24 = scalar_lea.hbm %s10751_s8, 16384 }
  0x59   :  { %p9687_p10 = scmp.ne.s32.totalorder %s10751_s8, %s9686_s24  ;;  %p9690_p11 = scmp.lt.u32.totalorder %s9686_s24, %s10751_s8 }
  0x5b   :  { %p9692_p12 = pnand %p9690_p11, %p9687_p10 }
  0x5d   :  { %9695 = shalt.err (!%p9692_p12)
}
  0x5e   :  { %s9696_s0 = scalar_lea.vmem %s129_s29, 16384  ;;  %p9701_p0 = scmp.lt.s32.totalorder %s129_s29, %s129_s29 }
  0x5f   :  { %p9697_p13 = scmp.ne.s32.totalorder %s129_s29, %s9696_s0  ;;  %p9702_p1 = scmp.lt.s32.totalorder %s9696_s0, %s9696_s0 }
  0x61   :  { %p9703_p2 = por %p9702_p1, %p9701_p0 }
  0x63   :  { %p9704_p3 = pnand %p9703_p2, %p9697_p13 }
  0x65   :  { %9707 = shalt.err (!%p9704_p3)
}
  0x66   :  { %s10045_s6 = smov 256   ;;  %s10046_s30 = smov 16  }
  0x67   :  { %134 = dma.hbm_to_vmem [thread:$0]  %s10751_s8, 16384, %s129_s29, [#allocation14], %s10045_s6, %s10045_s6, %s10046_s30  }
  0x68   :  { %s9708_s5 = scalar_lea.hbm %s10753_s10, 16384 }
  0x69   :  { %p9709_p4 = scmp.ne.s32.totalorder %s10753_s10, %s9708_s5  ;;  %p9712_p5 = scmp.lt.u32.totalorder %s9708_s5, %s10753_s10 }
  0x6b   :  { %p9714_p6 = pnand %p9712_p5, %p9709_p4 }
  0x6d   :  { %9717 = shalt.err (!%p9714_p6)
}
  0x6e   :  { %s9718_s26 = scalar_lea.vmem %s153_s27, 16384  ;;  %p9723_p8 = scmp.lt.s32.totalorder %s153_s27, %s153_s27 }
  0x6f   :  { %p9719_p7 = scmp.ne.s32.totalorder %s153_s27, %s9718_s26  ;;  %p9724_p9 = scmp.lt.s32.totalorder %s9718_s26, %s9718_s26 }
  0x71   :  { %p9725_p10 = por %p9724_p9, %p9723_p8 }
  0x73   :  { %p9726_p11 = pnand %p9725_p10, %p9719_p7 }
  0x75   :  { %9729 = shalt.err (!%p9726_p11)
}
  0x76   :  { %158 = dma.hbm_to_vmem [thread:$0]  %s10753_s10, 16384, %s153_s27, [#allocation17], %s10045_s6, %s10045_s6, %s10046_s30  }
  0x77   :  { %s10047_s0 = smov [#allocation19]   ;;  %s10048_s3 = smov [#allocation22]  }
  0x78   :  { %s176_s1 = sshll.u32 %s10047_s0, 4  ;;  %s202_s2 = sshll.u32 %s10048_s3, 4  ;;  %s177_s1 = int_to_ptr.vmem [resolvable:$true] %s176_s1  ;;  %s203_s2 = int_to_ptr.vmem [resolvable:$true] %s202_s2 }
  0x79   :  { %s9730_s24 = scalar_lea.hbm %s10755_s12, 8192 }
  0x7a   :  { %p9731_p12 = scmp.ne.s32.totalorder %s10755_s12, %s9730_s24  ;;  %p9734_p13 = scmp.lt.u32.totalorder %s9730_s24, %s10755_s12 }
  0x7c   :  { %p9736_p0 = pnand %p9734_p13, %p9731_p12 }
  0x7e   :  { %9739 = shalt.err (!%p9736_p0)
}
  0x7f   :  { %s9740_s10 = scalar_lea.vmem %s177_s1, 8192  ;;  %p9745_p2 = scmp.lt.s32.totalorder %s177_s1, %s177_s1 }
  0x80   :  { %p9741_p1 = scmp.ne.s32.totalorder %s177_s1, %s9740_s10  ;;  %p9746_p3 = scmp.lt.s32.totalorder %s9740_s10, %s9740_s10 }
  0x82   :  { %p9747_p4 = por %p9746_p3, %p9745_p2 }
  0x84   :  { %p9748_p5 = pnand %p9747_p4, %p9741_p1 }
  0x86   :  { %9751 = shalt.err (!%p9748_p5)
}
  0x87   :  { %182 = dma.hbm_to_vmem [thread:$0]  %s10755_s12, 8192, %s177_s1, [#allocation20], %s10040_s28, %s10040_s28, %s10041_s23  }
  0x88   :  { %s9752_s3 = scalar_lea.hbm %s10758_s15, 2048 }
  0x89   :  { %p9753_p6 = scmp.ne.s32.totalorder %s10758_s15, %s9752_s3  ;;  %p9756_p7 = scmp.lt.u32.totalorder %s9752_s3, %s10758_s15 }
  0x8b   :  { %p9758_p8 = pnand %p9756_p7, %p9753_p6 }
  0x8d   :  { %9761 = shalt.err (!%p9758_p8)
}
  0x8e   :  { %s9762_s22 = scalar_lea.vmem %s203_s2, 2048  ;;  %p9767_p10 = scmp.lt.s32.totalorder %s203_s2, %s203_s2 }
  0x8f   :  { %p9763_p9 = scmp.ne.s32.totalorder %s203_s2, %s9762_s22  ;;  %p9768_p11 = scmp.lt.s32.totalorder %s9762_s22, %s9762_s22 }
  0x91   :  { %p9769_p12 = por %p9768_p11, %p9767_p10 }
  0x93   :  { %p9770_p13 = pnand %p9769_p12, %p9763_p9 }
  0x95   :  { %9773 = shalt.err (!%p9770_p13)
}
  0x96   :  { %s10788_s12 = smov 4   ;;  %s10789_s1 = smov 64  }
  0x97   :  { %208 = dma.hbm_to_vmem [thread:$0]  %s10758_s15, 2048, %s203_s2, [#allocation23], %s10789_s1, %s10789_s1, %s10788_s12  }
  0x98   :  { %s10049_s10 = smov [#allocation25]   ;;  %s10050_s8 = smov [#allocation2]  }
  0x99   :  { %s226_s27 = sshll.u32 %s10049_s10, 4  ;;  %s44_s29 = sshll.u32 %s10050_s8, 4  ;;  %s227_s27 = int_to_ptr.vmem [resolvable:$true] %s226_s27  ;;  %s45_s29 = int_to_ptr.vmem [resolvable:$true] %s44_s29 }
  0x9a   :  { %s9774_s4 = scalar_lea.hbm %s10760_s17, 1024 }
  0x9b   :  { %p9775_p0 = scmp.ne.s32.totalorder %s10760_s17, %s9774_s4  ;;  %p9778_p1 = scmp.lt.u32.totalorder %s9774_s4, %s10760_s17 }
  0x9d   :  { %p9780_p2 = pnand %p9778_p1, %p9775_p0 }
  0x9f   :  { %9783 = shalt.err (!%p9780_p2)
}
  0xa0   :  { %s9784_s15 = scalar_lea.vmem %s227_s27, 1024  ;;  %p9789_p4 = scmp.lt.s32.totalorder %s227_s27, %s227_s27 }
  0xa1   :  { %p9785_p3 = scmp.ne.s32.totalorder %s227_s27, %s9784_s15  ;;  %p9790_p5 = scmp.lt.s32.totalorder %s9784_s15, %s9784_s15 }
  0xa3   :  { %p9791_p6 = por %p9790_p5, %p9789_p4 }
  0xa5   :  { %p9792_p7 = pnand %p9791_p6, %p9785_p3 }
  0xa7   :  { %9795 = shalt.err (!%p9792_p7)
}
  0xa8   :  { %232 = dma.hbm_to_vmem [thread:$0]  %s10760_s17, 1024, %s227_s27, [#allocation26], %s10789_s1, %s10789_s1, %s10788_s12  }
  0xa9   :  { %s10790_s8 = sld [smem:[#allocation41_spill]] }
  0xaf   :  { %s9796_s0 = scalar_lea.hbm %s10790_s8, 512 }
  0xb0   :  { %p9797_p8 = scmp.ne.s32.totalorder %s10790_s8, %s9796_s0  ;;  %p9800_p9 = scmp.lt.u32.totalorder %s9796_s0, %s10790_s8 }
  0xb2   :  { %p9802_p10 = pnand %p9800_p9, %p9797_p8 }
  0xb4   :  { %9805 = shalt.err (!%p9802_p10)
}
  0xb5   :  { %s9806_s20 = scalar_lea.vmem %s45_s29, 512  ;;  %p9811_p12 = scmp.lt.s32.totalorder %s45_s29, %s45_s29 }
  0xb6   :  { %p9807_p11 = scmp.ne.s32.totalorder %s45_s29, %s9806_s20  ;;  %p9812_p13 = scmp.lt.s32.totalorder %s9806_s20, %s9806_s20 }
  0xb8   :  { %p9813_p0 = por %p9812_p13, %p9811_p12 }
  0xba   :  { %p9814_p1 = pnand %p9813_p0, %p9807_p11 }
  0xbc   :  { %9817 = shalt.err (!%p9814_p1)
}
  0xbd   :  { %50 = dma.hbm_to_vmem [thread:$0]  %s10790_s8, 512, %s45_s29, [#allocation3], %s10789_s1, %s10789_s1, %s10788_s12  }
  0xbe   :  { %s10051_s22 = smov [#allocation6]   ;;  %s10052_s2 = smov [#allocation9]  }
  0xbf   :  { %s68_s15 = sshll.u32 %s10051_s22, 4  ;;  %s92_s25 = sshll.u32 %s10052_s2, 4  ;;  %s69_s15 = int_to_ptr.vmem [resolvable:$true] %s68_s15  ;;  %s93_s25 = int_to_ptr.vmem [resolvable:$true] %s92_s25 }
  0xc0   :  { %s10791_s0 = sld [smem:[#allocation43_spill]] }
  0xc6   :  { %s9818_s3 = scalar_lea.hbm %s10791_s0, 1024 }
  0xc7   :  { %p9819_p2 = scmp.ne.s32.totalorder %s10791_s0, %s9818_s3  ;;  %p9822_p3 = scmp.lt.u32.totalorder %s9818_s3, %s10791_s0 }
  0xc9   :  { %p9824_p4 = pnand %p9822_p3, %p9819_p2 }
  0xcb   :  { %9827 = shalt.err (!%p9824_p4)
}
  0xcc   :  { %s9828_s29 = scalar_lea.vmem %s69_s15, 1024  ;;  %p9833_p6 = scmp.lt.s32.totalorder %s69_s15, %s69_s15 }
  0xcd   :  { %p9829_p5 = scmp.ne.s32.totalorder %s69_s15, %s9828_s29  ;;  %p9834_p7 = scmp.lt.s32.totalorder %s9828_s29, %s9828_s29 }
  0xcf   :  { %p9835_p8 = por %p9834_p7, %p9833_p6 }
  0xd1   :  { %p9836_p9 = pnand %p9835_p8, %p9829_p5 }
  0xd3   :  { %9839 = shalt.err (!%p9836_p9)
}
  0xd4   :  { %74 = dma.hbm_to_vmem [thread:$0]  %s10791_s0, 1024, %s69_s15, [#allocation5], %s10789_s1, %s10789_s1, %s10788_s12  }
  0xd5   :  { %s10792_s2 = sld [smem:[#allocation45_spill]] }
  0xdb   :  { %s9840_s26 = scalar_lea.hbm %s10792_s2, 4096 }
  0xdc   :  { %p9841_p10 = scmp.ne.s32.totalorder %s10792_s2, %s9840_s26  ;;  %p9844_p11 = scmp.lt.u32.totalorder %s9840_s26, %s10792_s2 }
  0xde   :  { %p9846_p12 = pnand %p9844_p11, %p9841_p10 }
  0xe0   :  { %9849 = shalt.err (!%p9846_p12)
}
  0xe1   :  { %s9850_s24 = scalar_lea.vmem %s93_s25, 4096  ;;  %p9855_p0 = scmp.lt.s32.totalorder %s93_s25, %s93_s25 }
  0xe2   :  { %p9851_p13 = scmp.ne.s32.totalorder %s93_s25, %s9850_s24  ;;  %p9856_p1 = scmp.lt.s32.totalorder %s9850_s24, %s9850_s24 }
  0xe4   :  { %p9857_p2 = por %p9856_p1, %p9855_p0 }
  0xe6   :  { %p9858_p3 = pnand %p9857_p2, %p9851_p13 }
  0xe8   :  { %9861 = shalt.err (!%p9858_p3)
}
  0xe9   :  { %98 = dma.hbm_to_vmem [thread:$0]  %s10792_s2, 4096, %s93_s25, [#allocation8], %s10040_s28, %s10040_s28, %s10041_s23  }
  0xea   :  { %s10053_s20 = smov [#allocation12]   ;;  %s10054_s8 = smov [#allocation15]  }
  0xeb   :  { %s116_s29 = sshll.u32 %s10053_s20, 4  ;;  %s140_s17 = sshll.u32 %s10054_s8, 4  ;;  %s117_s29 = int_to_ptr.vmem [resolvable:$true] %s116_s29  ;;  %s141_s17 = int_to_ptr.vmem [resolvable:$true] %s140_s17 }
  0xec   :  { %s9862_s26 = scalar_lea.hbm %s10750_s7, 8192 }
  0xed   :  { %p9863_p4 = scmp.ne.s32.totalorder %s10750_s7, %s9862_s26  ;;  %p9866_p5 = scmp.lt.u32.totalorder %s9862_s26, %s10750_s7 }
  0xef   :  { %p9868_p6 = pnand %p9866_p5, %p9863_p4 }
  0xf1   :  { %9871 = shalt.err (!%p9868_p6)
}
  0xf2   :  { %s9872_s25 = scalar_lea.vmem %s117_s29, 8192  ;;  %p9877_p8 = scmp.lt.s32.totalorder %s117_s29, %s117_s29 }
  0xf3   :  { %p9873_p7 = scmp.ne.s32.totalorder %s117_s29, %s9872_s25  ;;  %p9878_p9 = scmp.lt.s32.totalorder %s9872_s25, %s9872_s25 }
  0xf5   :  { %p9879_p10 = por %p9878_p9, %p9877_p8 }
  0xf7   :  { %p9880_p11 = pnand %p9879_p10, %p9873_p7 }
  0xf9   :  { %9883 = shalt.err (!%p9880_p11)
}
  0xfa   :  { %122 = dma.hbm_to_vmem [thread:$0]  %s10750_s7, 8192, %s117_s29, [#allocation11], %s10045_s6, %s10045_s6, %s10046_s30  }
  0xfb   :  { %s9884_s20 = scalar_lea.hbm %s10752_s9, 16384 }
  0xfc   :  { %p9885_p12 = scmp.ne.s32.totalorder %s10752_s9, %s9884_s20  ;;  %p9888_p13 = scmp.lt.u32.totalorder %s9884_s20, %s10752_s9 }
  0xfe   :  { %p9890_p0 = pnand %p9888_p13, %p9885_p12 }
 0x100   :  { %9893 = shalt.err (!%p9890_p0)
}
 0x101   :  { %s9894_s10 = scalar_lea.vmem %s141_s17, 16384  ;;  %p9899_p2 = scmp.lt.s32.totalorder %s141_s17, %s141_s17 }
 0x102   :  { %p9895_p1 = scmp.ne.s32.totalorder %s141_s17, %s9894_s10  ;;  %p9900_p3 = scmp.lt.s32.totalorder %s9894_s10, %s9894_s10 }
 0x104   :  { %p9901_p4 = por %p9900_p3, %p9899_p2 }
 0x106   :  { %p9902_p5 = pnand %p9901_p4, %p9895_p1 }
 0x108   :  { %9905 = shalt.err (!%p9902_p5)
}
 0x109   :  { %146 = dma.hbm_to_vmem [thread:$0]  %s10752_s9, 16384, %s141_s17, [#allocation14], %s10045_s6, %s10045_s6, %s10046_s30  }
 0x10a   :  { %s10055_s3 = smov [#allocation18]   ;;  %s10056_s5 = smov [#allocation21]  }
 0x10b   :  { %s164_s4 = sshll.u32 %s10055_s3, 4  ;;  %s190_s25 = sshll.u32 %s10056_s5, 4  ;;  %s165_s4 = int_to_ptr.vmem [resolvable:$true] %s164_s4  ;;  %s191_s25 = int_to_ptr.vmem [resolvable:$true] %s190_s25 }
 0x10c   :  { %s9906_s15 = scalar_lea.hbm %s10754_s11, 16384 }
 0x10d   :  { %p9907_p6 = scmp.ne.s32.totalorder %s10754_s11, %s9906_s15  ;;  %p9910_p7 = scmp.lt.u32.totalorder %s9906_s15, %s10754_s11 }
 0x10f   :  { %p9912_p8 = pnand %p9910_p7, %p9907_p6 }
 0x111   :  { %9915 = shalt.err (!%p9912_p8)
}
 0x112   :  { %s9916_s9 = scalar_lea.vmem %s165_s4, 16384  ;;  %p9921_p10 = scmp.lt.s32.totalorder %s165_s4, %s165_s4 }
 0x113   :  { %p9917_p9 = scmp.ne.s32.totalorder %s165_s4, %s9916_s9  ;;  %p9922_p11 = scmp.lt.s32.totalorder %s9916_s9, %s9916_s9 }
 0x115   :  { %p9923_p12 = por %p9922_p11, %p9921_p10 }
 0x117   :  { %p9924_p13 = pnand %p9923_p12, %p9917_p9 }
 0x119   :  { %9927 = shalt.err (!%p9924_p13)
}
 0x11a   :  { %170 = dma.hbm_to_vmem [thread:$0]  %s10754_s11, 16384, %s165_s4, [#allocation17], %s10045_s6, %s10045_s6, %s10046_s30  }
 0x11b   :  { %s9928_s7 = scalar_lea.hbm %s10757_s14, 4096 }
 0x11c   :  { %p9929_p0 = scmp.ne.s32.totalorder %s10757_s14, %s9928_s7  ;;  %p9932_p1 = scmp.lt.u32.totalorder %s9928_s7, %s10757_s14 }
 0x11e   :  { %p9934_p2 = pnand %p9932_p1, %p9929_p0 }
 0x120   :  { %9937 = shalt.err (!%p9934_p2)
}
 0x121   :  { %s9938_s24 = scalar_lea.vmem %s191_s25, 4096  ;;  %p9943_p4 = scmp.lt.s32.totalorder %s191_s25, %s191_s25 }
 0x122   :  { %p9939_p3 = scmp.ne.s32.totalorder %s191_s25, %s9938_s24  ;;  %p9944_p5 = scmp.lt.s32.totalorder %s9938_s24, %s9938_s24 }
 0x124   :  { %p9945_p6 = por %p9944_p5, %p9943_p4 }
 0x126   :  { %p9946_p7 = pnand %p9945_p6, %p9939_p3 }
 0x128   :  { %9949 = shalt.err (!%p9946_p7)
}
 0x129   :  { %196 = dma.hbm_to_vmem [thread:$0]  %s10757_s14, 4096, %s191_s25, [#allocation20], %s10040_s28, %s10040_s28, %s10041_s23  }
 0x12a   :  { %s10057_s30 = smov [#allocation24]   ;;  %s10058_s15 = smov [#allocation27]  }
 0x12b   :  { %s214_s4 = sshll.u32 %s10057_s30, 4  ;;  %s238_s0 = sshll.u32 %s10058_s15, 4  ;;  %s215_s4 = int_to_ptr.vmem [resolvable:$true] %s214_s4  ;;  %s239_s0 = int_to_ptr.vmem [resolvable:$true] %s238_s0 }
 0x12c   :  { %s9950_s27 = scalar_lea.hbm %s10759_s16, 1024 }
 0x12d   :  { %p9951_p8 = scmp.ne.s32.totalorder %s10759_s16, %s9950_s27  ;;  %p9954_p9 = scmp.lt.u32.totalorder %s9950_s27, %s10759_s16 }
 0x12f   :  { %p9956_p10 = pnand %p9954_p9, %p9951_p8 }
 0x131   :  { %9959 = shalt.err (!%p9956_p10)
}
 0x132   :  { %s9960_s14 = scalar_lea.vmem %s215_s4, 1024  ;;  %p9965_p12 = scmp.lt.s32.totalorder %s215_s4, %s215_s4 }
 0x133   :  { %p9961_p11 = scmp.ne.s32.totalorder %s215_s4, %s9960_s14  ;;  %p9966_p13 = scmp.lt.s32.totalorder %s9960_s14, %s9960_s14 }
 0x135   :  { %p9967_p0 = por %p9966_p13, %p9965_p12 }
 0x137   :  { %p9968_p1 = pnand %p9967_p0, %p9961_p11 }
 0x139   :  { %9971 = shalt.err (!%p9968_p1)
}
 0x13a   :  { %220 = dma.hbm_to_vmem [thread:$0]  %s10759_s16, 1024, %s215_s4, [#allocation23], %s10789_s1, %s10789_s1, %s10788_s12  }
 0x13b   :  { %s9972_s7 = scalar_lea.hbm %s10761_s18, 1024 }
 0x13c   :  { %p9973_p2 = scmp.ne.s32.totalorder %s10761_s18, %s9972_s7  ;;  %p9976_p3 = scmp.lt.u32.totalorder %s9972_s7, %s10761_s18 }
 0x13e   :  { %p9978_p4 = pnand %p9976_p3, %p9973_p2 }
 0x140   :  { %9981 = shalt.err (!%p9978_p4)
}
 0x141   :  { %s9982_s24 = scalar_lea.vmem %s239_s0, 1024  ;;  %p9987_p6 = scmp.lt.s32.totalorder %s239_s0, %s239_s0 }
 0x142   :  { %p9983_p5 = scmp.ne.s32.totalorder %s239_s0, %s9982_s24  ;;  %p9988_p7 = scmp.lt.s32.totalorder %s9982_s24, %s9982_s24 }
 0x144   :  { %p9989_p8 = por %p9988_p7, %p9987_p6 }
 0x146   :  { %p9990_p9 = pnand %p9989_p8, %p9983_p5 }
 0x148   :  { %9993 = shalt.err (!%p9990_p9)
}
 0x149   :  { %244 = dma.hbm_to_vmem [thread:$0]  %s10761_s18, 1024, %s239_s0, [#allocation26], %s10789_s1, %s10789_s1, %s10788_s12  }
 0x14a   :  { %s10059_s6 = smov [#allocation28]   ;;  %s9994_s20 = scalar_lea.hbm %s10764_s21, 1536 }
 0x14b   :  { %s254_s30 = sshll.u32 %s10059_s6, 4  ;;  %p9995_p10 = scmp.ne.s32.totalorder %s10764_s21, %s9994_s20  ;;  %s255_s30 = int_to_ptr.vmem [resolvable:$true] %s254_s30 }
 0x14c   :  { %p9998_p11 = scmp.lt.u32.totalorder %s9994_s20, %s10764_s21 }
 0x14e   :  { %p10000_p12 = pnand %p9998_p11, %p9995_p10 }
 0x150   :  { %10003 = shalt.err (!%p10000_p12)
}
 0x151   :  { %s10004_s22 = scalar_lea.vmem %s255_s30, 1536  ;;  %p10009_p0 = scmp.lt.s32.totalorder %s255_s30, %s255_s30 }
 0x152   :  { %p10005_p13 = scmp.ne.s32.totalorder %s255_s30, %s10004_s22  ;;  %p10010_p1 = scmp.lt.s32.totalorder %s10004_s22, %s10004_s22 }
 0x154   :  { %p10011_p2 = por %p10010_p1, %p10009_p0 }
 0x156   :  { %p10012_p3 = pnand %p10011_p2, %p10005_p13 }
 0x158   :  { %10015 = shalt.err (!%p10012_p3)
}
 0x159   :  { %s10060_s18 = smov 512   ;;  %s10061_s12 = smov 32  }
 0x15a   :  { %260 = dma.hbm_to_vmem [thread:$0]  %s10764_s21, 1536, %s255_s30, [#allocation29], %s10060_s18, %s10060_s18, %s10061_s12  }
 0x15b   :  { %10016 = dma.done.wait [#allocation3], 512  }
 0x15c   :  { %10017 = vsyncadd [#allocation3], 4294966784 }
 0x15d   :  { %10018 = dma.done.wait [#allocation5], 2048  }
 0x15e   :  { %10019 = vsyncadd [#allocation5], 4294965248 }
 0x15f   :  { %10020 = dma.done.wait [#allocation8], 6144  }
 0x160   :  { %10021 = vsyncadd [#allocation8], 4294961152 }
 0x161   :  { %10022 = dma.done.wait [#allocation11], 12288  }
 0x162   :  { %10023 = vsyncadd [#allocation11], 4294955008 }
 0x163   :  { %10024 = dma.done.wait [#allocation14], 32768  }
 0x164   :  { %10025 = vsyncadd [#allocation14], 4294934528 }
 0x165   :  { %10026 = dma.done.wait [#allocation17], 32768  }
 0x166   :  { %10027 = vsyncadd [#allocation17], 4294934528 }
 0x167   :  { %10028 = dma.done.wait [#allocation20], 12288  }
 0x168   :  { %10029 = vsyncadd [#allocation20], 4294955008 }
 0x169   :  { %10030 = dma.done.wait [#allocation23], 3072  }
 0x16a   :  { %10031 = vsyncadd [#allocation23], 4294964224 }
 0x16b   :  { %10032 = dma.done.wait [#allocation26], 2048  }
 0x16c   :  { %10033 = vsyncadd [#allocation26], 4294965248 }
 0x16d   :  { %10034 = dma.done.wait [#allocation29], 1536  }
 0x16e   :  { %10035 = vsyncadd [#allocation29], 4294965760  ;;  %v10062_v0 = vmov 0.0   ;;  %vm10063_vm0 = vmmov 0   ;;  %v8376_v1 = vld [vmem:[#allocation2] sm:$0xff]   ;;  %v8377_v2 = vld [vmem:[#allocation2 + $0x8] sm:$0xff]  }
 0x16f   :  { %8160 = vmatprep.subr.bf16.mxu0 %v10062_v0  ;;  %8168 = vmatprep.mubr.msk.bf16.mxu0 %vm10063_vm0, %v10062_v0  ;;  %v8380_v3 = vld [vmem:[#allocation4] sm:$0xff]   ;;  %v8378_v4 = vld [vmem:[#allocation2 + $0x10] sm:$0xff]   ;;  %v8381_v5 = vld [vmem:[#allocation4 + $0x8] sm:$0xff]   ;;  %vm350_vm1 = vcmask 523264   ;;  %s10793_s14 = sld [smem:[#allocation40_spill]]  ;;  %v10064_v54 = vmov 0  }
 0x170   :  { %8172 = vmatprep.subr.bf16.mxu1 %v10062_v0  ;;  %8188 = vmatprep.mubr.msk.bf16.mxu1 %vm10063_vm0, %v10062_v0  ;;  %v8379_v6 = vld [vmem:[#allocation2 + $0x18] sm:$0xff]   ;;  %v8382_v7 = vld [vmem:[#allocation4 + $0x10] sm:$0xff]   ;;  %v8384_v10 = vld [vmem:[#allocation4 + $0x20] sm:$0xff]   ;;  %s10794_s12 = sld [smem:[#allocation47_spill]]  ;;  %s10795_s0 = sld [smem:[#allocation48_spill]] }
 0x171   :  { %8161 = vmatpush3.bf16.msra.mxu0 %v8376_v1  ;;  %8173 = vmatpush3.bf16.msra.mxu1 %v8380_v3  ;;  %v8383_v9 = vld [vmem:[#allocation4 + $0x18] sm:$0xff]   ;;  %v8385_v11 = vld [vmem:[#allocation4 + $0x28] sm:$0xff]   ;;  %v8386_v12 = vld [vmem:[#allocation4 + $0x30] sm:$0xff]  }
 0x172   :  { %8162 = vmatprep.subr.bf16.mxu0 %v10062_v0  ;;  %8174 = vmatprep.subr.bf16.mxu1 %v10062_v0  ;;  %v8387_v13 = vld [vmem:[#allocation4 + $0x38] sm:$0xff]   ;;  %v8388_v14 = vld [vmem:[#allocation6] sm:$0xff]   ;;  %v8389_v15 = vld [vmem:[#allocation6 + $0x8] sm:$0xff]  }
 0x173   :  { %v8390_v16 = vld [vmem:[#allocation6 + $0x10] sm:$0xff]   ;;  %v8391_v17 = vld [vmem:[#allocation6 + $0x18] sm:$0xff]   ;;  %v8392_v18 = vld [vmem:[#allocation6 + $0x20] sm:$0xff]   ;;  %8375 = vset.pattern.permute.xlu0 %v10064_v54 }
 0x174   :  { %v8393_v19 = vld [vmem:[#allocation6 + $0x28] sm:$0xff]   ;;  %v325_v20 = vld [vmem:[#allocation28] ss:$0 sm:$0xff]  ;;  %v8394_v28 = vld [vmem:[#allocation6 + $0x30] sm:$0xff]  }
 0x175   :  { %8163 = vmatpush3.bf16.msra.mxu0 %v8377_v2  ;;  %8175 = vmatpush3.bf16.msra.mxu1 %v8381_v5  ;;  %v316_v8 = vld [vmem:[%s10793_s14] sm:$0xf]  ;;  %v8395_v29 = vld [vmem:[#allocation6 + $0x38] sm:$0xff]   ;;  %v8398_v31 = vld [vmem:[#allocation7 + $0x4] ss:$8 sps:$4 sm:$0xff]  }
 0x176   :  { %8164 = vmatprep.subr.bf16.mxu0 %v10062_v0  ;;  %8176 = vmatprep.subr.bf16.mxu1 %v10062_v0  ;;  %v8396_v30 = vld [vmem:[#allocation7] ss:$8 sps:$4 sm:$0xff]   ;;  %v8401_v32 = vld [vmem:[#allocation7 + $0x14] ss:$8 sps:$4 sm:$0xff]   ;;  %v8399_v33 = vld [vmem:[#allocation7 + $0x10] ss:$8 sps:$4 sm:$0xff]  }
 0x177   :  { %v8404_v34 = vld [vmem:[#allocation7 + $0x24] ss:$8 sps:$4 sm:$0xff]   ;;  %v8402_v35 = vld [vmem:[#allocation7 + $0x20] ss:$8 sps:$4 sm:$0xff]   ;;  %v8407_v36 = vld [vmem:[#allocation7 + $0x34] ss:$8 sps:$4 sm:$0xff]  }
 0x178   :  { %v8405_v37 = vld [vmem:[#allocation7 + $0x30] ss:$8 sps:$4 sm:$0xff]   ;;  %v8410_v38 = vld [vmem:[#allocation7 + $0x44] ss:$8 sps:$4 sm:$0xff]   ;;  %v8408_v39 = vld [vmem:[#allocation7 + $0x40] ss:$8 sps:$4 sm:$0xff]  }
 0x179   :  { %8165 = vmatpush3.bf16.msra.mxu0 %v8378_v4  ;;  %8177 = vmatpush3.bf16.msra.mxu1 %v8382_v7  ;;  %v8413_v40 = vld [vmem:[#allocation7 + $0x54] ss:$8 sps:$4 sm:$0xff]   ;;  %v8411_v41 = vld [vmem:[#allocation7 + $0x50] ss:$8 sps:$4 sm:$0xff]   ;;  %v8416_v42 = vld [vmem:[#allocation7 + $0x64] ss:$8 sps:$4 sm:$0xff]  }
 0x17a   :  { %8166 = vmatprep.subr.bf16.mxu0 %v10062_v0  ;;  %8178 = vmatprep.subr.bf16.mxu1 %v10062_v0  ;;  %v8414_v43 = vld [vmem:[#allocation7 + $0x60] ss:$8 sps:$4 sm:$0xff]   ;;  %v8419_v52 = vld [vmem:[#allocation7 + $0x74] ss:$8 sps:$4 sm:$0xff]   ;;  %v8417_v53 = vld [vmem:[#allocation7 + $0x70] ss:$8 sps:$4 sm:$0xff]  }
 0x17b   :  { %v412_v44 = vld [vmem:[#allocation28 + $0x1] ss:$0 sm:$0xff]  ;;  %v8422_v56 = vld [vmem:[#allocation9 + $0x4] ss:$8 sps:$4 sm:$0xff]   ;;  %v8425_v57 = vld [vmem:[#allocation9 + $0x14] ss:$8 sps:$4 sm:$0xff]  }
 0x17c   :  { %v8420_v55 = vld [vmem:[#allocation9] ss:$8 sps:$4 sm:$0xff]   ;;  %v8423_v58 = vld [vmem:[#allocation9 + $0x10] ss:$8 sps:$4 sm:$0xff]   ;;  %v8428_v59 = vld [vmem:[#allocation9 + $0x24] ss:$8 sps:$4 sm:$0xff]  }
 0x17d   :  { %8167 = vmatpush3.bf16.msra.mxu0 %v8379_v6  ;;  %8179 = vmatpush3.bf16.msra.mxu1 %v8383_v9  ;;  %v8426_v60 = vld [vmem:[#allocation9 + $0x20] ss:$8 sps:$4 sm:$0xff]   ;;  %v8431_v61 = vld [vmem:[#allocation9 + $0x34] ss:$8 sps:$4 sm:$0xff]   ;;  %v8429_v62 = vld [vmem:[#allocation9 + $0x30] ss:$8 sps:$4 sm:$0xff]  }
 0x17e   :  { %8192 = vmatprep.subr.bf16.mxu0 %v10062_v0  ;;  %8180 = vmatprep.subr.bf16.mxu1 %v10062_v0  ;;  %v8434_v63 = vld [vmem:[#allocation9 + $0x44] ss:$8 sps:$4 sm:$0xff]   ;;  %v8432_v1 = vld [vmem:[#allocation9 + $0x40] ss:$8 sps:$4 sm:$0xff]   ;;  %v8437_v2 = vld [vmem:[#allocation9 + $0x54] ss:$8 sps:$4 sm:$0xff]  }
 0x17f   :  { %v8435_v3 = vld [vmem:[#allocation9 + $0x50] ss:$8 sps:$4 sm:$0xff]   ;;  %v8440_v4 = vld [vmem:[#allocation9 + $0x64] ss:$8 sps:$4 sm:$0xff]   ;;  %v8438_v5 = vld [vmem:[#allocation9 + $0x60] ss:$8 sps:$4 sm:$0xff]  }
 0x180   :  { %8169 = vmatmul.mubr.msk.bf16.vlgmr.msra.gmra.mrb[0].mxu0 %vm350_vm1, %v316_v8  ;;  %v8443_v6 = vld [vmem:[#allocation9 + $0x74] ss:$8 sps:$4 sm:$0xff]   ;;  %v8441_v7 = vld [vmem:[#allocation9 + $0x70] ss:$8 sps:$4 sm:$0xff]   ;;  %v8446_v8 = vld [vmem:[#allocation9 + $0x84] ss:$8 sps:$4 sm:$0xff]  }
 0x181   :  { %8208 = vmatprep.mubr.msk.bf16.mxu0 %vm10063_vm0, %v10062_v0  ;;  %8181 = vmatpush3.bf16.msra.mxu1 %v8384_v10  ;;  %v8444_v9 = vld [vmem:[#allocation9 + $0x80] ss:$8 sps:$4 sm:$0xff]   ;;  %v8449_v10 = vld [vmem:[#allocation9 + $0x94] ss:$8 sps:$4 sm:$0xff]  }
 0x182   :  { %8182 = vmatprep.subr.bf16.mxu1 %v10062_v0  ;;  %8193 = vmatpush3.bf16.msra.mxu0 %v8388_v14  ;;  %v8455_v14 = vld [vmem:[#allocation9 + $0xb4] ss:$8 sps:$4 sm:$0xff]  }
 0x183   :  { %8194 = vmatprep.subr.bf16.mxu0 %v10062_v0 }
 0x185   :  { %8183 = vmatpush3.bf16.msra.mxu1 %v8385_v11  ;;  %v8447_v11 = vld [vmem:[#allocation9 + $0x90] ss:$8 sps:$4 sm:$0xff]  }
 0x186   :  { %8184 = vmatprep.subr.bf16.mxu1 %v10062_v0  ;;  %8195 = vmatpush3.bf16.msra.mxu0 %v8389_v15  ;;  %v8453_v15 = vld [vmem:[#allocation9 + $0xb0] ss:$8 sps:$4 sm:$0xff]  }
 0x187   :  { %8196 = vmatprep.subr.bf16.mxu0 %v10062_v0 }
 0x189   :  { %8185 = vmatpush3.bf16.msra.mxu1 %v8386_v12  ;;  %v8452_v12 = vld [vmem:[#allocation9 + $0xa4] ss:$8 sps:$4 sm:$0xff]  }
 0x18a   :  { %8186 = vmatprep.subr.bf16.mxu1 %v10062_v0  ;;  %8197 = vmatpush3.bf16.msra.mxu0 %v8390_v16  ;;  %v8458_v16 = vld [vmem:[#allocation9 + $0xc4] ss:$8 sps:$4 sm:$0xff]  }
 0x18b   :  { %8198 = vmatprep.subr.bf16.mxu0 %v10062_v0 }
 0x18d   :  { %8187 = vmatpush3.bf16.msra.mxu1 %v8387_v13  ;;  %v8450_v13 = vld [vmem:[#allocation9 + $0xa0] ss:$8 sps:$4 sm:$0xff]  }
 0x18e   :  { %8199 = vmatpush3.bf16.msra.mxu0 %v8391_v17  ;;  %719 = vmatprep.subr.bf16.mxu1 %v8398_v31  ;;  %v8456_v17 = vld [vmem:[#allocation9 + $0xc0] ss:$8 sps:$4 sm:$0xff]   ;;  %v8465_v31 = vld [vmem:[#allocation9 + $0xf0] ss:$8 sps:$4 sm:$0xff]  }
 0x18f   :  { %8200 = vmatprep.subr.bf16.mxu0 %v10062_v0 }
 0x192   :  { %8201 = vmatpush3.bf16.msra.mxu0 %v8392_v18  ;;  %v8461_v18 = vld [vmem:[#allocation9 + $0xd4] ss:$8 sps:$4 sm:$0xff]  }
 0x193   :  { %8202 = vmatprep.subr.bf16.mxu0 %v10062_v0 }
 0x196   :  { %8203 = vmatpush3.bf16.msra.mxu0 %v8393_v19  ;;  %v8459_v19 = vld [vmem:[#allocation9 + $0xd0] ss:$8 sps:$4 sm:$0xff]  }
 0x197   :  { %8204 = vmatprep.subr.bf16.mxu0 %v10062_v0 }
 0x19a   :  { %8205 = vmatpush3.bf16.msra.mxu0 %v8394_v28  ;;  %v8464_v28 = vld [vmem:[#allocation9 + $0xe4] ss:$8 sps:$4 sm:$0xff]  }
 0x19b   :  { %8206 = vmatprep.subr.bf16.mxu0 %v10062_v0 }
 0x19e   :  { %8207 = vmatpush3.bf16.msra.mxu0 %v8395_v29  ;;  %v8462_v29 = vld [vmem:[#allocation9 + $0xe0] ss:$8 sps:$4 sm:$0xff]  }
 0x19f   :  { %969 = vmatprep.subr.bf16.mxu0 %v8422_v56  ;;  %v8506_v56 = vld [vmem:[#allocation10 + $0xc4] ss:$8 sps:$4 sm:$0xff]  }
 0x253   :  { %v388_v21 = vpop.f32.mrb[0].mxu0 }
 0x254   :  { %v389_v22 = vadd.f32 %v388_v21, %v325_v20  ;;  %v8170_v23 = vpop.f32.mrb[1].mxu0  ;;  %v519_v20 = vld [vmem:[#allocation28 + $0x2] ss:$0 sm:$0xff] }
 0x255   :  { %v391_v24 = vpop.f32.mrb[2].mxu0 }
 0x256   :  { %v394_v25 = vmax.f32 %v389_v22, 0.0  ;;  %v8171_v26 = vpop.f32.mrb[3].mxu0 }
 0x258   :  { %v395_v27 = vpack.c.bf16 %v394_v25, %v394_v25 }
 0x25a   :  { %8189 = vmatmul.mubr.bf16.vlgmr.msra.gmra.mrb[0].mxu1 %v395_v27 }
 0x25b   :  { %720 = vmatpush1.bf16.msra.mxu1 %v8396_v30  ;;  %751 = vmatprep.mubr.bf16.mxu1 %v10064_v54  ;;  %v8467_v30 = vld [vmem:[#allocation9 + $0xf4] ss:$8 sps:$4 sm:$0xff]  }
 0x25c   :  { %721 = vmatprep.subr.bf16.mxu1 %v8401_v32  ;;  %v8468_v32 = vld [vmem:[#allocation10] ss:$8 sps:$4 sm:$0xff]   ;;  %v8503_v54 = vld [vmem:[#allocation10 + $0xb4] ss:$8 sps:$4 sm:$0xff]  }
 0x25f   :  { %722 = vmatpush1.bf16.msra.mxu1 %v8399_v33  ;;  %v8470_v33 = vld [vmem:[#allocation10 + $0x4] ss:$8 sps:$4 sm:$0xff]  }
 0x260   :  { %723 = vmatprep.subr.bf16.mxu1 %v8404_v34  ;;  %v8473_v34 = vld [vmem:[#allocation10 + $0x14] ss:$8 sps:$4 sm:$0xff]  }
 0x263   :  { %724 = vmatpush1.bf16.msra.mxu1 %v8402_v35  ;;  %v8471_v35 = vld [vmem:[#allocation10 + $0x10] ss:$8 sps:$4 sm:$0xff]  }
 0x264   :  { %725 = vmatprep.subr.bf16.mxu1 %v8407_v36  ;;  %v8476_v36 = vld [vmem:[#allocation10 + $0x24] ss:$8 sps:$4 sm:$0xff]  }
 0x267   :  { %726 = vmatpush1.bf16.msra.mxu1 %v8405_v37  ;;  %v8474_v37 = vld [vmem:[#allocation10 + $0x20] ss:$8 sps:$4 sm:$0xff]  }
 0x268   :  { %727 = vmatprep.subr.bf16.mxu1 %v8410_v38  ;;  %v8479_v38 = vld [vmem:[#allocation10 + $0x34] ss:$8 sps:$4 sm:$0xff]  }
 0x26b   :  { %728 = vmatpush1.bf16.msra.mxu1 %v8408_v39  ;;  %v8477_v39 = vld [vmem:[#allocation10 + $0x30] ss:$8 sps:$4 sm:$0xff]  }
 0x26c   :  { %729 = vmatprep.subr.bf16.mxu1 %v8413_v40  ;;  %v8482_v40 = vld [vmem:[#allocation10 + $0x44] ss:$8 sps:$4 sm:$0xff]  }
 0x26f   :  { %730 = vmatpush1.bf16.msra.mxu1 %v8411_v41  ;;  %v8480_v41 = vld [vmem:[#allocation10 + $0x40] ss:$8 sps:$4 sm:$0xff]  }
 0x270   :  { %731 = vmatprep.subr.bf16.mxu1 %v8416_v42  ;;  %v8485_v42 = vld [vmem:[#allocation10 + $0x54] ss:$8 sps:$4 sm:$0xff]  }
 0x273   :  { %732 = vmatpush1.bf16.msra.mxu1 %v8414_v43  ;;  %v8483_v43 = vld [vmem:[#allocation10 + $0x50] ss:$8 sps:$4 sm:$0xff]  }
 0x274   :  { %733 = vmatprep.subr.bf16.mxu1 %v8419_v52  ;;  %v8500_v52 = vld [vmem:[#allocation10 + $0xa4] ss:$8 sps:$4 sm:$0xff]  }
 0x277   :  { %734 = vmatpush1.bf16.msra.mxu1 %v8417_v53  ;;  %v8498_v53 = vld [vmem:[#allocation10 + $0xa0] ss:$8 sps:$4 sm:$0xff]  }
 0x278   :  { %1219 = vmatprep.subr.bf16.mxu1 %v8470_v33  ;;  %v8560_v33 = vld [vmem:[#allocation12 + $0xe4] ss:$16 sps:$4 sm:$0xff]  }
 0x32d   :  { %v495_v45 = vpop.f32.mrb[0].mxu1 }
 0x32e   :  { %v496_v46 = vadd.f32 %v495_v45, %v412_v44  ;;  %v8190_v47 = vpop.f32.mrb[1].mxu1  ;;  %v8488_v44 = vld [vmem:[#allocation10 + $0x64] ss:$8 sps:$4 sm:$0xff]   ;;  %v8486_v45 = vld [vmem:[#allocation10 + $0x60] ss:$8 sps:$4 sm:$0xff]  }
 0x32f   :  { %v498_v48 = vpop.f32.mrb[2].mxu1  ;;  %v8489_v47 = vld [vmem:[#allocation10 + $0x70] ss:$8 sps:$4 sm:$0xff]  }
 0x330   :  { %v501_v49 = vmax.f32 %v496_v46, 0.0  ;;  %v8191_v50 = vpop.f32.mrb[3].mxu1  ;;  %v8491_v46 = vld [vmem:[#allocation10 + $0x74] ss:$8 sps:$4 sm:$0xff]   ;;  %v8494_v48 = vld [vmem:[#allocation10 + $0x84] ss:$8 sps:$4 sm:$0xff]  }
 0x331   :  { %v8497_v50 = vld [vmem:[#allocation10 + $0x94] ss:$8 sps:$4 sm:$0xff]  }
 0x332   :  { %v502_v51 = vpack.c.bf16 %v501_v49, %v501_v49  ;;  %v8492_v49 = vld [vmem:[#allocation10 + $0x80] ss:$8 sps:$4 sm:$0xff]  }
 0x334   :  { %8209 = vmatmul.mubr.bf16.vlgmr.msra.gmra.mrb[4].mxu0 %v502_v51  ;;  %v8495_v51 = vld [vmem:[#allocation10 + $0x90] ss:$8 sps:$4 sm:$0xff]  }
 0x335   :  { %970 = vmatpush1.bf16.msra.mxu0 %v8420_v55  ;;  %v8501_v55 = vld [vmem:[#allocation10 + $0xb0] ss:$8 sps:$4 sm:$0xff]  }
 0x336   :  { %971 = vmatprep.subr.bf16.mxu0 %v8425_v57  ;;  %v8504_v57 = vld [vmem:[#allocation10 + $0xc0] ss:$8 sps:$4 sm:$0xff]  }
 0x339   :  { %972 = vmatpush1.bf16.msra.mxu0 %v8423_v58  ;;  %v8509_v58 = vld [vmem:[#allocation10 + $0xd4] ss:$8 sps:$4 sm:$0xff]  }
 0x33a   :  { %973 = vmatprep.subr.bf16.mxu0 %v8428_v59  ;;  %v8507_v59 = vld [vmem:[#allocation10 + $0xd0] ss:$8 sps:$4 sm:$0xff]  }
 0x33d   :  { %974 = vmatpush1.bf16.msra.mxu0 %v8426_v60  ;;  %v629_v60 = vlaneseq }
 0x33e   :  { %975 = vmatprep.subr.bf16.mxu0 %v8431_v61 }
 0x33f   :  { %v10484_v61 = vshrl.u32 %v629_v60, 7 }
 0x341   :  { %976 = vmatpush1.bf16.msra.mxu0 %v8429_v62  ;;  %v10487_v62 = vsub.s32 0, %v10484_v61 }
 0x342   :  { %977 = vmatprep.subr.bf16.mxu0 %v8434_v63  ;;  %v627_v63 = vld [vmem:[#allocation28 + $0x3] ss:$8 sm:$0x3] }
 0x345   :  { %978 = vmatpush1.bf16.msra.mxu0 %v8432_v1  ;;  %v10490_v1 = vsub.s32 1, %v10484_v61 }
 0x346   :  { %979 = vmatprep.subr.bf16.mxu0 %v8437_v2  ;;  %v632_v2 = vrot.slane %v627_v63, %v10487_v62 }
 0x349   :  { %980 = vmatpush1.bf16.msra.mxu0 %v8435_v3  ;;  %v636_v3 = vrot.slane %v627_v63, %v10490_v1  ;;  %v8527_v63 = vld [vmem:[#allocation12 + $0x2c] ss:$16 sps:$4 sm:$0xff]  }
 0x34a   :  { %981 = vmatprep.subr.bf16.mxu0 %v8440_v4 }
 0x34d   :  { %982 = vmatpush1.bf16.msra.mxu0 %v8438_v5 }
 0x34e   :  { %983 = vmatprep.subr.bf16.mxu0 %v8443_v6 }
 0x351   :  { %984 = vmatpush1.bf16.msra.mxu0 %v8441_v7 }
 0x352   :  { %985 = vmatprep.subr.bf16.mxu0 %v8446_v8 }
 0x355   :  { %986 = vmatpush1.bf16.msra.mxu0 %v8444_v9 }
 0x356   :  { %987 = vmatprep.subr.bf16.mxu0 %v8449_v10 }
 0x359   :  { %988 = vmatpush1.bf16.msra.mxu0 %v8447_v11 }
 0x35a   :  { %989 = vmatprep.subr.bf16.mxu0 %v8452_v12 }
 0x35d   :  { %990 = vmatpush1.bf16.msra.mxu0 %v8450_v13 }
 0x35e   :  { %991 = vmatprep.subr.bf16.mxu0 %v8455_v14  ;;  %v8512_v14 = vld [vmem:[#allocation10 + $0xe4] ss:$8 sps:$4 sm:$0xff]  }
 0x361   :  { %992 = vmatpush1.bf16.msra.mxu0 %v8453_v15  ;;  %v8510_v15 = vld [vmem:[#allocation10 + $0xe0] ss:$8 sps:$4 sm:$0xff]  }
 0x362   :  { %993 = vmatprep.subr.bf16.mxu0 %v8458_v16  ;;  %v8515_v16 = vld [vmem:[#allocation10 + $0xf4] ss:$8 sps:$4 sm:$0xff]  }
 0x365   :  { %994 = vmatpush1.bf16.msra.mxu0 %v8456_v17  ;;  %v8513_v17 = vld [vmem:[#allocation10 + $0xf0] ss:$8 sps:$4 sm:$0xff]  }
 0x366   :  { %995 = vmatprep.subr.bf16.mxu0 %v8461_v18  ;;  %v8516_v18 = vld [vmem:[#allocation12] ss:$16 sps:$4 sm:$0xff]  }
 0x369   :  { %996 = vmatpush1.bf16.msra.mxu0 %v8459_v19  ;;  %v8518_v19 = vld [vmem:[#allocation12 + $0x4] ss:$16 sps:$4 sm:$0xff]  }
 0x36a   :  { %997 = vmatprep.subr.bf16.mxu0 %v8464_v28  ;;  %v8540_v28 = vld [vmem:[#allocation12 + $0x80] ss:$16 sps:$4 sm:$0xff]  }
 0x36d   :  { %998 = vmatpush1.bf16.msra.mxu0 %v8462_v29  ;;  %v8548_v29 = vld [vmem:[#allocation12 + $0xa4] ss:$16 sps:$4 sm:$0xff]  }
 0x36e   :  { %999 = vmatprep.subr.bf16.mxu0 %v8467_v30  ;;  %v8546_v30 = vld [vmem:[#allocation12 + $0xa0] ss:$16 sps:$4 sm:$0xff]  }
 0x371   :  { %1000 = vmatpush1.bf16.msra.mxu0 %v8465_v31  ;;  %v8554_v31 = vld [vmem:[#allocation12 + $0xc4] ss:$16 sps:$4 sm:$0xff]  }
 0x372   :  { %1671 = vmatprep.subr.bf16.mxu0 %v8518_v19  ;;  %v8581_v19 = vld [vmem:[#allocation12 + $0x14c] ss:$16 sps:$4 sm:$0xff]  }
 0x407   :  { %v602_v21 = vpop.f32.mrb[4].mxu0 }
 0x408   :  { %v603_v22 = vadd.f32 %v602_v21, %v519_v20  ;;  %v8210_v23 = vpop.f32.mrb[5].mxu0  ;;  %v8521_v20 = vld [vmem:[#allocation12 + $0xc] ss:$16 sps:$4 sm:$0xff]   ;;  %v8524_v21 = vld [vmem:[#allocation12 + $0x24] ss:$16 sps:$4 sm:$0xff]  }
 0x409   :  { %v605_v24 = vpop.f32.mrb[6].mxu0  ;;  %v8530_v23 = vld [vmem:[#allocation12 + $0x44] ss:$16 sps:$4 sm:$0xff]  }
 0x40a   :  { %v608_v25 = vmax.f32 %v603_v22, 0.0  ;;  %v8211_v26 = vpop.f32.mrb[7].mxu0  ;;  %v8522_v22 = vld [vmem:[#allocation12 + $0x20] ss:$16 sps:$4 sm:$0xff]  }
 0x40b   :  { %v8528_v24 = vld [vmem:[#allocation12 + $0x40] ss:$16 sps:$4 sm:$0xff]  }
 0x40c   :  { %v609_v27 = vpack.c.bf16 %v608_v25, %v608_v25  ;;  %v8536_v25 = vld [vmem:[#allocation12 + $0x64] ss:$16 sps:$4 sm:$0xff]   ;;  %v8534_v26 = vld [vmem:[#allocation12 + $0x60] ss:$16 sps:$4 sm:$0xff]  }
 0x40e   :  { %752 = vmatmul.mubr.bf16.vlgmr.msra.gmra.mrb[4].mxu1 %v609_v27  ;;  %v8542_v27 = vld [vmem:[#allocation12 + $0x84] ss:$16 sps:$4 sm:$0xff]  }
 0x40f   :  { %1220 = vmatpush1.bf16.msra.mxu1 %v8468_v32  ;;  %v8552_v32 = vld [vmem:[#allocation12 + $0xc0] ss:$16 sps:$4 sm:$0xff]  }
 0x410   :  { %1221 = vmatprep.subr.bf16.mxu1 %v8473_v34  ;;  %v8558_v34 = vld [vmem:[#allocation12 + $0xe0] ss:$16 sps:$4 sm:$0xff]  }
 0x413   :  { %1222 = vmatpush1.bf16.msra.mxu1 %v8471_v35  ;;  %v8566_v35 = vld [vmem:[#allocation12 + $0x104] ss:$16 sps:$4 sm:$0xff]  }
 0x414   :  { %1223 = vmatprep.subr.bf16.mxu1 %v8476_v36  ;;  %v8564_v36 = vld [vmem:[#allocation12 + $0x100] ss:$16 sps:$4 sm:$0xff]  }
 0x417   :  { %1224 = vmatpush1.bf16.msra.mxu1 %v8474_v37  ;;  %v8572_v37 = vld [vmem:[#allocation12 + $0x124] ss:$16 sps:$4 sm:$0xff]  }
 0x418   :  { %1225 = vmatprep.subr.bf16.mxu1 %v8479_v38  ;;  %v8570_v38 = vld [vmem:[#allocation12 + $0x120] ss:$16 sps:$4 sm:$0xff]  }
 0x41b   :  { %1226 = vmatpush1.bf16.msra.mxu1 %v8477_v39  ;;  %v8578_v39 = vld [vmem:[#allocation12 + $0x144] ss:$16 sps:$4 sm:$0xff]  }
 0x41c   :  { %1227 = vmatprep.subr.bf16.mxu1 %v8482_v40  ;;  %v8576_v40 = vld [vmem:[#allocation12 + $0x140] ss:$16 sps:$4 sm:$0xff]  }
 0x41f   :  { %1228 = vmatpush1.bf16.msra.mxu1 %v8480_v41  ;;  %v8584_v41 = vld [vmem:[#allocation12 + $0x164] ss:$16 sps:$4 sm:$0xff]  }
 0x420   :  { %1229 = vmatprep.subr.bf16.mxu1 %v8485_v42  ;;  %v8582_v42 = vld [vmem:[#allocation12 + $0x160] ss:$16 sps:$4 sm:$0xff]  }
 0x423   :  { %1230 = vmatpush1.bf16.msra.mxu1 %v8483_v43  ;;  %v8590_v43 = vld [vmem:[#allocation12 + $0x184] ss:$16 sps:$4 sm:$0xff]  }
 0x424   :  { %1231 = vmatprep.subr.bf16.mxu1 %v8488_v44  ;;  %v8588_v44 = vld [vmem:[#allocation12 + $0x180] ss:$16 sps:$4 sm:$0xff]  }
 0x427   :  { %1232 = vmatpush1.bf16.msra.mxu1 %v8486_v45  ;;  %v8596_v45 = vld [vmem:[#allocation12 + $0x1a4] ss:$16 sps:$4 sm:$0xff]  }
 0x428   :  { %1233 = vmatprep.subr.bf16.mxu1 %v8491_v46  ;;  %v8594_v46 = vld [vmem:[#allocation12 + $0x1a0] ss:$16 sps:$4 sm:$0xff]  }
 0x42b   :  { %1234 = vmatpush1.bf16.msra.mxu1 %v8489_v47  ;;  %v797_v47 = vld [vmem:[#allocation28 + $0x4] ss:$8 sm:$0x3] }
 0x42c   :  { %1235 = vmatprep.subr.bf16.mxu1 %v8494_v48  ;;  %v802_v48 = vrot.slane %v797_v47, %v10487_v62 }
 0x42f   :  { %1236 = vmatpush1.bf16.msra.mxu1 %v8492_v49  ;;  %v806_v49 = vrot.slane %v797_v47, %v10490_v1 }
 0x430   :  { %1237 = vmatprep.subr.bf16.mxu1 %v8497_v50 }
 0x433   :  { %1238 = vmatpush1.bf16.msra.mxu1 %v8495_v51 }
 0x434   :  { %1239 = vmatprep.subr.bf16.mxu1 %v8500_v52 }
 0x437   :  { %1240 = vmatpush1.bf16.msra.mxu1 %v8498_v53 }
 0x438   :  { %1241 = vmatprep.subr.bf16.mxu1 %v8503_v54 }
 0x43b   :  { %1242 = vmatpush1.bf16.msra.mxu1 %v8501_v55 }
 0x43c   :  { %1243 = vmatprep.subr.bf16.mxu1 %v8506_v56 }
 0x43f   :  { %1244 = vmatpush1.bf16.msra.mxu1 %v8504_v57 }
 0x440   :  { %1245 = vmatprep.subr.bf16.mxu1 %v8509_v58 }
 0x443   :  { %1246 = vmatpush1.bf16.msra.mxu1 %v8507_v59  ;;  %v8519_v59 = vld [vmem:[#allocation12 + $0x8] ss:$16 sps:$4 sm:$0xff]  }
 0x444   :  { %1247 = vmatprep.subr.bf16.mxu1 %v8512_v14  ;;  %v8561_v14 = vld [vmem:[#allocation12 + $0xe8] ss:$16 sps:$4 sm:$0xff]  }
 0x447   :  { %1248 = vmatpush1.bf16.msra.mxu1 %v8510_v15  ;;  %v8569_v15 = vld [vmem:[#allocation12 + $0x10c] ss:$16 sps:$4 sm:$0xff]  }
 0x448   :  { %1249 = vmatprep.subr.bf16.mxu1 %v8515_v16  ;;  %v8567_v16 = vld [vmem:[#allocation12 + $0x108] ss:$16 sps:$4 sm:$0xff]  }
 0x44b   :  { %1250 = vmatpush1.bf16.msra.mxu1 %v8513_v17  ;;  %v8575_v17 = vld [vmem:[#allocation12 + $0x12c] ss:$16 sps:$4 sm:$0xff]  }
 0x44c   :  { %1712 = vmatprep.subr.bf16.mxu1 %v8521_v20  ;;  %v8579_v20 = vld [vmem:[#allocation12 + $0x148] ss:$16 sps:$4 sm:$0xff]  }
 0x4e1   :  { %v753_v4 = vpop.f32.mrb[4].mxu1 }
 0x4e2   :  { %v754_v5 = vadd.f32 %v753_v4, %v632_v2  ;;  %v755_v6 = vpop.f32.mrb[5].mxu1  ;;  %v8525_v2 = vld [vmem:[#allocation12 + $0x28] ss:$16 sps:$4 sm:$0xff]  }
 0x4e3   :  { %v756_v7 = vadd.f32 %v755_v6, %v636_v3  ;;  %v757_v8 = vpop.f32.mrb[6].mxu1  ;;  %v8533_v3 = vld [vmem:[#allocation12 + $0x4c] ss:$16 sps:$4 sm:$0xff]   ;;  %v8531_v4 = vld [vmem:[#allocation12 + $0x48] ss:$16 sps:$4 sm:$0xff]  }
 0x4e4   :  { %v760_v9 = vmax.f32 %v754_v5, 0.0  ;;  %v758_v10 = vpop.f32.mrb[7].mxu1  ;;  %v8539_v5 = vld [vmem:[#allocation12 + $0x6c] ss:$16 sps:$4 sm:$0xff]   ;;  %v8537_v6 = vld [vmem:[#allocation12 + $0x68] ss:$16 sps:$4 sm:$0xff]  }
 0x4e5   :  { %v761_v11 = vmax.f32 %v756_v7, 0.0  ;;  %v8545_v7 = vld [vmem:[#allocation12 + $0x8c] ss:$16 sps:$4 sm:$0xff]   ;;  %v8543_v8 = vld [vmem:[#allocation12 + $0x88] ss:$16 sps:$4 sm:$0xff]  }
 0x4e6   :  { %v762_v13 = vpack.c.bf16 %v760_v9, %v760_v9  ;;  %v8551_v9 = vld [vmem:[#allocation12 + $0xac] ss:$16 sps:$4 sm:$0xff]   ;;  %v8549_v10 = vld [vmem:[#allocation12 + $0xa8] ss:$16 sps:$4 sm:$0xff]  }
 0x4e7   :  { %v763_v12 = vpack.c.bf16 %v761_v11, %v761_v11  ;;  %v8557_v11 = vld [vmem:[#allocation12 + $0xcc] ss:$16 sps:$4 sm:$0xff]  }
 0x4e9   :  { %1001 = vmatprep.mubr.bf16.mxu0 %v763_v12  ;;  %v8555_v12 = vld [vmem:[#allocation12 + $0xc8] ss:$16 sps:$4 sm:$0xff]  }
 0x4ea   :  { %1002 = vmatmul.mubr.bf16.vlgmr.msra.gmra.mrb[8].mxu0 %v762_v13  ;;  %v8563_v13 = vld [vmem:[#allocation12 + $0xec] ss:$16 sps:$4 sm:$0xff]  }
 0x4eb   :  { %1672 = vmatpush1.bf16.msra.mxu0 %v8516_v18  ;;  %v8573_v18 = vld [vmem:[#allocation12 + $0x128] ss:$16 sps:$4 sm:$0xff]  }
 0x4ec   :  { %1673 = vmatprep.subr.bf16.mxu0 %v8524_v21  ;;  %v8587_v21 = vld [vmem:[#allocation12 + $0x16c] ss:$16 sps:$4 sm:$0xff]  }
 0x4ef   :  { %1674 = vmatpush1.bf16.msra.mxu0 %v8522_v22  ;;  %v8585_v22 = vld [vmem:[#allocation12 + $0x168] ss:$16 sps:$4 sm:$0xff]  }
 0x4f0   :  { %1675 = vmatprep.subr.bf16.mxu0 %v8530_v23  ;;  %v8593_v23 = vld [vmem:[#allocation12 + $0x18c] ss:$16 sps:$4 sm:$0xff]  }
 0x4f3   :  { %1676 = vmatpush1.bf16.msra.mxu0 %v8528_v24  ;;  %v8591_v24 = vld [vmem:[#allocation12 + $0x188] ss:$16 sps:$4 sm:$0xff]  }
 0x4f4   :  { %1677 = vmatprep.subr.bf16.mxu0 %v8536_v25  ;;  %v8599_v25 = vld [vmem:[#allocation12 + $0x1ac] ss:$16 sps:$4 sm:$0xff]  }
 0x4f7   :  { %1678 = vmatpush1.bf16.msra.mxu0 %v8534_v26  ;;  %v8597_v26 = vld [vmem:[#allocation12 + $0x1a8] ss:$16 sps:$4 sm:$0xff]  }
 0x4f8   :  { %1679 = vmatprep.subr.bf16.mxu0 %v8542_v27  ;;  %v8602_v27 = vld [vmem:[#allocation12 + $0x1c4] ss:$16 sps:$4 sm:$0xff]  }
 0x4fb   :  { %1680 = vmatpush1.bf16.msra.mxu0 %v8540_v28  ;;  %v8605_v28 = vld [vmem:[#allocation12 + $0x1cc] ss:$16 sps:$4 sm:$0xff]  }
 0x4fc   :  { %1681 = vmatprep.subr.bf16.mxu0 %v8548_v29  ;;  %v8600_v29 = vld [vmem:[#allocation12 + $0x1c0] ss:$16 sps:$4 sm:$0xff]  }
 0x4ff   :  { %1682 = vmatpush1.bf16.msra.mxu0 %v8546_v30  ;;  %v8603_v30 = vld [vmem:[#allocation12 + $0x1c8] ss:$16 sps:$4 sm:$0xff]  }
 0x500   :  { %1683 = vmatprep.subr.bf16.mxu0 %v8554_v31  ;;  %v8608_v31 = vld [vmem:[#allocation12 + $0x1e4] ss:$16 sps:$4 sm:$0xff]  }
 0x503   :  { %1684 = vmatpush1.bf16.msra.mxu0 %v8552_v32  ;;  %v8611_v32 = vld [vmem:[#allocation12 + $0x1ec] ss:$16 sps:$4 sm:$0xff]  }
 0x504   :  { %1685 = vmatprep.subr.bf16.mxu0 %v8560_v33  ;;  %v8606_v33 = vld [vmem:[#allocation12 + $0x1e0] ss:$16 sps:$4 sm:$0xff]  }
 0x507   :  { %1686 = vmatpush1.bf16.msra.mxu0 %v8558_v34  ;;  %v8609_v34 = vld [vmem:[#allocation12 + $0x1e8] ss:$16 sps:$4 sm:$0xff]  }
 0x508   :  { %1687 = vmatprep.subr.bf16.mxu0 %v8566_v35  ;;  %v8614_v35 = vld [vmem:[#allocation13 + $0x4] ss:$16 sps:$4 sm:$0xff]  }
 0x50b   :  { %1688 = vmatpush1.bf16.msra.mxu0 %v8564_v36  ;;  %v8617_v36 = vld [vmem:[#allocation13 + $0xc] ss:$16 sps:$4 sm:$0xff]  }
 0x50c   :  { %1689 = vmatprep.subr.bf16.mxu0 %v8572_v37  ;;  %v1047_v37 = vld [vmem:[#allocation28 + $0x5] ss:$8 sm:$0x3] }
 0x50f   :  { %1690 = vmatpush1.bf16.msra.mxu0 %v8570_v38  ;;  %v1052_v38 = vrot.slane %v1047_v37, %v10487_v62 }
 0x510   :  { %1691 = vmatprep.subr.bf16.mxu0 %v8578_v39  ;;  %v1056_v39 = vrot.slane %v1047_v37, %v10490_v1  ;;  %v8689_v37 = vld [vmem:[#allocation13 + $0x18c] ss:$16 sps:$4 sm:$0xff]  }
 0x513   :  { %1692 = vmatpush1.bf16.msra.mxu0 %v8576_v40 }
 0x514   :  { %1693 = vmatprep.subr.bf16.mxu0 %v8584_v41 }
 0x517   :  { %1694 = vmatpush1.bf16.msra.mxu0 %v8582_v42 }
 0x518   :  { %1695 = vmatprep.subr.bf16.mxu0 %v8590_v43 }
 0x51b   :  { %1696 = vmatpush1.bf16.msra.mxu0 %v8588_v44 }
 0x51c   :  { %1697 = vmatprep.subr.bf16.mxu0 %v8596_v45 }
 0x51f   :  { %1698 = vmatpush1.bf16.msra.mxu0 %v8594_v46 }
 0x520   :  { %1699 = vmatprep.subr.bf16.mxu0 %v8602_v27  ;;  %v8669_v27 = vld [vmem:[#allocation13 + $0x128] ss:$16 sps:$4 sm:$0xff]  }
 0x523   :  { %1700 = vmatpush1.bf16.msra.mxu0 %v8600_v29  ;;  %v8677_v29 = vld [vmem:[#allocation13 + $0x14c] ss:$16 sps:$4 sm:$0xff]  }
 0x524   :  { %1701 = vmatprep.subr.bf16.mxu0 %v8608_v31  ;;  %v8675_v31 = vld [vmem:[#allocation13 + $0x148] ss:$16 sps:$4 sm:$0xff]  }
 0x527   :  { %1702 = vmatpush1.bf16.msra.mxu0 %v8606_v33  ;;  %v8683_v33 = vld [vmem:[#allocation13 + $0x16c] ss:$16 sps:$4 sm:$0xff]  }
 0x528   :  { %2552 = vmatprep.subr.bf16.mxu0 %v8614_v35  ;;  %v8681_v35 = vld [vmem:[#allocation13 + $0x168] ss:$16 sps:$4 sm:$0xff]  }
 0x5bd   :  { %v1003_v50 = vpop.f32.mrb[8].mxu0 }
 0x5be   :  { %v1004_v51 = vadd.f32 %v1003_v50, %v802_v48  ;;  %v1005_v52 = vpop.f32.mrb[9].mxu0  ;;  %v8615_v50 = vld [vmem:[#allocation13 + $0x8] ss:$16 sps:$4 sm:$0xff]  }
 0x5bf   :  { %v1006_v53 = vadd.f32 %v1005_v52, %v806_v49  ;;  %v1007_v54 = vpop.f32.mrb[10].mxu0  ;;  %v8612_v49 = vld [vmem:[#allocation13] ss:$16 sps:$4 sm:$0xff]   ;;  %v8620_v52 = vld [vmem:[#allocation13 + $0x24] ss:$16 sps:$4 sm:$0xff]  }
 0x5c0   :  { %v1010_v55 = vmax.f32 %v1004_v51, 0.0  ;;  %v1008_v56 = vpop.f32.mrb[11].mxu0  ;;  %v8618_v54 = vld [vmem:[#allocation13 + $0x20] ss:$16 sps:$4 sm:$0xff]  }
 0x5c1   :  { %v1011_v57 = vmax.f32 %v1006_v53, 0.0  ;;  %v8623_v53 = vld [vmem:[#allocation13 + $0x2c] ss:$16 sps:$4 sm:$0xff]   ;;  %v8626_v56 = vld [vmem:[#allocation13 + $0x44] ss:$16 sps:$4 sm:$0xff]  }
 0x5c2   :  { %v1012_v60 = vpack.c.bf16 %v1010_v55, %v1010_v55  ;;  %v8621_v55 = vld [vmem:[#allocation13 + $0x28] ss:$16 sps:$4 sm:$0xff]  }
 0x5c3   :  { %v1013_v58 = vpack.c.bf16 %v1011_v57, %v1011_v57  ;;  %v8629_v57 = vld [vmem:[#allocation13 + $0x4c] ss:$16 sps:$4 sm:$0xff]  }
 0x5c5   :  { %1251 = vmatprep.mubr.bf16.mxu1 %v1013_v58  ;;  %v8624_v58 = vld [vmem:[#allocation13 + $0x40] ss:$16 sps:$4 sm:$0xff]  }
 0x5c6   :  { %1252 = vmatmul.mubr.bf16.vlgmr.msra.gmra.mrb[8].mxu1 %v1012_v60  ;;  %v8632_v60 = vld [vmem:[#allocation13 + $0x64] ss:$16 sps:$4 sm:$0xff]  }
 0x5c7   :  { %1713 = vmatpush1.bf16.msra.mxu1 %v8519_v59  ;;  %v8627_v59 = vld [vmem:[#allocation13 + $0x48] ss:$16 sps:$4 sm:$0xff]  }
 0x5c8   :  { %1714 = vmatprep.subr.bf16.mxu1 %v8527_v63  ;;  %v8635_v63 = vld [vmem:[#allocation13 + $0x6c] ss:$16 sps:$4 sm:$0xff]  }
 0x5cb   :  { %1715 = vmatpush1.bf16.msra.mxu1 %v8525_v2  ;;  %v8630_v2 = vld [vmem:[#allocation13 + $0x60] ss:$16 sps:$4 sm:$0xff]  }
 0x5cc   :  { %1716 = vmatprep.subr.bf16.mxu1 %v8533_v3  ;;  %v8633_v3 = vld [vmem:[#allocation13 + $0x68] ss:$16 sps:$4 sm:$0xff]  }
 0x5cf   :  { %1717 = vmatpush1.bf16.msra.mxu1 %v8531_v4  ;;  %v8638_v4 = vld [vmem:[#allocation13 + $0x84] ss:$16 sps:$4 sm:$0xff]  }
 0x5d0   :  { %1718 = vmatprep.subr.bf16.mxu1 %v8539_v5  ;;  %v8641_v5 = vld [vmem:[#allocation13 + $0x8c] ss:$16 sps:$4 sm:$0xff]  }
 0x5d3   :  { %1719 = vmatpush1.bf16.msra.mxu1 %v8537_v6  ;;  %v8636_v6 = vld [vmem:[#allocation13 + $0x80] ss:$16 sps:$4 sm:$0xff]  }
 0x5d4   :  { %1720 = vmatprep.subr.bf16.mxu1 %v8545_v7  ;;  %v8639_v7 = vld [vmem:[#allocation13 + $0x88] ss:$16 sps:$4 sm:$0xff]  }
 0x5d7   :  { %1721 = vmatpush1.bf16.msra.mxu1 %v8543_v8  ;;  %v8644_v8 = vld [vmem:[#allocation13 + $0xa4] ss:$16 sps:$4 sm:$0xff]  }
 0x5d8   :  { %1722 = vmatprep.subr.bf16.mxu1 %v8551_v9  ;;  %v8647_v9 = vld [vmem:[#allocation13 + $0xac] ss:$16 sps:$4 sm:$0xff]  }
 0x5db   :  { %1723 = vmatpush1.bf16.msra.mxu1 %v8549_v10  ;;  %v8642_v10 = vld [vmem:[#allocation13 + $0xa0] ss:$16 sps:$4 sm:$0xff]  }
 0x5dc   :  { %1724 = vmatprep.subr.bf16.mxu1 %v8557_v11  ;;  %v8645_v11 = vld [vmem:[#allocation13 + $0xa8] ss:$16 sps:$4 sm:$0xff]  }
 0x5df   :  { %1725 = vmatpush1.bf16.msra.mxu1 %v8555_v12  ;;  %v8650_v12 = vld [vmem:[#allocation13 + $0xc4] ss:$16 sps:$4 sm:$0xff]  }
 0x5e0   :  { %1726 = vmatprep.subr.bf16.mxu1 %v8563_v13  ;;  %v8653_v13 = vld [vmem:[#allocation13 + $0xcc] ss:$16 sps:$4 sm:$0xff]  }
 0x5e3   :  { %1727 = vmatpush1.bf16.msra.mxu1 %v8561_v14  ;;  %v8648_v14 = vld [vmem:[#allocation13 + $0xc0] ss:$16 sps:$4 sm:$0xff]  }
 0x5e4   :  { %1728 = vmatprep.subr.bf16.mxu1 %v8569_v15  ;;  %v8651_v15 = vld [vmem:[#allocation13 + $0xc8] ss:$16 sps:$4 sm:$0xff]  }
 0x5e7   :  { %1729 = vmatpush1.bf16.msra.mxu1 %v8567_v16  ;;  %v8656_v16 = vld [vmem:[#allocation13 + $0xe4] ss:$16 sps:$4 sm:$0xff]  }
 0x5e8   :  { %1730 = vmatprep.subr.bf16.mxu1 %v8575_v17  ;;  %v8659_v17 = vld [vmem:[#allocation13 + $0xec] ss:$16 sps:$4 sm:$0xff]  }
 0x5eb   :  { %1731 = vmatpush1.bf16.msra.mxu1 %v8573_v18  ;;  %v8654_v18 = vld [vmem:[#allocation13 + $0xe0] ss:$16 sps:$4 sm:$0xff]  }
 0x5ec   :  { %1732 = vmatprep.subr.bf16.mxu1 %v8581_v19  ;;  %v8657_v19 = vld [vmem:[#allocation13 + $0xe8] ss:$16 sps:$4 sm:$0xff]  }
 0x5ef   :  { %1733 = vmatpush1.bf16.msra.mxu1 %v8579_v20  ;;  %v8662_v20 = vld [vmem:[#allocation13 + $0x104] ss:$16 sps:$4 sm:$0xff]  }
 0x5f0   :  { %1734 = vmatprep.subr.bf16.mxu1 %v8587_v21  ;;  %v8665_v21 = vld [vmem:[#allocation13 + $0x10c] ss:$16 sps:$4 sm:$0xff]  }
 0x5f3   :  { %1735 = vmatpush1.bf16.msra.mxu1 %v8585_v22  ;;  %v8660_v22 = vld [vmem:[#allocation13 + $0x100] ss:$16 sps:$4 sm:$0xff]  }
 0x5f4   :  { %1736 = vmatprep.subr.bf16.mxu1 %v8593_v23  ;;  %v8663_v23 = vld [vmem:[#allocation13 + $0x108] ss:$16 sps:$4 sm:$0xff]  }
 0x5f7   :  { %1737 = vmatpush1.bf16.msra.mxu1 %v8591_v24  ;;  %v8668_v24 = vld [vmem:[#allocation13 + $0x124] ss:$16 sps:$4 sm:$0xff]  }
 0x5f8   :  { %1738 = vmatprep.subr.bf16.mxu1 %v8599_v25  ;;  %v8671_v25 = vld [vmem:[#allocation13 + $0x12c] ss:$16 sps:$4 sm:$0xff]  }
 0x5fb   :  { %1739 = vmatpush1.bf16.msra.mxu1 %v8597_v26  ;;  %v8666_v26 = vld [vmem:[#allocation13 + $0x120] ss:$16 sps:$4 sm:$0xff]  }
 0x5fc   :  { %1740 = vmatprep.subr.bf16.mxu1 %v8605_v28  ;;  %v8674_v28 = vld [vmem:[#allocation13 + $0x144] ss:$16 sps:$4 sm:$0xff]  }
 0x5ff   :  { %1741 = vmatpush1.bf16.msra.mxu1 %v8603_v30  ;;  %v8672_v30 = vld [vmem:[#allocation13 + $0x140] ss:$16 sps:$4 sm:$0xff]  }
 0x600   :  { %1742 = vmatprep.subr.bf16.mxu1 %v8611_v32  ;;  %v8680_v32 = vld [vmem:[#allocation13 + $0x164] ss:$16 sps:$4 sm:$0xff]  }
 0x603   :  { %1743 = vmatpush1.bf16.msra.mxu1 %v8609_v34  ;;  %v8678_v34 = vld [vmem:[#allocation13 + $0x160] ss:$16 sps:$4 sm:$0xff]  }
 0x604   :  { %2634 = vmatprep.subr.bf16.mxu1 %v8617_v36  ;;  %v8686_v36 = vld [vmem:[#allocation13 + $0x184] ss:$16 sps:$4 sm:$0xff]  }
 0x699   :  { %v1253_v40 = vpop.f32.mrb[8].mxu1 }
 0x69a   :  { %v1254_v41 = vadd.f32 %v1253_v40, %v1052_v38  ;;  %v1255_v42 = vpop.f32.mrb[9].mxu1  ;;  %v8684_v38 = vld [vmem:[#allocation13 + $0x180] ss:$16 sps:$4 sm:$0xff]   ;;  %v8692_v40 = vld [vmem:[#allocation13 + $0x1a4] ss:$16 sps:$4 sm:$0xff]  }
 0x69b   :  { %v1256_v43 = vadd.f32 %v1255_v42, %v1056_v39  ;;  %v1257_v44 = vpop.f32.mrb[10].mxu1  ;;  %v8687_v39 = vld [vmem:[#allocation13 + $0x188] ss:$16 sps:$4 sm:$0xff]   ;;  %v8690_v42 = vld [vmem:[#allocation13 + $0x1a0] ss:$16 sps:$4 sm:$0xff]  }
 0x69c   :  { %v1260_v45 = vmax.f32 %v1254_v41, 0.0  ;;  %v1258_v46 = vpop.f32.mrb[11].mxu1  ;;  %v8695_v41 = vld [vmem:[#allocation13 + $0x1ac] ss:$16 sps:$4 sm:$0xff]   ;;  %v8698_v44 = vld [vmem:[#allocation13 + $0x1c4] ss:$16 sps:$4 sm:$0xff]  }
 0x69d   :  { %v1261_v47 = vmax.f32 %v1256_v43, 0.0  ;;  %v8693_v43 = vld [vmem:[#allocation13 + $0x1a8] ss:$16 sps:$4 sm:$0xff]   ;;  %v8696_v46 = vld [vmem:[#allocation13 + $0x1c0] ss:$16 sps:$4 sm:$0xff]  }
 0x69e   :  { %v1262_v51 = vpack.c.bf16 %v1260_v45, %v1260_v45  ;;  %v8701_v45 = vld [vmem:[#allocation13 + $0x1cc] ss:$16 sps:$4 sm:$0xff]  }
 0x69f   :  { %v1263_v48 = vpack.c.bf16 %v1261_v47, %v1261_v47  ;;  %v8699_v47 = vld [vmem:[#allocation13 + $0x1c8] ss:$16 sps:$4 sm:$0xff]  }
 0x6a1   :  { %1703 = vmatprep.mubr.bf16.mxu0 %v1263_v48  ;;  %1744 = vmatprep.mubr.bf16.mxu1 %v1263_v48  ;;  %v8704_v48 = vld [vmem:[#allocation13 + $0x1e4] ss:$16 sps:$4 sm:$0xff]  }
 0x6a2   :  { %1704 = vmatmul.mubr.bf16.vlgmr.msra.gmra.mrb[12].mxu0 %v1262_v51  ;;  %1745 = vmatmul.mubr.bf16.vlgmr.msra.gmra.mrb[12].mxu1 %v1262_v51  ;;  %v8705_v51 = vld [vmem:[#allocation13 + $0x1e8] ss:$16 sps:$4 sm:$0xff]  }
 0x6a3   :  { %2553 = vmatpush1.bf16.msra.mxu0 %v8612_v49  ;;  %2635 = vmatpush1.bf16.msra.mxu1 %v8615_v50  ;;  %v8707_v49 = vld [vmem:[#allocation13 + $0x1ec] ss:$16 sps:$4 sm:$0xff]   ;;  %v8702_v50 = vld [vmem:[#allocation13 + $0x1e0] ss:$16 sps:$4 sm:$0xff]  }
 0x6a4   :  { %2554 = vmatprep.subr.bf16.mxu0 %v8620_v52  ;;  %2636 = vmatprep.subr.bf16.mxu1 %v8623_v53  ;;  %v8710_v52 = vld [vmem:[#allocation13 + $0x204] ss:$16 sps:$4 sm:$0xff]   ;;  %v8713_v53 = vld [vmem:[#allocation13 + $0x20c] ss:$16 sps:$4 sm:$0xff]  }
 0x6a7   :  { %2555 = vmatpush1.bf16.msra.mxu0 %v8618_v54  ;;  %2637 = vmatpush1.bf16.msra.mxu1 %v8621_v55  ;;  %v10498_v54 = vld [vmem:[#allocation28 + $0x6] ss:$8 sm:$0xf]  ;;  %v10501_v55 = vsub.s32 3, %v10484_v61 }
 0x6a8   :  { %2556 = vmatprep.subr.bf16.mxu0 %v8626_v56  ;;  %2638 = vmatprep.subr.bf16.mxu1 %v8629_v57  ;;  %v1334_v56 = vrot.slane %v10498_v54, %v10487_v62  ;;  %v1338_v57 = vrot.slane %v10498_v54, %v10490_v1 }
 0x6ab   :  { %2557 = vmatpush1.bf16.msra.mxu0 %v8624_v58  ;;  %2639 = vmatpush1.bf16.msra.mxu1 %v8627_v59  ;;  %v1346_v58 = vrot.slane %v10498_v54, %v10501_v55 }
 0x6ac   :  { %2558 = vmatprep.subr.bf16.mxu0 %v8632_v60  ;;  %2640 = vmatprep.subr.bf16.mxu1 %v8635_v63 }
 0x6af   :  { %2559 = vmatpush1.bf16.msra.mxu0 %v8630_v2  ;;  %2641 = vmatpush1.bf16.msra.mxu1 %v8633_v3 }
 0x6b0   :  { %2560 = vmatprep.subr.bf16.mxu0 %v8638_v4  ;;  %2642 = vmatprep.subr.bf16.mxu1 %v8641_v5 }
 0x6b3   :  { %2561 = vmatpush1.bf16.msra.mxu0 %v8636_v6  ;;  %2643 = vmatpush1.bf16.msra.mxu1 %v8639_v7 }
 0x6b4   :  { %2562 = vmatprep.subr.bf16.mxu0 %v8644_v8  ;;  %2644 = vmatprep.subr.bf16.mxu1 %v8647_v9 }
 0x6b7   :  { %2563 = vmatpush1.bf16.msra.mxu0 %v8642_v10  ;;  %2645 = vmatpush1.bf16.msra.mxu1 %v8645_v11 }
 0x6b8   :  { %2564 = vmatprep.subr.bf16.mxu0 %v8650_v12  ;;  %2646 = vmatprep.subr.bf16.mxu1 %v8653_v13 }
 0x6bb   :  { %2565 = vmatpush1.bf16.msra.mxu0 %v8648_v14  ;;  %2647 = vmatpush1.bf16.msra.mxu1 %v8651_v15  ;;  %v8708_v14 = vld [vmem:[#allocation13 + $0x200] ss:$16 sps:$4 sm:$0xff]   ;;  %v8711_v15 = vld [vmem:[#allocation13 + $0x208] ss:$16 sps:$4 sm:$0xff]  }
 0x6bc   :  { %2566 = vmatprep.subr.bf16.mxu0 %v8656_v16  ;;  %2648 = vmatprep.subr.bf16.mxu1 %v8659_v17  ;;  %v8716_v17 = vld [vmem:[#allocation13 + $0x224] ss:$16 sps:$4 sm:$0xff]  }
 0x6bf   :  { %2567 = vmatpush1.bf16.msra.mxu0 %v8654_v18  ;;  %2649 = vmatpush1.bf16.msra.mxu1 %v8657_v19  ;;  %v8719_v18 = vld [vmem:[#allocation13 + $0x22c] ss:$16 sps:$4 sm:$0xff]  }
 0x6c0   :  { %2568 = vmatprep.subr.bf16.mxu0 %v8662_v20  ;;  %2650 = vmatprep.subr.bf16.mxu1 %v8665_v21  ;;  %v8714_v20 = vld [vmem:[#allocation13 + $0x220] ss:$16 sps:$4 sm:$0xff]   ;;  %v8717_v21 = vld [vmem:[#allocation13 + $0x228] ss:$16 sps:$4 sm:$0xff]  }
 0x6c3   :  { %2569 = vmatpush1.bf16.msra.mxu0 %v8660_v22  ;;  %2651 = vmatpush1.bf16.msra.mxu1 %v8663_v23  ;;  %v8722_v22 = vld [vmem:[#allocation13 + $0x244] ss:$16 sps:$4 sm:$0xff]   ;;  %v8725_v23 = vld [vmem:[#allocation13 + $0x24c] ss:$16 sps:$4 sm:$0xff]  }
 0x6c4   :  { %2570 = vmatprep.subr.bf16.mxu0 %v8668_v24  ;;  %2652 = vmatprep.subr.bf16.mxu1 %v8671_v25  ;;  %v8720_v24 = vld [vmem:[#allocation13 + $0x240] ss:$16 sps:$4 sm:$0xff]   ;;  %v8723_v25 = vld [vmem:[#allocation13 + $0x248] ss:$16 sps:$4 sm:$0xff]  }
 0x6c7   :  { %2571 = vmatpush1.bf16.msra.mxu0 %v8666_v26  ;;  %2653 = vmatpush1.bf16.msra.mxu1 %v8669_v27  ;;  %v8728_v26 = vld [vmem:[#allocation13 + $0x264] ss:$16 sps:$4 sm:$0xff]   ;;  %v8731_v27 = vld [vmem:[#allocation13 + $0x26c] ss:$16 sps:$4 sm:$0xff]  }
 0x6c8   :  { %2572 = vmatprep.subr.bf16.mxu0 %v8674_v28  ;;  %2654 = vmatprep.subr.bf16.mxu1 %v8677_v29  ;;  %v8726_v28 = vld [vmem:[#allocation13 + $0x260] ss:$16 sps:$4 sm:$0xff]   ;;  %v8729_v29 = vld [vmem:[#allocation13 + $0x268] ss:$16 sps:$4 sm:$0xff]  }
 0x6cb   :  { %2573 = vmatpush1.bf16.msra.mxu0 %v8672_v30  ;;  %2655 = vmatpush1.bf16.msra.mxu1 %v8675_v31  ;;  %v8734_v30 = vld [vmem:[#allocation13 + $0x284] ss:$16 sps:$4 sm:$0xff]   ;;  %v8737_v31 = vld [vmem:[#allocation13 + $0x28c] ss:$16 sps:$4 sm:$0xff]  }
 0x6cc   :  { %2574 = vmatprep.subr.bf16.mxu0 %v8680_v32  ;;  %2656 = vmatprep.subr.bf16.mxu1 %v8683_v33  ;;  %v8732_v32 = vld [vmem:[#allocation13 + $0x280] ss:$16 sps:$4 sm:$0xff]   ;;  %v8735_v33 = vld [vmem:[#allocation13 + $0x288] ss:$16 sps:$4 sm:$0xff]  }
 0x6cf   :  { %2575 = vmatpush1.bf16.msra.mxu0 %v8678_v34  ;;  %2657 = vmatpush1.bf16.msra.mxu1 %v8681_v35  ;;  %v8740_v34 = vld [vmem:[#allocation13 + $0x2a4] ss:$16 sps:$4 sm:$0xff]   ;;  %v8743_v35 = vld [vmem:[#allocation13 + $0x2ac] ss:$16 sps:$4 sm:$0xff]  }
 0x6d0   :  { %2576 = vmatprep.subr.bf16.mxu0 %v8686_v36  ;;  %2658 = vmatprep.subr.bf16.mxu1 %v8689_v37  ;;  %v8738_v36 = vld [vmem:[#allocation13 + $0x2a0] ss:$16 sps:$4 sm:$0xff]   ;;  %v8741_v37 = vld [vmem:[#allocation13 + $0x2a8] ss:$16 sps:$4 sm:$0xff]  }
 0x6d3   :  { %2577 = vmatpush1.bf16.msra.mxu0 %v8684_v38  ;;  %2659 = vmatpush1.bf16.msra.mxu1 %v8687_v39  ;;  %v8746_v38 = vld [vmem:[#allocation13 + $0x2c4] ss:$16 sps:$4 sm:$0xff]   ;;  %v8749_v39 = vld [vmem:[#allocation13 + $0x2cc] ss:$16 sps:$4 sm:$0xff]  }
 0x6d4   :  { %2578 = vmatprep.subr.bf16.mxu0 %v8692_v40  ;;  %2660 = vmatprep.subr.bf16.mxu1 %v8695_v41  ;;  %v8744_v40 = vld [vmem:[#allocation13 + $0x2c0] ss:$16 sps:$4 sm:$0xff]   ;;  %v8747_v41 = vld [vmem:[#allocation13 + $0x2c8] ss:$16 sps:$4 sm:$0xff]  }
 0x6d7   :  { %2579 = vmatpush1.bf16.msra.mxu0 %v8690_v42  ;;  %2661 = vmatpush1.bf16.msra.mxu1 %v8693_v43  ;;  %v8752_v42 = vld [vmem:[#allocation13 + $0x2e4] ss:$16 sps:$4 sm:$0xff]   ;;  %v8755_v43 = vld [vmem:[#allocation13 + $0x2ec] ss:$16 sps:$4 sm:$0xff]  }
 0x6d8   :  { %2580 = vmatprep.subr.bf16.mxu0 %v8698_v44  ;;  %2662 = vmatprep.subr.bf16.mxu1 %v8701_v45  ;;  %v8750_v44 = vld [vmem:[#allocation13 + $0x2e0] ss:$16 sps:$4 sm:$0xff]   ;;  %v8753_v45 = vld [vmem:[#allocation13 + $0x2e8] ss:$16 sps:$4 sm:$0xff]  }
 0x6db   :  { %2581 = vmatpush1.bf16.msra.mxu0 %v8696_v46  ;;  %2663 = vmatpush1.bf16.msra.mxu1 %v8699_v47  ;;  %v8758_v46 = vld [vmem:[#allocation13 + $0x304] ss:$16 sps:$4 sm:$0xff]   ;;  %v8761_v47 = vld [vmem:[#allocation13 + $0x30c] ss:$16 sps:$4 sm:$0xff]  }
 0x6dc   :  { %2582 = vmatprep.subr.bf16.mxu0 %v8704_v48  ;;  %2664 = vmatprep.subr.bf16.mxu1 %v8707_v49  ;;  %v8756_v48 = vld [vmem:[#allocation13 + $0x300] ss:$16 sps:$4 sm:$0xff]   ;;  %v8759_v49 = vld [vmem:[#allocation13 + $0x308] ss:$16 sps:$4 sm:$0xff]  }
 0x6df   :  { %2583 = vmatpush1.bf16.msra.mxu0 %v8702_v50  ;;  %2665 = vmatpush1.bf16.msra.mxu1 %v8705_v51  ;;  %v8764_v50 = vld [vmem:[#allocation13 + $0x324] ss:$16 sps:$4 sm:$0xff]   ;;  %v8767_v51 = vld [vmem:[#allocation13 + $0x32c] ss:$16 sps:$4 sm:$0xff]  }
 0x6e0   :  { %2593 = vmatprep.subr.bf16.mxu0 %v8710_v52  ;;  %2675 = vmatprep.subr.bf16.mxu1 %v8713_v53  ;;  %v8762_v52 = vld [vmem:[#allocation13 + $0x320] ss:$16 sps:$4 sm:$0xff]   ;;  %v8765_v53 = vld [vmem:[#allocation13 + $0x328] ss:$16 sps:$4 sm:$0xff]  }
 0x775   :  { %v1705_v59 = vpop.f32.mrb[12].mxu0  ;;  %v10509_v60 = vpop.f32.mrb[12].mxu1 }
 0x776   :  { %v1706_v63 = vadd.f32 %v1705_v59, %v1334_v56  ;;  %v1707_v2 = vpop.f32.mrb[13].mxu0  ;;  %v1748_v3 = vpop.f32.mrb[13].mxu1  ;;  %v8770_v56 = vld [vmem:[#allocation13 + $0x344] ss:$16 sps:$4 sm:$0xff]   ;;  %v8771_v59 = vld [vmem:[#allocation13 + $0x348] ss:$16 sps:$4 sm:$0xff]  }
 0x777   :  { %v1708_v4 = vadd.f32 %v1707_v2, %v1338_v57  ;;  %v1749_v5 = vadd.f32 %v1748_v3, %v1346_v58  ;;  %v1709_v6 = vpop.f32.mrb[14].mxu0  ;;  %v1750_v7 = vpop.f32.mrb[14].mxu1  ;;  %v8773_v57 = vld [vmem:[#allocation13 + $0x34c] ss:$16 sps:$4 sm:$0xff]   ;;  %v8768_v58 = vld [vmem:[#allocation13 + $0x340] ss:$16 sps:$4 sm:$0xff]  }
 0x778   :  { %v1753_v8 = vmax.f32 %v1706_v63, 0.0  ;;  %v1710_v9 = vpop.f32.mrb[15].mxu0  ;;  %v1751_v10 = vpop.f32.mrb[15].mxu1  ;;  %v8776_v63 = vld [vmem:[#allocation13 + $0x364] ss:$16 sps:$4 sm:$0xff]  }
 0x779   :  { %v1754_v11 = vmax.f32 %v1708_v4, 0.0  ;;  %v1756_v12 = vmax.f32 %v1749_v5, 0.0  ;;  %v8779_v2 = vld [vmem:[#allocation13 + $0x36c] ss:$16 sps:$4 sm:$0xff]   ;;  %v8774_v3 = vld [vmem:[#allocation13 + $0x360] ss:$16 sps:$4 sm:$0xff]  }
 0x77a   :  { %v1757_v16 = vpack.c.bf16 %v1753_v8, %v1753_v8  ;;  %v8777_v4 = vld [vmem:[#allocation13 + $0x368] ss:$16 sps:$4 sm:$0xff]   ;;  %v8782_v5 = vld [vmem:[#allocation13 + $0x384] ss:$16 sps:$4 sm:$0xff]   ;;  %v8785_v6 = vld [vmem:[#allocation13 + $0x38c] ss:$16 sps:$4 sm:$0xff]  }
 0x77b   :  { %v1758_v13 = vpack.c.bf16 %v1754_v11, %v1754_v11  ;;  %v1760_v19 = vpack.c.bf16 %v1756_v12, %v1756_v12  ;;  %v8780_v7 = vld [vmem:[#allocation13 + $0x380] ss:$16 sps:$4 sm:$0xff]   ;;  %v8783_v8 = vld [vmem:[#allocation13 + $0x388] ss:$16 sps:$4 sm:$0xff]   ;;  %v10512_v9 = vsub.s32 2, %v10484_v61 }
 0x77c   :  { %v8788_v10 = vld [vmem:[#allocation13 + $0x3a4] ss:$16 sps:$4 sm:$0xff]   ;;  %v8791_v11 = vld [vmem:[#allocation13 + $0x3ac] ss:$16 sps:$4 sm:$0xff]   ;;  %v8786_v12 = vld [vmem:[#allocation13 + $0x3a0] ss:$16 sps:$4 sm:$0xff]  }
 0x77d   :  { %2584 = vmatprep.mubr.bf16.mxu0 %v1758_v13  ;;  %2666 = vmatprep.mubr.bf16.mxu1 %v1758_v13  ;;  %v8789_v13 = vld [vmem:[#allocation13 + $0x3a8] ss:$16 sps:$4 sm:$0xff]  }
 0x77e   :  { %2585 = vmatmul.mubr.bf16.vlgmr.msra.gmra.mrb[16].mxu0 %v1757_v16  ;;  %2667 = vmatmul.mubr.bf16.vlgmr.msra.gmra.mrb[16].mxu1 %v1757_v16  ;;  %v8797_v16 = vld [vmem:[#allocation13 + $0x3cc] ss:$16 sps:$4 sm:$0xff]   ;;  %v8795_v61 = vld [vmem:[#allocation13 + $0x3c8] ss:$16 sps:$4 sm:$0xff]  }
 0x77f   :  { %2594 = vmatpush1.bf16.msra.mxu0 %v8708_v14  ;;  %2676 = vmatpush1.bf16.msra.mxu1 %v8711_v15  ;;  %v1342_v14 = vrot.slane %v10498_v54, %v10512_v9  ;;  %v8794_v15 = vld [vmem:[#allocation13 + $0x3c4] ss:$16 sps:$4 sm:$0xff]  }
 0x780   :  { %2625 = vmatprep.mubr.bf16.mxu0 %v1760_v19  ;;  %2707 = vmatprep.mubr.bf16.mxu1 %v1760_v19  ;;  %v8800_v19 = vld [vmem:[#allocation13 + $0x3e4] ss:$16 sps:$4 sm:$0xff]  }
 0x781   :  { %2595 = vmatprep.subr.bf16.mxu0 %v8716_v17  ;;  %2677 = vmatprep.subr.bf16.mxu1 %v8719_v18  ;;  %v8792_v17 = vld [vmem:[#allocation13 + $0x3c0] ss:$16 sps:$4 sm:$0xff]   ;;  %v1747_v18 = vadd.f32 %v10509_v60, %v1342_v14  ;;  %v8806_v54 = vld [vmem:[#allocation15 + $0x4] ss:$16 sps:$4 sm:$0xff]   ;;  %v8873_v14 = vld [vmem:[#allocation15 + $0x168] ss:$16 sps:$4 sm:$0xff]  }
 0x782   :  { %v8812_v60 = vld [vmem:[#allocation15 + $0x24] ss:$16 sps:$4 sm:$0xff]  }
 0x783   :  { %2596 = vmatpush1.bf16.msra.mxu0 %v8714_v20  ;;  %2678 = vmatpush1.bf16.msra.mxu1 %v8717_v21  ;;  %v8803_v20 = vld [vmem:[#allocation13 + $0x3ec] ss:$16 sps:$4 sm:$0xff]   ;;  %v8798_v21 = vld [vmem:[#allocation13 + $0x3e0] ss:$16 sps:$4 sm:$0xff]  }
 0x784   :  { %2597 = vmatprep.subr.bf16.mxu0 %v8722_v22  ;;  %2679 = vmatprep.subr.bf16.mxu1 %v8725_v23  ;;  %v8801_v22 = vld [vmem:[#allocation13 + $0x3e8] ss:$16 sps:$4 sm:$0xff]   ;;  %v1755_v23 = vmax.f32 %v1747_v18, 0.0  ;;  %v8884_v18 = vld [vmem:[#allocation15 + $0x1a4] ss:$16 sps:$4 sm:$0xff]  }
 0x787   :  { %2598 = vmatpush1.bf16.msra.mxu0 %v8720_v24  ;;  %2680 = vmatpush1.bf16.msra.mxu1 %v8723_v25  ;;  %v8809_v24 = vld [vmem:[#allocation15 + $0xc] ss:$16 sps:$4 sm:$0xff]   ;;  %v8804_v25 = vld [vmem:[#allocation15] ss:$16 sps:$4 sm:$0xff]  }
 0x788   :  { %2599 = vmatprep.subr.bf16.mxu0 %v8728_v26  ;;  %2681 = vmatprep.subr.bf16.mxu1 %v8731_v27  ;;  %v8807_v26 = vld [vmem:[#allocation15 + $0x8] ss:$16 sps:$4 sm:$0xff]   ;;  %v1759_v27 = vpack.c.bf16 %v1755_v23, %v1755_v23  ;;  %v8893_v23 = vld [vmem:[#allocation15 + $0x1cc] ss:$16 sps:$4 sm:$0xff]  }
 0x78b   :  { %2600 = vmatpush1.bf16.msra.mxu0 %v8726_v28  ;;  %2682 = vmatpush1.bf16.msra.mxu1 %v8729_v29  ;;  %v8815_v28 = vld [vmem:[#allocation15 + $0x2c] ss:$16 sps:$4 sm:$0xff]   ;;  %v8810_v29 = vld [vmem:[#allocation15 + $0x20] ss:$16 sps:$4 sm:$0xff]  }
 0x78c   :  { %2601 = vmatprep.subr.bf16.mxu0 %v8734_v30  ;;  %2683 = vmatprep.subr.bf16.mxu1 %v8737_v31  ;;  %v8813_v30 = vld [vmem:[#allocation15 + $0x28] ss:$16 sps:$4 sm:$0xff]   ;;  %v8818_v31 = vld [vmem:[#allocation15 + $0x44] ss:$16 sps:$4 sm:$0xff]  }
 0x78f   :  { %2602 = vmatpush1.bf16.msra.mxu0 %v8732_v32  ;;  %2684 = vmatpush1.bf16.msra.mxu1 %v8735_v33  ;;  %v8821_v32 = vld [vmem:[#allocation15 + $0x4c] ss:$16 sps:$4 sm:$0xff]   ;;  %v8816_v33 = vld [vmem:[#allocation15 + $0x40] ss:$16 sps:$4 sm:$0xff]  }
 0x790   :  { %2603 = vmatprep.subr.bf16.mxu0 %v8740_v34  ;;  %2685 = vmatprep.subr.bf16.mxu1 %v8743_v35  ;;  %v8819_v34 = vld [vmem:[#allocation15 + $0x48] ss:$16 sps:$4 sm:$0xff]   ;;  %v8824_v35 = vld [vmem:[#allocation15 + $0x64] ss:$16 sps:$4 sm:$0xff]  }
 0x793   :  { %2604 = vmatpush1.bf16.msra.mxu0 %v8738_v36  ;;  %2686 = vmatpush1.bf16.msra.mxu1 %v8741_v37  ;;  %v8827_v36 = vld [vmem:[#allocation15 + $0x6c] ss:$16 sps:$4 sm:$0xff]   ;;  %v8822_v37 = vld [vmem:[#allocation15 + $0x60] ss:$16 sps:$4 sm:$0xff]  }
 0x794   :  { %2605 = vmatprep.subr.bf16.mxu0 %v8746_v38  ;;  %2687 = vmatprep.subr.bf16.mxu1 %v8749_v39  ;;  %v8825_v38 = vld [vmem:[#allocation15 + $0x68] ss:$16 sps:$4 sm:$0xff]   ;;  %v8830_v39 = vld [vmem:[#allocation15 + $0x84] ss:$16 sps:$4 sm:$0xff]  }
 0x797   :  { %2606 = vmatpush1.bf16.msra.mxu0 %v8744_v40  ;;  %2688 = vmatpush1.bf16.msra.mxu1 %v8747_v41  ;;  %v8833_v40 = vld [vmem:[#allocation15 + $0x8c] ss:$16 sps:$4 sm:$0xff]   ;;  %v8828_v41 = vld [vmem:[#allocation15 + $0x80] ss:$16 sps:$4 sm:$0xff]  }
 0x798   :  { %2607 = vmatprep.subr.bf16.mxu0 %v8752_v42  ;;  %2689 = vmatprep.subr.bf16.mxu1 %v8755_v43  ;;  %v8831_v42 = vld [vmem:[#allocation15 + $0x88] ss:$16 sps:$4 sm:$0xff]   ;;  %v8836_v43 = vld [vmem:[#allocation15 + $0xa4] ss:$16 sps:$4 sm:$0xff]  }
 0x79b   :  { %2608 = vmatpush1.bf16.msra.mxu0 %v8750_v44  ;;  %2690 = vmatpush1.bf16.msra.mxu1 %v8753_v45  ;;  %v8839_v44 = vld [vmem:[#allocation15 + $0xac] ss:$16 sps:$4 sm:$0xff]   ;;  %v8834_v45 = vld [vmem:[#allocation15 + $0xa0] ss:$16 sps:$4 sm:$0xff]  }
 0x79c   :  { %2609 = vmatprep.subr.bf16.mxu0 %v8758_v46  ;;  %2691 = vmatprep.subr.bf16.mxu1 %v8761_v47  ;;  %v8837_v46 = vld [vmem:[#allocation15 + $0xa8] ss:$16 sps:$4 sm:$0xff]   ;;  %v8842_v47 = vld [vmem:[#allocation15 + $0xc4] ss:$16 sps:$4 sm:$0xff]  }
 0x79f   :  { %2610 = vmatpush1.bf16.msra.mxu0 %v8756_v48  ;;  %2692 = vmatpush1.bf16.msra.mxu1 %v8759_v49  ;;  %v8845_v48 = vld [vmem:[#allocation15 + $0xcc] ss:$16 sps:$4 sm:$0xff]   ;;  %v8840_v49 = vld [vmem:[#allocation15 + $0xc0] ss:$16 sps:$4 sm:$0xff]  }
 0x7a0   :  { %2611 = vmatprep.subr.bf16.mxu0 %v8764_v50  ;;  %2693 = vmatprep.subr.bf16.mxu1 %v8767_v51  ;;  %v8843_v50 = vld [vmem:[#allocation15 + $0xc8] ss:$16 sps:$4 sm:$0xff]   ;;  %v8848_v51 = vld [vmem:[#allocation15 + $0xe4] ss:$16 sps:$4 sm:$0xff]  }
 0x7a3   :  { %2612 = vmatpush1.bf16.msra.mxu0 %v8762_v52  ;;  %2694 = vmatpush1.bf16.msra.mxu1 %v8765_v53  ;;  %v8851_v52 = vld [vmem:[#allocation15 + $0xec] ss:$16 sps:$4 sm:$0xff]   ;;  %v8846_v53 = vld [vmem:[#allocation15 + $0xe0] ss:$16 sps:$4 sm:$0xff]  }
 0x7a4   :  { %2613 = vmatprep.subr.bf16.mxu0 %v8770_v56  ;;  %2695 = vmatprep.subr.bf16.mxu1 %v8773_v57  ;;  %v8849_v56 = vld [vmem:[#allocation15 + $0xe8] ss:$16 sps:$4 sm:$0xff]   ;;  %v8854_v57 = vld [vmem:[#allocation15 + $0x104] ss:$16 sps:$4 sm:$0xff]  }
 0x7a7   :  { %2614 = vmatpush1.bf16.msra.mxu0 %v8768_v58  ;;  %2696 = vmatpush1.bf16.msra.mxu1 %v8771_v59  ;;  %v8857_v58 = vld [vmem:[#allocation15 + $0x10c] ss:$16 sps:$4 sm:$0xff]   ;;  %v8852_v59 = vld [vmem:[#allocation15 + $0x100] ss:$16 sps:$4 sm:$0xff]  }
 0x7a8   :  { %2615 = vmatprep.subr.bf16.mxu0 %v8776_v63  ;;  %2697 = vmatprep.subr.bf16.mxu1 %v8779_v2  ;;  %v8855_v63 = vld [vmem:[#allocation15 + $0x108] ss:$16 sps:$4 sm:$0xff]   ;;  %v8860_v2 = vld [vmem:[#allocation15 + $0x124] ss:$16 sps:$4 sm:$0xff]  }
 0x7ab   :  { %2616 = vmatpush1.bf16.msra.mxu0 %v8774_v3  ;;  %2698 = vmatpush1.bf16.msra.mxu1 %v8777_v4  ;;  %v8863_v3 = vld [vmem:[#allocation15 + $0x12c] ss:$16 sps:$4 sm:$0xff]   ;;  %v8858_v4 = vld [vmem:[#allocation15 + $0x120] ss:$16 sps:$4 sm:$0xff]  }
 0x7ac   :  { %2617 = vmatprep.subr.bf16.mxu0 %v8782_v5  ;;  %2699 = vmatprep.subr.bf16.mxu1 %v8785_v6  ;;  %v8861_v5 = vld [vmem:[#allocation15 + $0x128] ss:$16 sps:$4 sm:$0xff]   ;;  %v8866_v6 = vld [vmem:[#allocation15 + $0x144] ss:$16 sps:$4 sm:$0xff]  }
 0x7af   :  { %2618 = vmatpush1.bf16.msra.mxu0 %v8780_v7  ;;  %2700 = vmatpush1.bf16.msra.mxu1 %v8783_v8  ;;  %v8869_v7 = vld [vmem:[#allocation15 + $0x14c] ss:$16 sps:$4 sm:$0xff]   ;;  %v8864_v8 = vld [vmem:[#allocation15 + $0x140] ss:$16 sps:$4 sm:$0xff]  }
 0x7b0   :  { %2619 = vmatprep.subr.bf16.mxu0 %v8788_v10  ;;  %2701 = vmatprep.subr.bf16.mxu1 %v8791_v11  ;;  %v8867_v10 = vld [vmem:[#allocation15 + $0x148] ss:$16 sps:$4 sm:$0xff]   ;;  %v8872_v11 = vld [vmem:[#allocation15 + $0x164] ss:$16 sps:$4 sm:$0xff]  }
 0x7b3   :  { %2620 = vmatpush1.bf16.msra.mxu0 %v8786_v12  ;;  %2702 = vmatpush1.bf16.msra.mxu1 %v8789_v13  ;;  %v8875_v12 = vld [vmem:[#allocation15 + $0x16c] ss:$16 sps:$4 sm:$0xff]   ;;  %v8870_v13 = vld [vmem:[#allocation15 + $0x160] ss:$16 sps:$4 sm:$0xff]  }
 0x7b4   :  { %2621 = vmatprep.subr.bf16.mxu0 %v8794_v15  ;;  %2703 = vmatprep.subr.bf16.mxu1 %v8797_v16  ;;  %v8878_v15 = vld [vmem:[#allocation15 + $0x184] ss:$16 sps:$4 sm:$0xff]   ;;  %v8881_v16 = vld [vmem:[#allocation15 + $0x18c] ss:$16 sps:$4 sm:$0xff]  }
 0x7b7   :  { %2622 = vmatpush1.bf16.msra.mxu0 %v8792_v17  ;;  %2704 = vmatpush1.bf16.msra.mxu1 %v8795_v61  ;;  %v8876_v17 = vld [vmem:[#allocation15 + $0x180] ss:$16 sps:$4 sm:$0xff]   ;;  %v8879_v61 = vld [vmem:[#allocation15 + $0x188] ss:$16 sps:$4 sm:$0xff]  }
 0x7b8   :  { %2623 = vmatprep.subr.bf16.mxu0 %v8800_v19  ;;  %2705 = vmatprep.subr.bf16.mxu1 %v8803_v20  ;;  %v8887_v19 = vld [vmem:[#allocation15 + $0x1ac] ss:$16 sps:$4 sm:$0xff]   ;;  %v8882_v20 = vld [vmem:[#allocation15 + $0x1a0] ss:$16 sps:$4 sm:$0xff]  }
 0x7bb   :  { %2624 = vmatpush1.bf16.msra.mxu0 %v8798_v21  ;;  %2706 = vmatpush1.bf16.msra.mxu1 %v8801_v22  ;;  %v8885_v21 = vld [vmem:[#allocation15 + $0x1a8] ss:$16 sps:$4 sm:$0xff]   ;;  %v8890_v22 = vld [vmem:[#allocation15 + $0x1c4] ss:$16 sps:$4 sm:$0xff]  }
 0x7bc   :  { %3515 = vmatprep.subr.bf16.mxu0 %v8806_v54  ;;  %3597 = vmatprep.subr.bf16.mxu1 %v8809_v24  ;;  %v8888_v54 = vld [vmem:[#allocation15 + $0x1c0] ss:$16 sps:$4 sm:$0xff]   ;;  %v8891_v24 = vld [vmem:[#allocation15 + $0x1c8] ss:$16 sps:$4 sm:$0xff]  }
 0x7be   :  { %2626 = vmatmul.mubr.bf16.vlgmr.msra.gmra.mrb[16].mxu0 %v1759_v27  ;;  %2708 = vmatmul.mubr.bf16.vlgmr.msra.gmra.mrb[16].mxu1 %v1759_v27  ;;  %v8894_v27 = vld [vmem:[#allocation15 + $0x1e0] ss:$16 sps:$4 sm:$0xff]  }
 0x7bf   :  { %3516 = vmatpush1.bf16.msra.mxu0 %v8804_v25  ;;  %3598 = vmatpush1.bf16.msra.mxu1 %v8807_v26  ;;  %v8896_v25 = vld [vmem:[#allocation15 + $0x1e4] ss:$16 sps:$4 sm:$0xff]   ;;  %v8899_v26 = vld [vmem:[#allocation15 + $0x1ec] ss:$16 sps:$4 sm:$0xff]  }
 0x7c0   :  { %3517 = vmatprep.subr.bf16.mxu0 %v8812_v60  ;;  %3599 = vmatprep.subr.bf16.mxu1 %v8815_v28  ;;  %v8897_v60 = vld [vmem:[#allocation15 + $0x1e8] ss:$16 sps:$4 sm:$0xff]   ;;  %v8902_v28 = vld [vmem:[#allocation15 + $0x204] ss:$16 sps:$4 sm:$0xff]  }
 0x7c3   :  { %3518 = vmatpush1.bf16.msra.mxu0 %v8810_v29  ;;  %3600 = vmatpush1.bf16.msra.mxu1 %v8813_v30  ;;  %v8905_v29 = vld [vmem:[#allocation15 + $0x20c] ss:$16 sps:$4 sm:$0xff]  }
 0x7c4   :  { %3519 = vmatprep.subr.bf16.mxu0 %v8818_v31  ;;  %3601 = vmatprep.subr.bf16.mxu1 %v8821_v32  ;;  %v10517_v30 = vld [vmem:[#allocation28 + $0x7] ss:$8 sm:$0xf] }
 0x7c5   :  { %v1895_v31 = vrot.slane %v10517_v30, %v10487_v62  ;;  %v1899_v32 = vrot.slane %v10517_v30, %v10490_v1 }
 0x7c7   :  { %3520 = vmatpush1.bf16.msra.mxu0 %v8816_v33  ;;  %3602 = vmatpush1.bf16.msra.mxu1 %v8819_v34  ;;  %v1907_v33 = vrot.slane %v10517_v30, %v10501_v55 }
 0x7c8   :  { %3521 = vmatprep.subr.bf16.mxu0 %v8824_v35  ;;  %3603 = vmatprep.subr.bf16.mxu1 %v8827_v36 }
 0x7cb   :  { %3522 = vmatpush1.bf16.msra.mxu0 %v8822_v37  ;;  %3604 = vmatpush1.bf16.msra.mxu1 %v8825_v38 }
 0x7cc   :  { %3523 = vmatprep.subr.bf16.mxu0 %v8830_v39  ;;  %3605 = vmatprep.subr.bf16.mxu1 %v8833_v40 }
 0x7cf   :  { %3524 = vmatpush1.bf16.msra.mxu0 %v8828_v41  ;;  %3606 = vmatpush1.bf16.msra.mxu1 %v8831_v42 }
 0x7d0   :  { %3525 = vmatprep.subr.bf16.mxu0 %v8836_v43  ;;  %3607 = vmatprep.subr.bf16.mxu1 %v8839_v44 }
 0x7d3   :  { %3526 = vmatpush1.bf16.msra.mxu0 %v8834_v45  ;;  %3608 = vmatpush1.bf16.msra.mxu1 %v8837_v46 }
 0x7d4   :  { %3527 = vmatprep.subr.bf16.mxu0 %v8842_v47  ;;  %3609 = vmatprep.subr.bf16.mxu1 %v8845_v48 }
 0x7d7   :  { %3528 = vmatpush1.bf16.msra.mxu0 %v8840_v49  ;;  %3610 = vmatpush1.bf16.msra.mxu1 %v8843_v50  ;;  %v8900_v49 = vld [vmem:[#allocation15 + $0x200] ss:$16 sps:$4 sm:$0xff]   ;;  %v8903_v50 = vld [vmem:[#allocation15 + $0x208] ss:$16 sps:$4 sm:$0xff]  }
 0x7d8   :  { %3529 = vmatprep.subr.bf16.mxu0 %v8848_v51  ;;  %3611 = vmatprep.subr.bf16.mxu1 %v8851_v52  ;;  %v8908_v52 = vld [vmem:[#allocation15 + $0x224] ss:$16 sps:$4 sm:$0xff]  }
 0x7db   :  { %3530 = vmatpush1.bf16.msra.mxu0 %v8846_v53  ;;  %3612 = vmatpush1.bf16.msra.mxu1 %v8849_v56  ;;  %v8911_v53 = vld [vmem:[#allocation15 + $0x22c] ss:$16 sps:$4 sm:$0xff]  }
 0x7dc   :  { %3531 = vmatprep.subr.bf16.mxu0 %v8854_v57  ;;  %3613 = vmatprep.subr.bf16.mxu1 %v8857_v58  ;;  %v8906_v57 = vld [vmem:[#allocation15 + $0x220] ss:$16 sps:$4 sm:$0xff]   ;;  %v8909_v58 = vld [vmem:[#allocation15 + $0x228] ss:$16 sps:$4 sm:$0xff]  }
 0x7df   :  { %3532 = vmatpush1.bf16.msra.mxu0 %v8852_v59  ;;  %3614 = vmatpush1.bf16.msra.mxu1 %v8855_v63  ;;  %v8914_v59 = vld [vmem:[#allocation15 + $0x244] ss:$16 sps:$4 sm:$0xff]   ;;  %v8917_v63 = vld [vmem:[#allocation15 + $0x24c] ss:$16 sps:$4 sm:$0xff]  }
 0x7e0   :  { %3533 = vmatprep.subr.bf16.mxu0 %v8860_v2  ;;  %3615 = vmatprep.subr.bf16.mxu1 %v8863_v3  ;;  %v8912_v2 = vld [vmem:[#allocation15 + $0x240] ss:$16 sps:$4 sm:$0xff]   ;;  %v8915_v3 = vld [vmem:[#allocation15 + $0x248] ss:$16 sps:$4 sm:$0xff]  }
 0x7e3   :  { %3534 = vmatpush1.bf16.msra.mxu0 %v8858_v4  ;;  %3616 = vmatpush1.bf16.msra.mxu1 %v8861_v5  ;;  %v8920_v4 = vld [vmem:[#allocation15 + $0x264] ss:$16 sps:$4 sm:$0xff]   ;;  %v8923_v5 = vld [vmem:[#allocation15 + $0x26c] ss:$16 sps:$4 sm:$0xff]  }
 0x7e4   :  { %3535 = vmatprep.subr.bf16.mxu0 %v8866_v6  ;;  %3617 = vmatprep.subr.bf16.mxu1 %v8869_v7  ;;  %v8918_v6 = vld [vmem:[#allocation15 + $0x260] ss:$16 sps:$4 sm:$0xff]   ;;  %v8921_v7 = vld [vmem:[#allocation15 + $0x268] ss:$16 sps:$4 sm:$0xff]  }
 0x7e7   :  { %3536 = vmatpush1.bf16.msra.mxu0 %v8864_v8  ;;  %3618 = vmatpush1.bf16.msra.mxu1 %v8867_v10  ;;  %v8926_v8 = vld [vmem:[#allocation15 + $0x284] ss:$16 sps:$4 sm:$0xff]   ;;  %v8929_v10 = vld [vmem:[#allocation15 + $0x28c] ss:$16 sps:$4 sm:$0xff]  }
 0x7e8   :  { %3537 = vmatprep.subr.bf16.mxu0 %v8872_v11  ;;  %3619 = vmatprep.subr.bf16.mxu1 %v8875_v12  ;;  %v8924_v11 = vld [vmem:[#allocation15 + $0x280] ss:$16 sps:$4 sm:$0xff]   ;;  %v8927_v12 = vld [vmem:[#allocation15 + $0x288] ss:$16 sps:$4 sm:$0xff]  }
 0x7eb   :  { %3538 = vmatpush1.bf16.msra.mxu0 %v8870_v13  ;;  %3620 = vmatpush1.bf16.msra.mxu1 %v8873_v14  ;;  %v8932_v13 = vld [vmem:[#allocation15 + $0x2a4] ss:$16 sps:$4 sm:$0xff]   ;;  %v8935_v14 = vld [vmem:[#allocation15 + $0x2ac] ss:$16 sps:$4 sm:$0xff]  }
 0x7ec   :  { %3539 = vmatprep.subr.bf16.mxu0 %v8878_v15  ;;  %3621 = vmatprep.subr.bf16.mxu1 %v8881_v16  ;;  %v8930_v15 = vld [vmem:[#allocation15 + $0x2a0] ss:$16 sps:$4 sm:$0xff]   ;;  %v8933_v16 = vld [vmem:[#allocation15 + $0x2a8] ss:$16 sps:$4 sm:$0xff]  }
 0x7ef   :  { %3540 = vmatpush1.bf16.msra.mxu0 %v8876_v17  ;;  %3622 = vmatpush1.bf16.msra.mxu1 %v8879_v61  ;;  %v8938_v17 = vld [vmem:[#allocation15 + $0x2c4] ss:$16 sps:$4 sm:$0xff]   ;;  %v8941_v61 = vld [vmem:[#allocation15 + $0x2cc] ss:$16 sps:$4 sm:$0xff]  }
 0x7f0   :  { %3541 = vmatprep.subr.bf16.mxu0 %v8884_v18  ;;  %3623 = vmatprep.subr.bf16.mxu1 %v8887_v19  ;;  %v8936_v18 = vld [vmem:[#allocation15 + $0x2c0] ss:$16 sps:$4 sm:$0xff]   ;;  %v8939_v19 = vld [vmem:[#allocation15 + $0x2c8] ss:$16 sps:$4 sm:$0xff]  }
 0x7f3   :  { %3542 = vmatpush1.bf16.msra.mxu0 %v8882_v20  ;;  %3624 = vmatpush1.bf16.msra.mxu1 %v8885_v21  ;;  %v8944_v20 = vld [vmem:[#allocation15 + $0x2e4] ss:$16 sps:$4 sm:$0xff]   ;;  %v8947_v21 = vld [vmem:[#allocation15 + $0x2ec] ss:$16 sps:$4 sm:$0xff]  }
 0x7f4   :  { %3543 = vmatprep.subr.bf16.mxu0 %v8890_v22  ;;  %3625 = vmatprep.subr.bf16.mxu1 %v8893_v23  ;;  %v8942_v22 = vld [vmem:[#allocation15 + $0x2e0] ss:$16 sps:$4 sm:$0xff]   ;;  %v8945_v23 = vld [vmem:[#allocation15 + $0x2e8] ss:$16 sps:$4 sm:$0xff]  }
 0x7f7   :  { %3544 = vmatpush1.bf16.msra.mxu0 %v8888_v54  ;;  %3626 = vmatpush1.bf16.msra.mxu1 %v8891_v24  ;;  %v8950_v54 = vld [vmem:[#allocation15 + $0x304] ss:$16 sps:$4 sm:$0xff]   ;;  %v8953_v24 = vld [vmem:[#allocation15 + $0x30c] ss:$16 sps:$4 sm:$0xff]  }
 0x7f8   :  { %3545 = vmatprep.subr.bf16.mxu0 %v8896_v25  ;;  %3627 = vmatprep.subr.bf16.mxu1 %v8899_v26  ;;  %v8948_v25 = vld [vmem:[#allocation15 + $0x300] ss:$16 sps:$4 sm:$0xff]   ;;  %v8951_v26 = vld [vmem:[#allocation15 + $0x308] ss:$16 sps:$4 sm:$0xff]  }
 0x7fb   :  { %3546 = vmatpush1.bf16.msra.mxu0 %v8894_v27  ;;  %3628 = vmatpush1.bf16.msra.mxu1 %v8897_v60  ;;  %v8956_v27 = vld [vmem:[#allocation15 + $0x324] ss:$16 sps:$4 sm:$0xff]   ;;  %v8959_v60 = vld [vmem:[#allocation15 + $0x32c] ss:$16 sps:$4 sm:$0xff]  }
 0x7fc   :  { %3556 = vmatprep.subr.bf16.mxu0 %v8902_v28  ;;  %3638 = vmatprep.subr.bf16.mxu1 %v8905_v29  ;;  %v8954_v28 = vld [vmem:[#allocation15 + $0x320] ss:$16 sps:$4 sm:$0xff]   ;;  %v8957_v29 = vld [vmem:[#allocation15 + $0x328] ss:$16 sps:$4 sm:$0xff]  }
 0x891   :  { %v2627_v34 = vpop.f32.mrb[16].mxu0  ;;  %v10525_v35 = vpop.f32.mrb[16].mxu1 }
 0x892   :  { %v8292_v36 = vadd.f32 %v2627_v34, %v1895_v31  ;;  %v2629_v37 = vpop.f32.mrb[17].mxu0  ;;  %v2711_v38 = vpop.f32.mrb[17].mxu1  ;;  %v8962_v31 = vld [vmem:[#allocation15 + $0x344] ss:$16 sps:$4 sm:$0xff]   ;;  %v8963_v34 = vld [vmem:[#allocation15 + $0x348] ss:$16 sps:$4 sm:$0xff]  }
 0x893   :  { %v8293_v39 = vadd.f32 %v2629_v37, %v1899_v32  ;;  %v8295_v40 = vadd.f32 %v2711_v38, %v1907_v33  ;;  %v2631_v41 = vpop.f32.mrb[18].mxu0  ;;  %v2713_v42 = vpop.f32.mrb[18].mxu1  ;;  %v8965_v32 = vld [vmem:[#allocation15 + $0x34c] ss:$16 sps:$4 sm:$0xff]   ;;  %v8960_v33 = vld [vmem:[#allocation15 + $0x340] ss:$16 sps:$4 sm:$0xff]  }
 0x894   :  { %v2716_v43 = vmax.f32 %v8292_v36, 0.0  ;;  %v2632_v44 = vpop.f32.mrb[19].mxu0  ;;  %v2714_v45 = vpop.f32.mrb[19].mxu1  ;;  %v8968_v36 = vld [vmem:[#allocation15 + $0x364] ss:$16 sps:$4 sm:$0xff]  }
 0x895   :  { %v2717_v46 = vmax.f32 %v8293_v39, 0.0  ;;  %v2719_v47 = vmax.f32 %v8295_v40, 0.0  ;;  %v8971_v37 = vld [vmem:[#allocation15 + $0x36c] ss:$16 sps:$4 sm:$0xff]   ;;  %v8966_v38 = vld [vmem:[#allocation15 + $0x360] ss:$16 sps:$4 sm:$0xff]  }
 0x896   :  { %v2720_v51 = vpack.c.bf16 %v2716_v43, %v2716_v43  ;;  %v8969_v39 = vld [vmem:[#allocation15 + $0x368] ss:$16 sps:$4 sm:$0xff]   ;;  %v8974_v40 = vld [vmem:[#allocation15 + $0x384] ss:$16 sps:$4 sm:$0xff]   ;;  %v8977_v41 = vld [vmem:[#allocation15 + $0x38c] ss:$16 sps:$4 sm:$0xff]  }
 0x897   :  { %v2721_v48 = vpack.c.bf16 %v2717_v46, %v2717_v46  ;;  %v2723_v56 = vpack.c.bf16 %v2719_v47, %v2719_v47  ;;  %v8972_v42 = vld [vmem:[#allocation15 + $0x380] ss:$16 sps:$4 sm:$0xff]   ;;  %v8975_v43 = vld [vmem:[#allocation15 + $0x388] ss:$16 sps:$4 sm:$0xff]   ;;  %v8980_v44 = vld [vmem:[#allocation15 + $0x3a4] ss:$16 sps:$4 sm:$0xff]  }
 0x898   :  { %v8983_v45 = vld [vmem:[#allocation15 + $0x3ac] ss:$16 sps:$4 sm:$0xff]   ;;  %v8978_v46 = vld [vmem:[#allocation15 + $0x3a0] ss:$16 sps:$4 sm:$0xff]   ;;  %v8981_v47 = vld [vmem:[#allocation15 + $0x3a8] ss:$16 sps:$4 sm:$0xff]  }
 0x899   :  { %3547 = vmatprep.mubr.bf16.mxu0 %v2721_v48  ;;  %3629 = vmatprep.mubr.bf16.mxu1 %v2721_v48  ;;  %v1903_v48 = vrot.slane %v10517_v30, %v10512_v9  ;;  %v8998_v30 = vld [vmem:[#allocation16 + $0x4] ss:$16 sps:$4 sm:$0xff]  }
 0x89a   :  { %3548 = vmatmul.mubr.bf16.vlgmr.msra.gmra.mrb[20].mxu0 %v2720_v51  ;;  %3630 = vmatmul.mubr.bf16.vlgmr.msra.gmra.mrb[20].mxu1 %v2720_v51  ;;  %v8984_v51 = vld [vmem:[#allocation15 + $0x3c0] ss:$16 sps:$4 sm:$0xff]  }
 0x89b   :  { %3557 = vmatpush1.bf16.msra.mxu0 %v8900_v49  ;;  %3639 = vmatpush1.bf16.msra.mxu1 %v8903_v50  ;;  %v8986_v49 = vld [vmem:[#allocation15 + $0x3c4] ss:$16 sps:$4 sm:$0xff]   ;;  %v8989_v50 = vld [vmem:[#allocation15 + $0x3cc] ss:$16 sps:$4 sm:$0xff]  }
 0x89c   :  { %3588 = vmatprep.mubr.bf16.mxu0 %v2723_v56  ;;  %3670 = vmatprep.mubr.bf16.mxu1 %v2723_v56  ;;  %v8992_v56 = vld [vmem:[#allocation15 + $0x3e4] ss:$16 sps:$4 sm:$0xff]  }
 0x89d   :  { %3558 = vmatprep.subr.bf16.mxu0 %v8908_v52  ;;  %3640 = vmatprep.subr.bf16.mxu1 %v8911_v53  ;;  %v8987_v52 = vld [vmem:[#allocation15 + $0x3c8] ss:$16 sps:$4 sm:$0xff]   ;;  %v8294_v53 = vadd.f32 %v10525_v35, %v1903_v48  ;;  %v9004_v35 = vld [vmem:[#allocation16 + $0x24] ss:$16 sps:$4 sm:$0xff]  }
 0x89e   :  { %v9065_v48 = vld [vmem:[#allocation16 + $0x168] ss:$16 sps:$4 sm:$0xff]  }
 0x89f   :  { %3559 = vmatpush1.bf16.msra.mxu0 %v8906_v57  ;;  %3641 = vmatpush1.bf16.msra.mxu1 %v8909_v58  ;;  %v8995_v57 = vld [vmem:[#allocation15 + $0x3ec] ss:$16 sps:$4 sm:$0xff]   ;;  %v8990_v58 = vld [vmem:[#allocation15 + $0x3e0] ss:$16 sps:$4 sm:$0xff]  }
 0x8a0   :  { %3560 = vmatprep.subr.bf16.mxu0 %v8914_v59  ;;  %3642 = vmatprep.subr.bf16.mxu1 %v8917_v63  ;;  %v8993_v59 = vld [vmem:[#allocation15 + $0x3e8] ss:$16 sps:$4 sm:$0xff]   ;;  %v2718_v63 = vmax.f32 %v8294_v53, 0.0  ;;  %v9076_v53 = vld [vmem:[#allocation16 + $0x1a4] ss:$16 sps:$4 sm:$0xff]  }
 0x8a3   :  { %3561 = vmatpush1.bf16.msra.mxu0 %v8912_v2  ;;  %3643 = vmatpush1.bf16.msra.mxu1 %v8915_v3  ;;  %v9001_v2 = vld [vmem:[#allocation16 + $0xc] ss:$16 sps:$4 sm:$0xff]   ;;  %v8996_v3 = vld [vmem:[#allocation16] ss:$16 sps:$4 sm:$0xff]  }
 0x8a4   :  { %3562 = vmatprep.subr.bf16.mxu0 %v8920_v4  ;;  %3644 = vmatprep.subr.bf16.mxu1 %v8923_v5  ;;  %v8999_v4 = vld [vmem:[#allocation16 + $0x8] ss:$16 sps:$4 sm:$0xff]   ;;  %v2722_v5 = vpack.c.bf16 %v2718_v63, %v2718_v63  ;;  %v9085_v63 = vld [vmem:[#allocation16 + $0x1cc] ss:$16 sps:$4 sm:$0xff]  }
 0x8a7   :  { %3563 = vmatpush1.bf16.msra.mxu0 %v8918_v6  ;;  %3645 = vmatpush1.bf16.msra.mxu1 %v8921_v7  ;;  %v9007_v6 = vld [vmem:[#allocation16 + $0x2c] ss:$16 sps:$4 sm:$0xff]   ;;  %v9002_v7 = vld [vmem:[#allocation16 + $0x20] ss:$16 sps:$4 sm:$0xff]  }
 0x8a8   :  { %3564 = vmatprep.subr.bf16.mxu0 %v8926_v8  ;;  %3646 = vmatprep.subr.bf16.mxu1 %v8929_v10  ;;  %v9005_v8 = vld [vmem:[#allocation16 + $0x28] ss:$16 sps:$4 sm:$0xff]   ;;  %v9010_v10 = vld [vmem:[#allocation16 + $0x44] ss:$16 sps:$4 sm:$0xff]  }
 0x8ab   :  { %3565 = vmatpush1.bf16.msra.mxu0 %v8924_v11  ;;  %3647 = vmatpush1.bf16.msra.mxu1 %v8927_v12  ;;  %v9013_v11 = vld [vmem:[#allocation16 + $0x4c] ss:$16 sps:$4 sm:$0xff]   ;;  %v9008_v12 = vld [vmem:[#allocation16 + $0x40] ss:$16 sps:$4 sm:$0xff]  }
 0x8ac   :  { %3566 = vmatprep.subr.bf16.mxu0 %v8932_v13  ;;  %3648 = vmatprep.subr.bf16.mxu1 %v8935_v14  ;;  %v9011_v13 = vld [vmem:[#allocation16 + $0x48] ss:$16 sps:$4 sm:$0xff]   ;;  %v9016_v14 = vld [vmem:[#allocation16 + $0x64] ss:$16 sps:$4 sm:$0xff]  }
 0x8af   :  { %3567 = vmatpush1.bf16.msra.mxu0 %v8930_v15  ;;  %3649 = vmatpush1.bf16.msra.mxu1 %v8933_v16  ;;  %v9019_v15 = vld [vmem:[#allocation16 + $0x6c] ss:$16 sps:$4 sm:$0xff]   ;;  %v9014_v16 = vld [vmem:[#allocation16 + $0x60] ss:$16 sps:$4 sm:$0xff]  }
 0x8b0   :  { %3568 = vmatprep.subr.bf16.mxu0 %v8938_v17  ;;  %3650 = vmatprep.subr.bf16.mxu1 %v8941_v61  ;;  %v9017_v17 = vld [vmem:[#allocation16 + $0x68] ss:$16 sps:$4 sm:$0xff]   ;;  %v9022_v61 = vld [vmem:[#allocation16 + $0x84] ss:$16 sps:$4 sm:$0xff]  }
 0x8b3   :  { %3569 = vmatpush1.bf16.msra.mxu0 %v8936_v18  ;;  %3651 = vmatpush1.bf16.msra.mxu1 %v8939_v19  ;;  %v9025_v18 = vld [vmem:[#allocation16 + $0x8c] ss:$16 sps:$4 sm:$0xff]   ;;  %v9020_v19 = vld [vmem:[#allocation16 + $0x80] ss:$16 sps:$4 sm:$0xff]  }
 0x8b4   :  { %3570 = vmatprep.subr.bf16.mxu0 %v8944_v20  ;;  %3652 = vmatprep.subr.bf16.mxu1 %v8947_v21  ;;  %v9023_v20 = vld [vmem:[#allocation16 + $0x88] ss:$16 sps:$4 sm:$0xff]   ;;  %v9028_v21 = vld [vmem:[#allocation16 + $0xa4] ss:$16 sps:$4 sm:$0xff]  }
 0x8b7   :  { %3571 = vmatpush1.bf16.msra.mxu0 %v8942_v22  ;;  %3653 = vmatpush1.bf16.msra.mxu1 %v8945_v23  ;;  %v9031_v22 = vld [vmem:[#allocation16 + $0xac] ss:$16 sps:$4 sm:$0xff]   ;;  %v9026_v23 = vld [vmem:[#allocation16 + $0xa0] ss:$16 sps:$4 sm:$0xff]  }
 0x8b8   :  { %3572 = vmatprep.subr.bf16.mxu0 %v8950_v54  ;;  %3654 = vmatprep.subr.bf16.mxu1 %v8953_v24  ;;  %v9029_v54 = vld [vmem:[#allocation16 + $0xa8] ss:$16 sps:$4 sm:$0xff]   ;;  %v9034_v24 = vld [vmem:[#allocation16 + $0xc4] ss:$16 sps:$4 sm:$0xff]  }
 0x8bb   :  { %3573 = vmatpush1.bf16.msra.mxu0 %v8948_v25  ;;  %3655 = vmatpush1.bf16.msra.mxu1 %v8951_v26  ;;  %v9037_v25 = vld [vmem:[#allocation16 + $0xcc] ss:$16 sps:$4 sm:$0xff]   ;;  %v9032_v26 = vld [vmem:[#allocation16 + $0xc0] ss:$16 sps:$4 sm:$0xff]  }
 0x8bc   :  { %3574 = vmatprep.subr.bf16.mxu0 %v8956_v27  ;;  %3656 = vmatprep.subr.bf16.mxu1 %v8959_v60  ;;  %v9035_v27 = vld [vmem:[#allocation16 + $0xc8] ss:$16 sps:$4 sm:$0xff]   ;;  %v9040_v60 = vld [vmem:[#allocation16 + $0xe4] ss:$16 sps:$4 sm:$0xff]  }
 0x8bf   :  { %3575 = vmatpush1.bf16.msra.mxu0 %v8954_v28  ;;  %3657 = vmatpush1.bf16.msra.mxu1 %v8957_v29  ;;  %v9043_v28 = vld [vmem:[#allocation16 + $0xec] ss:$16 sps:$4 sm:$0xff]   ;;  %v9038_v29 = vld [vmem:[#allocation16 + $0xe0] ss:$16 sps:$4 sm:$0xff]  }
 0x8c0   :  { %3576 = vmatprep.subr.bf16.mxu0 %v8962_v31  ;;  %3658 = vmatprep.subr.bf16.mxu1 %v8965_v32  ;;  %v9041_v31 = vld [vmem:[#allocation16 + $0xe8] ss:$16 sps:$4 sm:$0xff]   ;;  %v9046_v32 = vld [vmem:[#allocation16 + $0x104] ss:$16 sps:$4 sm:$0xff]  }
 0x8c3   :  { %3577 = vmatpush1.bf16.msra.mxu0 %v8960_v33  ;;  %3659 = vmatpush1.bf16.msra.mxu1 %v8963_v34  ;;  %v9049_v33 = vld [vmem:[#allocation16 + $0x10c] ss:$16 sps:$4 sm:$0xff]   ;;  %v9044_v34 = vld [vmem:[#allocation16 + $0x100] ss:$16 sps:$4 sm:$0xff]  }
 0x8c4   :  { %3578 = vmatprep.subr.bf16.mxu0 %v8968_v36  ;;  %3660 = vmatprep.subr.bf16.mxu1 %v8971_v37  ;;  %v9047_v36 = vld [vmem:[#allocation16 + $0x108] ss:$16 sps:$4 sm:$0xff]   ;;  %v9052_v37 = vld [vmem:[#allocation16 + $0x124] ss:$16 sps:$4 sm:$0xff]  }
 0x8c7   :  { %3579 = vmatpush1.bf16.msra.mxu0 %v8966_v38  ;;  %3661 = vmatpush1.bf16.msra.mxu1 %v8969_v39  ;;  %v9055_v38 = vld [vmem:[#allocation16 + $0x12c] ss:$16 sps:$4 sm:$0xff]   ;;  %v9050_v39 = vld [vmem:[#allocation16 + $0x120] ss:$16 sps:$4 sm:$0xff]  }
 0x8c8   :  { %3580 = vmatprep.subr.bf16.mxu0 %v8974_v40  ;;  %3662 = vmatprep.subr.bf16.mxu1 %v8977_v41  ;;  %v9053_v40 = vld [vmem:[#allocation16 + $0x128] ss:$16 sps:$4 sm:$0xff]   ;;  %v9058_v41 = vld [vmem:[#allocation16 + $0x144] ss:$16 sps:$4 sm:$0xff]  }
 0x8cb   :  { %3581 = vmatpush1.bf16.msra.mxu0 %v8972_v42  ;;  %3663 = vmatpush1.bf16.msra.mxu1 %v8975_v43  ;;  %v9061_v42 = vld [vmem:[#allocation16 + $0x14c] ss:$16 sps:$4 sm:$0xff]   ;;  %v9056_v43 = vld [vmem:[#allocation16 + $0x140] ss:$16 sps:$4 sm:$0xff]  }
 0x8cc   :  { %3582 = vmatprep.subr.bf16.mxu0 %v8980_v44  ;;  %3664 = vmatprep.subr.bf16.mxu1 %v8983_v45  ;;  %v9059_v44 = vld [vmem:[#allocation16 + $0x148] ss:$16 sps:$4 sm:$0xff]   ;;  %v9064_v45 = vld [vmem:[#allocation16 + $0x164] ss:$16 sps:$4 sm:$0xff]  }
 0x8cf   :  { %3583 = vmatpush1.bf16.msra.mxu0 %v8978_v46  ;;  %3665 = vmatpush1.bf16.msra.mxu1 %v8981_v47  ;;  %v9067_v46 = vld [vmem:[#allocation16 + $0x16c] ss:$16 sps:$4 sm:$0xff]   ;;  %v9062_v47 = vld [vmem:[#allocation16 + $0x160] ss:$16 sps:$4 sm:$0xff]  }
 0x8d0   :  { %3584 = vmatprep.subr.bf16.mxu0 %v8986_v49  ;;  %3666 = vmatprep.subr.bf16.mxu1 %v8989_v50  ;;  %v9070_v49 = vld [vmem:[#allocation16 + $0x184] ss:$16 sps:$4 sm:$0xff]   ;;  %v9073_v50 = vld [vmem:[#allocation16 + $0x18c] ss:$16 sps:$4 sm:$0xff]  }
 0x8d3   :  { %3585 = vmatpush1.bf16.msra.mxu0 %v8984_v51  ;;  %3667 = vmatpush1.bf16.msra.mxu1 %v8987_v52  ;;  %v9068_v51 = vld [vmem:[#allocation16 + $0x180] ss:$16 sps:$4 sm:$0xff]   ;;  %v9071_v52 = vld [vmem:[#allocation16 + $0x188] ss:$16 sps:$4 sm:$0xff]  }
 0x8d4   :  { %3586 = vmatprep.subr.bf16.mxu0 %v8992_v56  ;;  %3668 = vmatprep.subr.bf16.mxu1 %v8995_v57  ;;  %v9079_v56 = vld [vmem:[#allocation16 + $0x1ac] ss:$16 sps:$4 sm:$0xff]   ;;  %v9074_v57 = vld [vmem:[#allocation16 + $0x1a0] ss:$16 sps:$4 sm:$0xff]  }
 0x8d7   :  { %3587 = vmatpush1.bf16.msra.mxu0 %v8990_v58  ;;  %3669 = vmatpush1.bf16.msra.mxu1 %v8993_v59  ;;  %v9077_v58 = vld [vmem:[#allocation16 + $0x1a8] ss:$16 sps:$4 sm:$0xff]   ;;  %v9082_v59 = vld [vmem:[#allocation16 + $0x1c4] ss:$16 sps:$4 sm:$0xff]  }
 0x8d8   :  { %4478 = vmatprep.subr.bf16.mxu0 %v8998_v30  ;;  %4560 = vmatprep.subr.bf16.mxu1 %v9001_v2  ;;  %v9080_v30 = vld [vmem:[#allocation16 + $0x1c0] ss:$16 sps:$4 sm:$0xff]   ;;  %v9083_v2 = vld [vmem:[#allocation16 + $0x1c8] ss:$16 sps:$4 sm:$0xff]  }
 0x8da   :  { %3589 = vmatmul.mubr.bf16.vlgmr.msra.gmra.mrb[20].mxu0 %v2722_v5  ;;  %3671 = vmatmul.mubr.bf16.vlgmr.msra.gmra.mrb[20].mxu1 %v2722_v5  ;;  %v9086_v5 = vld [vmem:[#allocation16 + $0x1e0] ss:$16 sps:$4 sm:$0xff]  }
 0x8db   :  { %4479 = vmatpush1.bf16.msra.mxu0 %v8996_v3  ;;  %4561 = vmatpush1.bf16.msra.mxu1 %v8999_v4  ;;  %v9088_v3 = vld [vmem:[#allocation16 + $0x1e4] ss:$16 sps:$4 sm:$0xff]   ;;  %v9091_v4 = vld [vmem:[#allocation16 + $0x1ec] ss:$16 sps:$4 sm:$0xff]  }
 0x8dc   :  { %4480 = vmatprep.subr.bf16.mxu0 %v9004_v35  ;;  %4562 = vmatprep.subr.bf16.mxu1 %v9007_v6  ;;  %v9089_v35 = vld [vmem:[#allocation16 + $0x1e8] ss:$16 sps:$4 sm:$0xff]   ;;  %v9094_v6 = vld [vmem:[#allocation16 + $0x204] ss:$16 sps:$4 sm:$0xff]  }
 0x8df   :  { %4481 = vmatpush1.bf16.msra.mxu0 %v9002_v7  ;;  %4563 = vmatpush1.bf16.msra.mxu1 %v9005_v8  ;;  %v9097_v7 = vld [vmem:[#allocation16 + $0x20c] ss:$16 sps:$4 sm:$0xff]   ;;  %v10530_v8 = vld [vmem:[#allocation28 + $0x20] ss:$8 sm:$0xf] }
 0x8e0   :  { %4482 = vmatprep.subr.bf16.mxu0 %v9010_v10  ;;  %4564 = vmatprep.subr.bf16.mxu1 %v9013_v11  ;;  %v2858_v10 = vrot.slane %v10530_v8, %v10487_v62  ;;  %v2862_v11 = vrot.slane %v10530_v8, %v10490_v1 }
 0x8e3   :  { %4483 = vmatpush1.bf16.msra.mxu0 %v9008_v12  ;;  %4565 = vmatpush1.bf16.msra.mxu1 %v9011_v13  ;;  %v2870_v12 = vrot.slane %v10530_v8, %v10501_v55 }
 0x8e4   :  { %4484 = vmatprep.subr.bf16.mxu0 %v9016_v14  ;;  %4566 = vmatprep.subr.bf16.mxu1 %v9019_v15 }
 0x8e7   :  { %4485 = vmatpush1.bf16.msra.mxu0 %v9014_v16  ;;  %4567 = vmatpush1.bf16.msra.mxu1 %v9017_v17 }
 0x8e8   :  { %4486 = vmatprep.subr.bf16.mxu0 %v9022_v61  ;;  %4568 = vmatprep.subr.bf16.mxu1 %v9025_v18 }
 0x8eb   :  { %4487 = vmatpush1.bf16.msra.mxu0 %v9020_v19  ;;  %4569 = vmatpush1.bf16.msra.mxu1 %v9023_v20 }
 0x8ec   :  { %4488 = vmatprep.subr.bf16.mxu0 %v9028_v21  ;;  %4570 = vmatprep.subr.bf16.mxu1 %v9031_v22 }
 0x8ef   :  { %4489 = vmatpush1.bf16.msra.mxu0 %v9026_v23  ;;  %4571 = vmatpush1.bf16.msra.mxu1 %v9029_v54 }
 0x8f0   :  { %4490 = vmatprep.subr.bf16.mxu0 %v9034_v24  ;;  %4572 = vmatprep.subr.bf16.mxu1 %v9037_v25 }
 0x8f3   :  { %4491 = vmatpush1.bf16.msra.mxu0 %v9032_v26  ;;  %4573 = vmatpush1.bf16.msra.mxu1 %v9035_v27  ;;  %v9092_v26 = vld [vmem:[#allocation16 + $0x200] ss:$16 sps:$4 sm:$0xff]   ;;  %v9095_v27 = vld [vmem:[#allocation16 + $0x208] ss:$16 sps:$4 sm:$0xff]  }
 0x8f4   :  { %4492 = vmatprep.subr.bf16.mxu0 %v9040_v60  ;;  %4574 = vmatprep.subr.bf16.mxu1 %v9043_v28  ;;  %v9100_v28 = vld [vmem:[#allocation16 + $0x224] ss:$16 sps:$4 sm:$0xff]  }
 0x8f7   :  { %4493 = vmatpush1.bf16.msra.mxu0 %v9038_v29  ;;  %4575 = vmatpush1.bf16.msra.mxu1 %v9041_v31  ;;  %v9103_v29 = vld [vmem:[#allocation16 + $0x22c] ss:$16 sps:$4 sm:$0xff]  }
 0x8f8   :  { %4494 = vmatprep.subr.bf16.mxu0 %v9046_v32  ;;  %4576 = vmatprep.subr.bf16.mxu1 %v9049_v33  ;;  %v9098_v32 = vld [vmem:[#allocation16 + $0x220] ss:$16 sps:$4 sm:$0xff]   ;;  %v9101_v33 = vld [vmem:[#allocation16 + $0x228] ss:$16 sps:$4 sm:$0xff]  }
 0x8fb   :  { %4495 = vmatpush1.bf16.msra.mxu0 %v9044_v34  ;;  %4577 = vmatpush1.bf16.msra.mxu1 %v9047_v36  ;;  %v9106_v34 = vld [vmem:[#allocation16 + $0x244] ss:$16 sps:$4 sm:$0xff]   ;;  %v9109_v36 = vld [vmem:[#allocation16 + $0x24c] ss:$16 sps:$4 sm:$0xff]  }
 0x8fc   :  { %4496 = vmatprep.subr.bf16.mxu0 %v9052_v37  ;;  %4578 = vmatprep.subr.bf16.mxu1 %v9055_v38  ;;  %v9104_v37 = vld [vmem:[#allocation16 + $0x240] ss:$16 sps:$4 sm:$0xff]   ;;  %v9107_v38 = vld [vmem:[#allocation16 + $0x248] ss:$16 sps:$4 sm:$0xff]  }
 0x8ff   :  { %4497 = vmatpush1.bf16.msra.mxu0 %v9050_v39  ;;  %4579 = vmatpush1.bf16.msra.mxu1 %v9053_v40  ;;  %v9112_v39 = vld [vmem:[#allocation16 + $0x264] ss:$16 sps:$4 sm:$0xff]   ;;  %v9115_v40 = vld [vmem:[#allocation16 + $0x26c] ss:$16 sps:$4 sm:$0xff]  }
 0x900   :  { %4498 = vmatprep.subr.bf16.mxu0 %v9058_v41  ;;  %4580 = vmatprep.subr.bf16.mxu1 %v9061_v42  ;;  %v9110_v41 = vld [vmem:[#allocation16 + $0x260] ss:$16 sps:$4 sm:$0xff]   ;;  %v9113_v42 = vld [vmem:[#allocation16 + $0x268] ss:$16 sps:$4 sm:$0xff]  }
 0x903   :  { %4499 = vmatpush1.bf16.msra.mxu0 %v9056_v43  ;;  %4581 = vmatpush1.bf16.msra.mxu1 %v9059_v44  ;;  %v9118_v43 = vld [vmem:[#allocation16 + $0x284] ss:$16 sps:$4 sm:$0xff]   ;;  %v9121_v44 = vld [vmem:[#allocation16 + $0x28c] ss:$16 sps:$4 sm:$0xff]  }
 0x904   :  { %4500 = vmatprep.subr.bf16.mxu0 %v9064_v45  ;;  %4582 = vmatprep.subr.bf16.mxu1 %v9067_v46  ;;  %v9116_v45 = vld [vmem:[#allocation16 + $0x280] ss:$16 sps:$4 sm:$0xff]   ;;  %v9119_v46 = vld [vmem:[#allocation16 + $0x288] ss:$16 sps:$4 sm:$0xff]  }
 0x907   :  { %4501 = vmatpush1.bf16.msra.mxu0 %v9062_v47  ;;  %4583 = vmatpush1.bf16.msra.mxu1 %v9065_v48  ;;  %v9124_v47 = vld [vmem:[#allocation16 + $0x2a4] ss:$16 sps:$4 sm:$0xff]   ;;  %v9127_v48 = vld [vmem:[#allocation16 + $0x2ac] ss:$16 sps:$4 sm:$0xff]  }
 0x908   :  { %4502 = vmatprep.subr.bf16.mxu0 %v9070_v49  ;;  %4584 = vmatprep.subr.bf16.mxu1 %v9073_v50  ;;  %v9122_v49 = vld [vmem:[#allocation16 + $0x2a0] ss:$16 sps:$4 sm:$0xff]   ;;  %v9125_v50 = vld [vmem:[#allocation16 + $0x2a8] ss:$16 sps:$4 sm:$0xff]  }
 0x90b   :  { %4503 = vmatpush1.bf16.msra.mxu0 %v9068_v51  ;;  %4585 = vmatpush1.bf16.msra.mxu1 %v9071_v52  ;;  %v9130_v51 = vld [vmem:[#allocation16 + $0x2c4] ss:$16 sps:$4 sm:$0xff]   ;;  %v9133_v52 = vld [vmem:[#allocation16 + $0x2cc] ss:$16 sps:$4 sm:$0xff]  }
 0x90c   :  { %4504 = vmatprep.subr.bf16.mxu0 %v9076_v53  ;;  %4586 = vmatprep.subr.bf16.mxu1 %v9079_v56  ;;  %v9128_v53 = vld [vmem:[#allocation16 + $0x2c0] ss:$16 sps:$4 sm:$0xff]   ;;  %v9131_v56 = vld [vmem:[#allocation16 + $0x2c8] ss:$16 sps:$4 sm:$0xff]  }
 0x90f   :  { %4505 = vmatpush1.bf16.msra.mxu0 %v9074_v57  ;;  %4587 = vmatpush1.bf16.msra.mxu1 %v9077_v58  ;;  %v9136_v57 = vld [vmem:[#allocation16 + $0x2e4] ss:$16 sps:$4 sm:$0xff]   ;;  %v9139_v58 = vld [vmem:[#allocation16 + $0x2ec] ss:$16 sps:$4 sm:$0xff]  }
 0x910   :  { %4506 = vmatprep.subr.bf16.mxu0 %v9082_v59  ;;  %4588 = vmatprep.subr.bf16.mxu1 %v9085_v63  ;;  %v9134_v59 = vld [vmem:[#allocation16 + $0x2e0] ss:$16 sps:$4 sm:$0xff]   ;;  %v9137_v63 = vld [vmem:[#allocation16 + $0x2e8] ss:$16 sps:$4 sm:$0xff]  }
 0x913   :  { %4507 = vmatpush1.bf16.msra.mxu0 %v9080_v30  ;;  %4589 = vmatpush1.bf16.msra.mxu1 %v9083_v2  ;;  %v9142_v30 = vld [vmem:[#allocation16 + $0x304] ss:$16 sps:$4 sm:$0xff]   ;;  %v9145_v2 = vld [vmem:[#allocation16 + $0x30c] ss:$16 sps:$4 sm:$0xff]  }
 0x914   :  { %4508 = vmatprep.subr.bf16.mxu0 %v9088_v3  ;;  %4590 = vmatprep.subr.bf16.mxu1 %v9091_v4  ;;  %v9140_v3 = vld [vmem:[#allocation16 + $0x300] ss:$16 sps:$4 sm:$0xff]   ;;  %v9143_v4 = vld [vmem:[#allocation16 + $0x308] ss:$16 sps:$4 sm:$0xff]  }
 0x917   :  { %4509 = vmatpush1.bf16.msra.mxu0 %v9086_v5  ;;  %4591 = vmatpush1.bf16.msra.mxu1 %v9089_v35  ;;  %v9148_v5 = vld [vmem:[#allocation16 + $0x324] ss:$16 sps:$4 sm:$0xff]   ;;  %v9151_v35 = vld [vmem:[#allocation16 + $0x32c] ss:$16 sps:$4 sm:$0xff]  }
 0x918   :  { %4519 = vmatprep.subr.bf16.mxu0 %v9094_v6  ;;  %4601 = vmatprep.subr.bf16.mxu1 %v9097_v7  ;;  %v9146_v6 = vld [vmem:[#allocation16 + $0x320] ss:$16 sps:$4 sm:$0xff]   ;;  %v9149_v7 = vld [vmem:[#allocation16 + $0x328] ss:$16 sps:$4 sm:$0xff]  }
 0x9ad   :  { %v3590_v13 = vpop.f32.mrb[20].mxu0  ;;  %v10538_v14 = vpop.f32.mrb[20].mxu1 }
 0x9ae   :  { %v8296_v15 = vadd.f32 %v3590_v13, %v2858_v10  ;;  %v3592_v16 = vpop.f32.mrb[21].mxu0  ;;  %v3674_v17 = vpop.f32.mrb[21].mxu1  ;;  %v9154_v10 = vld [vmem:[#allocation16 + $0x344] ss:$16 sps:$4 sm:$0xff]   ;;  %v9155_v13 = vld [vmem:[#allocation16 + $0x348] ss:$16 sps:$4 sm:$0xff]  }
 0x9af   :  { %v8297_v61 = vadd.f32 %v3592_v16, %v2862_v11  ;;  %v8299_v18 = vadd.f32 %v3674_v17, %v2870_v12  ;;  %v3594_v19 = vpop.f32.mrb[22].mxu0  ;;  %v3676_v20 = vpop.f32.mrb[22].mxu1  ;;  %v9157_v11 = vld [vmem:[#allocation16 + $0x34c] ss:$16 sps:$4 sm:$0xff]   ;;  %v9152_v12 = vld [vmem:[#allocation16 + $0x340] ss:$16 sps:$4 sm:$0xff]  }
 0x9b0   :  { %v3679_v21 = vmax.f32 %v8296_v15, 0.0  ;;  %v3595_v22 = vpop.f32.mrb[23].mxu0  ;;  %v3677_v23 = vpop.f32.mrb[23].mxu1  ;;  %v9160_v15 = vld [vmem:[#allocation16 + $0x364] ss:$16 sps:$4 sm:$0xff]  }
 0x9b1   :  { %v3680_v54 = vmax.f32 %v8297_v61, 0.0  ;;  %v3682_v24 = vmax.f32 %v8299_v18, 0.0  ;;  %v9163_v16 = vld [vmem:[#allocation16 + $0x36c] ss:$16 sps:$4 sm:$0xff]   ;;  %v9158_v17 = vld [vmem:[#allocation16 + $0x360] ss:$16 sps:$4 sm:$0xff]  }
 0x9b2   :  { %v3683_v60 = vpack.c.bf16 %v3679_v21, %v3679_v21  ;;  %v9161_v61 = vld [vmem:[#allocation16 + $0x368] ss:$16 sps:$4 sm:$0xff]   ;;  %v9166_v18 = vld [vmem:[#allocation16 + $0x384] ss:$16 sps:$4 sm:$0xff]   ;;  %v9169_v19 = vld [vmem:[#allocation16 + $0x38c] ss:$16 sps:$4 sm:$0xff]  }
 0x9b3   :  { %v3684_v25 = vpack.c.bf16 %v3680_v54, %v3680_v54  ;;  %v3686_v31 = vpack.c.bf16 %v3682_v24, %v3682_v24  ;;  %v9164_v20 = vld [vmem:[#allocation16 + $0x380] ss:$16 sps:$4 sm:$0xff]   ;;  %v9167_v21 = vld [vmem:[#allocation16 + $0x388] ss:$16 sps:$4 sm:$0xff]   ;;  %v9172_v22 = vld [vmem:[#allocation16 + $0x3a4] ss:$16 sps:$4 sm:$0xff]  }
 0x9b4   :  { %v9175_v23 = vld [vmem:[#allocation16 + $0x3ac] ss:$16 sps:$4 sm:$0xff]   ;;  %v9170_v54 = vld [vmem:[#allocation16 + $0x3a0] ss:$16 sps:$4 sm:$0xff]   ;;  %v9173_v24 = vld [vmem:[#allocation16 + $0x3a8] ss:$16 sps:$4 sm:$0xff]  }
 0x9b5   :  { %4510 = vmatprep.mubr.bf16.mxu0 %v3684_v25  ;;  %4592 = vmatprep.mubr.bf16.mxu1 %v3684_v25  ;;  %v2866_v25 = vrot.slane %v10530_v8, %v10512_v9  ;;  %v9190_v8 = vld [vmem:[#allocation18 + $0x4] ss:$16 sps:$4 sm:$0xff]  }
 0x9b6   :  { %4511 = vmatmul.mubr.bf16.vlgmr.msra.gmra.mrb[24].mxu0 %v3683_v60  ;;  %4593 = vmatmul.mubr.bf16.vlgmr.msra.gmra.mrb[24].mxu1 %v3683_v60  ;;  %v9176_v60 = vld [vmem:[#allocation16 + $0x3c0] ss:$16 sps:$4 sm:$0xff]  }
 0x9b7   :  { %4520 = vmatpush1.bf16.msra.mxu0 %v9092_v26  ;;  %4602 = vmatpush1.bf16.msra.mxu1 %v9095_v27  ;;  %v9178_v26 = vld [vmem:[#allocation16 + $0x3c4] ss:$16 sps:$4 sm:$0xff]   ;;  %v9181_v27 = vld [vmem:[#allocation16 + $0x3cc] ss:$16 sps:$4 sm:$0xff]  }
 0x9b8   :  { %4551 = vmatprep.mubr.bf16.mxu0 %v3686_v31  ;;  %4633 = vmatprep.mubr.bf16.mxu1 %v3686_v31  ;;  %v9184_v31 = vld [vmem:[#allocation16 + $0x3e4] ss:$16 sps:$4 sm:$0xff]  }
 0x9b9   :  { %4521 = vmatprep.subr.bf16.mxu0 %v9100_v28  ;;  %4603 = vmatprep.subr.bf16.mxu1 %v9103_v29  ;;  %v9179_v28 = vld [vmem:[#allocation16 + $0x3c8] ss:$16 sps:$4 sm:$0xff]   ;;  %v8298_v29 = vadd.f32 %v10538_v14, %v2866_v25  ;;  %v9196_v14 = vld [vmem:[#allocation18 + $0x24] ss:$16 sps:$4 sm:$0xff]  }
 0x9ba   :  { %v9257_v25 = vld [vmem:[#allocation18 + $0x168] ss:$16 sps:$4 sm:$0xff]  }
 0x9bb   :  { %4522 = vmatpush1.bf16.msra.mxu0 %v9098_v32  ;;  %4604 = vmatpush1.bf16.msra.mxu1 %v9101_v33  ;;  %v9187_v32 = vld [vmem:[#allocation16 + $0x3ec] ss:$16 sps:$4 sm:$0xff]   ;;  %v9182_v33 = vld [vmem:[#allocation16 + $0x3e0] ss:$16 sps:$4 sm:$0xff]  }
 0x9bc   :  { %4523 = vmatprep.subr.bf16.mxu0 %v9106_v34  ;;  %4605 = vmatprep.subr.bf16.mxu1 %v9109_v36  ;;  %v9185_v34 = vld [vmem:[#allocation16 + $0x3e8] ss:$16 sps:$4 sm:$0xff]   ;;  %v3681_v36 = vmax.f32 %v8298_v29, 0.0  ;;  %v9268_v29 = vld [vmem:[#allocation18 + $0x1a4] ss:$16 sps:$4 sm:$0xff]  }
 0x9bf   :  { %4524 = vmatpush1.bf16.msra.mxu0 %v9104_v37  ;;  %4606 = vmatpush1.bf16.msra.mxu1 %v9107_v38  ;;  %v9193_v37 = vld [vmem:[#allocation18 + $0xc] ss:$16 sps:$4 sm:$0xff]   ;;  %v9188_v38 = vld [vmem:[#allocation18] ss:$16 sps:$4 sm:$0xff]  }
 0x9c0   :  { %4525 = vmatprep.subr.bf16.mxu0 %v9112_v39  ;;  %4607 = vmatprep.subr.bf16.mxu1 %v9115_v40  ;;  %v9191_v39 = vld [vmem:[#allocation18 + $0x8] ss:$16 sps:$4 sm:$0xff]   ;;  %v3685_v40 = vpack.c.bf16 %v3681_v36, %v3681_v36  ;;  %v9277_v36 = vld [vmem:[#allocation18 + $0x1cc] ss:$16 sps:$4 sm:$0xff]  }
 0x9c3   :  { %4526 = vmatpush1.bf16.msra.mxu0 %v9110_v41  ;;  %4608 = vmatpush1.bf16.msra.mxu1 %v9113_v42  ;;  %v9199_v41 = vld [vmem:[#allocation18 + $0x2c] ss:$16 sps:$4 sm:$0xff]   ;;  %v9194_v42 = vld [vmem:[#allocation18 + $0x20] ss:$16 sps:$4 sm:$0xff]  }
 0x9c4   :  { %4527 = vmatprep.subr.bf16.mxu0 %v9118_v43  ;;  %4609 = vmatprep.subr.bf16.mxu1 %v9121_v44  ;;  %v9197_v43 = vld [vmem:[#allocation18 + $0x28] ss:$16 sps:$4 sm:$0xff]   ;;  %v9202_v44 = vld [vmem:[#allocation18 + $0x44] ss:$16 sps:$4 sm:$0xff]  }
 0x9c7   :  { %4528 = vmatpush1.bf16.msra.mxu0 %v9116_v45  ;;  %4610 = vmatpush1.bf16.msra.mxu1 %v9119_v46  ;;  %v9205_v45 = vld [vmem:[#allocation18 + $0x4c] ss:$16 sps:$4 sm:$0xff]   ;;  %v9200_v46 = vld [vmem:[#allocation18 + $0x40] ss:$16 sps:$4 sm:$0xff]  }
 0x9c8   :  { %4529 = vmatprep.subr.bf16.mxu0 %v9124_v47  ;;  %4611 = vmatprep.subr.bf16.mxu1 %v9127_v48  ;;  %v9203_v47 = vld [vmem:[#allocation18 + $0x48] ss:$16 sps:$4 sm:$0xff]   ;;  %v9208_v48 = vld [vmem:[#allocation18 + $0x64] ss:$16 sps:$4 sm:$0xff]  }
 0x9cb   :  { %4530 = vmatpush1.bf16.msra.mxu0 %v9122_v49  ;;  %4612 = vmatpush1.bf16.msra.mxu1 %v9125_v50  ;;  %v9211_v49 = vld [vmem:[#allocation18 + $0x6c] ss:$16 sps:$4 sm:$0xff]   ;;  %v9206_v50 = vld [vmem:[#allocation18 + $0x60] ss:$16 sps:$4 sm:$0xff]  }
 0x9cc   :  { %4531 = vmatprep.subr.bf16.mxu0 %v9130_v51  ;;  %4613 = vmatprep.subr.bf16.mxu1 %v9133_v52  ;;  %v9209_v51 = vld [vmem:[#allocation18 + $0x68] ss:$16 sps:$4 sm:$0xff]   ;;  %v9214_v52 = vld [vmem:[#allocation18 + $0x84] ss:$16 sps:$4 sm:$0xff]  }
 0x9cf   :  { %4532 = vmatpush1.bf16.msra.mxu0 %v9128_v53  ;;  %4614 = vmatpush1.bf16.msra.mxu1 %v9131_v56  ;;  %v9217_v53 = vld [vmem:[#allocation18 + $0x8c] ss:$16 sps:$4 sm:$0xff]   ;;  %v9212_v56 = vld [vmem:[#allocation18 + $0x80] ss:$16 sps:$4 sm:$0xff]  }
 0x9d0   :  { %4533 = vmatprep.subr.bf16.mxu0 %v9136_v57  ;;  %4615 = vmatprep.subr.bf16.mxu1 %v9139_v58  ;;  %v9215_v57 = vld [vmem:[#allocation18 + $0x88] ss:$16 sps:$4 sm:$0xff]   ;;  %v9220_v58 = vld [vmem:[#allocation18 + $0xa4] ss:$16 sps:$4 sm:$0xff]  }
 0x9d3   :  { %4534 = vmatpush1.bf16.msra.mxu0 %v9134_v59  ;;  %4616 = vmatpush1.bf16.msra.mxu1 %v9137_v63  ;;  %v9223_v59 = vld [vmem:[#allocation18 + $0xac] ss:$16 sps:$4 sm:$0xff]   ;;  %v9218_v63 = vld [vmem:[#allocation18 + $0xa0] ss:$16 sps:$4 sm:$0xff]  }
 0x9d4   :  { %4535 = vmatprep.subr.bf16.mxu0 %v9142_v30  ;;  %4617 = vmatprep.subr.bf16.mxu1 %v9145_v2  ;;  %v9221_v30 = vld [vmem:[#allocation18 + $0xa8] ss:$16 sps:$4 sm:$0xff]   ;;  %v9226_v2 = vld [vmem:[#allocation18 + $0xc4] ss:$16 sps:$4 sm:$0xff]  }
 0x9d7   :  { %4536 = vmatpush1.bf16.msra.mxu0 %v9140_v3  ;;  %4618 = vmatpush1.bf16.msra.mxu1 %v9143_v4  ;;  %v9229_v3 = vld [vmem:[#allocation18 + $0xcc] ss:$16 sps:$4 sm:$0xff]   ;;  %v9224_v4 = vld [vmem:[#allocation18 + $0xc0] ss:$16 sps:$4 sm:$0xff]  }
 0x9d8   :  { %4537 = vmatprep.subr.bf16.mxu0 %v9148_v5  ;;  %4619 = vmatprep.subr.bf16.mxu1 %v9151_v35  ;;  %v9227_v5 = vld [vmem:[#allocation18 + $0xc8] ss:$16 sps:$4 sm:$0xff]   ;;  %v9232_v35 = vld [vmem:[#allocation18 + $0xe4] ss:$16 sps:$4 sm:$0xff]  }
 0x9db   :  { %4538 = vmatpush1.bf16.msra.mxu0 %v9146_v6  ;;  %4620 = vmatpush1.bf16.msra.mxu1 %v9149_v7  ;;  %v9235_v6 = vld [vmem:[#allocation18 + $0xec] ss:$16 sps:$4 sm:$0xff]   ;;  %v9230_v7 = vld [vmem:[#allocation18 + $0xe0] ss:$16 sps:$4 sm:$0xff]  }
 0x9dc   :  { %4539 = vmatprep.subr.bf16.mxu0 %v9154_v10  ;;  %4621 = vmatprep.subr.bf16.mxu1 %v9157_v11  ;;  %v9233_v10 = vld [vmem:[#allocation18 + $0xe8] ss:$16 sps:$4 sm:$0xff]   ;;  %v9238_v11 = vld [vmem:[#allocation18 + $0x104] ss:$16 sps:$4 sm:$0xff]  }
 0x9df   :  { %4540 = vmatpush1.bf16.msra.mxu0 %v9152_v12  ;;  %4622 = vmatpush1.bf16.msra.mxu1 %v9155_v13  ;;  %v9241_v12 = vld [vmem:[#allocation18 + $0x10c] ss:$16 sps:$4 sm:$0xff]   ;;  %v9236_v13 = vld [vmem:[#allocation18 + $0x100] ss:$16 sps:$4 sm:$0xff]  }
 0x9e0   :  { %4541 = vmatprep.subr.bf16.mxu0 %v9160_v15  ;;  %4623 = vmatprep.subr.bf16.mxu1 %v9163_v16  ;;  %v9239_v15 = vld [vmem:[#allocation18 + $0x108] ss:$16 sps:$4 sm:$0xff]   ;;  %v9244_v16 = vld [vmem:[#allocation18 + $0x124] ss:$16 sps:$4 sm:$0xff]  }
 0x9e3   :  { %4542 = vmatpush1.bf16.msra.mxu0 %v9158_v17  ;;  %4624 = vmatpush1.bf16.msra.mxu1 %v9161_v61  ;;  %v9247_v17 = vld [vmem:[#allocation18 + $0x12c] ss:$16 sps:$4 sm:$0xff]   ;;  %v9242_v61 = vld [vmem:[#allocation18 + $0x120] ss:$16 sps:$4 sm:$0xff]  }
 0x9e4   :  { %4543 = vmatprep.subr.bf16.mxu0 %v9166_v18  ;;  %4625 = vmatprep.subr.bf16.mxu1 %v9169_v19  ;;  %v9245_v18 = vld [vmem:[#allocation18 + $0x128] ss:$16 sps:$4 sm:$0xff]   ;;  %v9250_v19 = vld [vmem:[#allocation18 + $0x144] ss:$16 sps:$4 sm:$0xff]  }
 0x9e7   :  { %4544 = vmatpush1.bf16.msra.mxu0 %v9164_v20  ;;  %4626 = vmatpush1.bf16.msra.mxu1 %v9167_v21  ;;  %v9253_v20 = vld [vmem:[#allocation18 + $0x14c] ss:$16 sps:$4 sm:$0xff]   ;;  %v9248_v21 = vld [vmem:[#allocation18 + $0x140] ss:$16 sps:$4 sm:$0xff]  }
 0x9e8   :  { %4545 = vmatprep.subr.bf16.mxu0 %v9172_v22  ;;  %4627 = vmatprep.subr.bf16.mxu1 %v9175_v23  ;;  %v9251_v22 = vld [vmem:[#allocation18 + $0x148] ss:$16 sps:$4 sm:$0xff]   ;;  %v9256_v23 = vld [vmem:[#allocation18 + $0x164] ss:$16 sps:$4 sm:$0xff]  }
 0x9eb   :  { %4546 = vmatpush1.bf16.msra.mxu0 %v9170_v54  ;;  %4628 = vmatpush1.bf16.msra.mxu1 %v9173_v24  ;;  %v9259_v54 = vld [vmem:[#allocation18 + $0x16c] ss:$16 sps:$4 sm:$0xff]   ;;  %v9254_v24 = vld [vmem:[#allocation18 + $0x160] ss:$16 sps:$4 sm:$0xff]  }
 0x9ec   :  { %4547 = vmatprep.subr.bf16.mxu0 %v9178_v26  ;;  %4629 = vmatprep.subr.bf16.mxu1 %v9181_v27  ;;  %v9262_v26 = vld [vmem:[#allocation18 + $0x184] ss:$16 sps:$4 sm:$0xff]   ;;  %v9265_v27 = vld [vmem:[#allocation18 + $0x18c] ss:$16 sps:$4 sm:$0xff]  }
 0x9ef   :  { %4548 = vmatpush1.bf16.msra.mxu0 %v9176_v60  ;;  %4630 = vmatpush1.bf16.msra.mxu1 %v9179_v28  ;;  %v9260_v60 = vld [vmem:[#allocation18 + $0x180] ss:$16 sps:$4 sm:$0xff]   ;;  %v9263_v28 = vld [vmem:[#allocation18 + $0x188] ss:$16 sps:$4 sm:$0xff]  }
 0x9f0   :  { %4549 = vmatprep.subr.bf16.mxu0 %v9184_v31  ;;  %4631 = vmatprep.subr.bf16.mxu1 %v9187_v32  ;;  %v9271_v31 = vld [vmem:[#allocation18 + $0x1ac] ss:$16 sps:$4 sm:$0xff]   ;;  %v9266_v32 = vld [vmem:[#allocation18 + $0x1a0] ss:$16 sps:$4 sm:$0xff]  }
 0x9f3   :  { %4550 = vmatpush1.bf16.msra.mxu0 %v9182_v33  ;;  %4632 = vmatpush1.bf16.msra.mxu1 %v9185_v34  ;;  %v9269_v33 = vld [vmem:[#allocation18 + $0x1a8] ss:$16 sps:$4 sm:$0xff]   ;;  %v9274_v34 = vld [vmem:[#allocation18 + $0x1c4] ss:$16 sps:$4 sm:$0xff]  }
 0x9f4   :  { %5441 = vmatprep.subr.bf16.mxu0 %v9190_v8  ;;  %5523 = vmatprep.subr.bf16.mxu1 %v9193_v37  ;;  %v9272_v8 = vld [vmem:[#allocation18 + $0x1c0] ss:$16 sps:$4 sm:$0xff]   ;;  %v9275_v37 = vld [vmem:[#allocation18 + $0x1c8] ss:$16 sps:$4 sm:$0xff]  }
 0x9f6   :  { %4552 = vmatmul.mubr.bf16.vlgmr.msra.gmra.mrb[24].mxu0 %v3685_v40  ;;  %4634 = vmatmul.mubr.bf16.vlgmr.msra.gmra.mrb[24].mxu1 %v3685_v40  ;;  %v9278_v40 = vld [vmem:[#allocation18 + $0x1e0] ss:$16 sps:$4 sm:$0xff]  }
 0x9f7   :  { %5442 = vmatpush1.bf16.msra.mxu0 %v9188_v38  ;;  %5524 = vmatpush1.bf16.msra.mxu1 %v9191_v39  ;;  %v9280_v38 = vld [vmem:[#allocation18 + $0x1e4] ss:$16 sps:$4 sm:$0xff]   ;;  %v9283_v39 = vld [vmem:[#allocation18 + $0x1ec] ss:$16 sps:$4 sm:$0xff]  }
 0x9f8   :  { %5443 = vmatprep.subr.bf16.mxu0 %v9196_v14  ;;  %5525 = vmatprep.subr.bf16.mxu1 %v9199_v41  ;;  %v9281_v14 = vld [vmem:[#allocation18 + $0x1e8] ss:$16 sps:$4 sm:$0xff]   ;;  %v9286_v41 = vld [vmem:[#allocation18 + $0x204] ss:$16 sps:$4 sm:$0xff]  }
 0x9fb   :  { %5444 = vmatpush1.bf16.msra.mxu0 %v9194_v42  ;;  %5526 = vmatpush1.bf16.msra.mxu1 %v9197_v43  ;;  %v9289_v42 = vld [vmem:[#allocation18 + $0x20c] ss:$16 sps:$4 sm:$0xff]   ;;  %v10543_v43 = vld [vmem:[#allocation28 + $0x21] ss:$8 sm:$0xf] }
 0x9fc   :  { %5445 = vmatprep.subr.bf16.mxu0 %v9202_v44  ;;  %5527 = vmatprep.subr.bf16.mxu1 %v9205_v45  ;;  %v3821_v44 = vrot.slane %v10543_v43, %v10487_v62  ;;  %v3825_v45 = vrot.slane %v10543_v43, %v10490_v1 }
 0x9ff   :  { %5446 = vmatpush1.bf16.msra.mxu0 %v9200_v46  ;;  %5528 = vmatpush1.bf16.msra.mxu1 %v9203_v47  ;;  %v3833_v46 = vrot.slane %v10543_v43, %v10501_v55 }
 0xa00   :  { %5447 = vmatprep.subr.bf16.mxu0 %v9208_v48  ;;  %5529 = vmatprep.subr.bf16.mxu1 %v9211_v49 }
 0xa03   :  { %5448 = vmatpush1.bf16.msra.mxu0 %v9206_v50  ;;  %5530 = vmatpush1.bf16.msra.mxu1 %v9209_v51 }
 0xa04   :  { %5449 = vmatprep.subr.bf16.mxu0 %v9214_v52  ;;  %5531 = vmatprep.subr.bf16.mxu1 %v9217_v53 }
 0xa07   :  { %5450 = vmatpush1.bf16.msra.mxu0 %v9212_v56  ;;  %5532 = vmatpush1.bf16.msra.mxu1 %v9215_v57 }
 0xa08   :  { %5451 = vmatprep.subr.bf16.mxu0 %v9220_v58  ;;  %5533 = vmatprep.subr.bf16.mxu1 %v9223_v59 }
 0xa0b   :  { %5452 = vmatpush1.bf16.msra.mxu0 %v9218_v63  ;;  %5534 = vmatpush1.bf16.msra.mxu1 %v9221_v30 }
 0xa0c   :  { %5453 = vmatprep.subr.bf16.mxu0 %v9226_v2  ;;  %5535 = vmatprep.subr.bf16.mxu1 %v9229_v3 }
 0xa0f   :  { %5454 = vmatpush1.bf16.msra.mxu0 %v9224_v4  ;;  %5536 = vmatpush1.bf16.msra.mxu1 %v9227_v5  ;;  %v9284_v4 = vld [vmem:[#allocation18 + $0x200] ss:$16 sps:$4 sm:$0xff]   ;;  %v9287_v5 = vld [vmem:[#allocation18 + $0x208] ss:$16 sps:$4 sm:$0xff]  }
 0xa10   :  { %5455 = vmatprep.subr.bf16.mxu0 %v9232_v35  ;;  %5537 = vmatprep.subr.bf16.mxu1 %v9235_v6  ;;  %v9292_v6 = vld [vmem:[#allocation18 + $0x224] ss:$16 sps:$4 sm:$0xff]  }
 0xa13   :  { %5456 = vmatpush1.bf16.msra.mxu0 %v9230_v7  ;;  %5538 = vmatpush1.bf16.msra.mxu1 %v9233_v10  ;;  %v9295_v7 = vld [vmem:[#allocation18 + $0x22c] ss:$16 sps:$4 sm:$0xff]  }
 0xa14   :  { %5457 = vmatprep.subr.bf16.mxu0 %v9238_v11  ;;  %5539 = vmatprep.subr.bf16.mxu1 %v9241_v12  ;;  %v9290_v11 = vld [vmem:[#allocation18 + $0x220] ss:$16 sps:$4 sm:$0xff]   ;;  %v9293_v12 = vld [vmem:[#allocation18 + $0x228] ss:$16 sps:$4 sm:$0xff]  }
 0xa17   :  { %5458 = vmatpush1.bf16.msra.mxu0 %v9236_v13  ;;  %5540 = vmatpush1.bf16.msra.mxu1 %v9239_v15  ;;  %v9298_v13 = vld [vmem:[#allocation18 + $0x244] ss:$16 sps:$4 sm:$0xff]   ;;  %v9301_v15 = vld [vmem:[#allocation18 + $0x24c] ss:$16 sps:$4 sm:$0xff]  }
 0xa18   :  { %5459 = vmatprep.subr.bf16.mxu0 %v9244_v16  ;;  %5541 = vmatprep.subr.bf16.mxu1 %v9247_v17  ;;  %v9296_v16 = vld [vmem:[#allocation18 + $0x240] ss:$16 sps:$4 sm:$0xff]   ;;  %v9299_v17 = vld [vmem:[#allocation18 + $0x248] ss:$16 sps:$4 sm:$0xff]  }
 0xa1b   :  { %5460 = vmatpush1.bf16.msra.mxu0 %v9242_v61  ;;  %5542 = vmatpush1.bf16.msra.mxu1 %v9245_v18  ;;  %v9304_v61 = vld [vmem:[#allocation18 + $0x264] ss:$16 sps:$4 sm:$0xff]   ;;  %v9307_v18 = vld [vmem:[#allocation18 + $0x26c] ss:$16 sps:$4 sm:$0xff]  }
 0xa1c   :  { %5461 = vmatprep.subr.bf16.mxu0 %v9250_v19  ;;  %5543 = vmatprep.subr.bf16.mxu1 %v9253_v20  ;;  %v9302_v19 = vld [vmem:[#allocation18 + $0x260] ss:$16 sps:$4 sm:$0xff]   ;;  %v9305_v20 = vld [vmem:[#allocation18 + $0x268] ss:$16 sps:$4 sm:$0xff]  }
 0xa1f   :  { %5462 = vmatpush1.bf16.msra.mxu0 %v9248_v21  ;;  %5544 = vmatpush1.bf16.msra.mxu1 %v9251_v22  ;;  %v9310_v21 = vld [vmem:[#allocation18 + $0x284] ss:$16 sps:$4 sm:$0xff]   ;;  %v9313_v22 = vld [vmem:[#allocation18 + $0x28c] ss:$16 sps:$4 sm:$0xff]  }
 0xa20   :  { %5463 = vmatprep.subr.bf16.mxu0 %v9256_v23  ;;  %5545 = vmatprep.subr.bf16.mxu1 %v9259_v54  ;;  %v9308_v23 = vld [vmem:[#allocation18 + $0x280] ss:$16 sps:$4 sm:$0xff]   ;;  %v9311_v54 = vld [vmem:[#allocation18 + $0x288] ss:$16 sps:$4 sm:$0xff]  }
 0xa23   :  { %5464 = vmatpush1.bf16.msra.mxu0 %v9254_v24  ;;  %5546 = vmatpush1.bf16.msra.mxu1 %v9257_v25  ;;  %v9316_v24 = vld [vmem:[#allocation18 + $0x2a4] ss:$16 sps:$4 sm:$0xff]   ;;  %v9319_v25 = vld [vmem:[#allocation18 + $0x2ac] ss:$16 sps:$4 sm:$0xff]  }
 0xa24   :  { %5465 = vmatprep.subr.bf16.mxu0 %v9262_v26  ;;  %5547 = vmatprep.subr.bf16.mxu1 %v9265_v27  ;;  %v9314_v26 = vld [vmem:[#allocation18 + $0x2a0] ss:$16 sps:$4 sm:$0xff]   ;;  %v9317_v27 = vld [vmem:[#allocation18 + $0x2a8] ss:$16 sps:$4 sm:$0xff]  }
 0xa27   :  { %5466 = vmatpush1.bf16.msra.mxu0 %v9260_v60  ;;  %5548 = vmatpush1.bf16.msra.mxu1 %v9263_v28  ;;  %v9322_v60 = vld [vmem:[#allocation18 + $0x2c4] ss:$16 sps:$4 sm:$0xff]   ;;  %v9325_v28 = vld [vmem:[#allocation18 + $0x2cc] ss:$16 sps:$4 sm:$0xff]  }
 0xa28   :  { %5467 = vmatprep.subr.bf16.mxu0 %v9268_v29  ;;  %5549 = vmatprep.subr.bf16.mxu1 %v9271_v31  ;;  %v9320_v29 = vld [vmem:[#allocation18 + $0x2c0] ss:$16 sps:$4 sm:$0xff]   ;;  %v9323_v31 = vld [vmem:[#allocation18 + $0x2c8] ss:$16 sps:$4 sm:$0xff]  }
 0xa2b   :  { %5468 = vmatpush1.bf16.msra.mxu0 %v9266_v32  ;;  %5550 = vmatpush1.bf16.msra.mxu1 %v9269_v33  ;;  %v9328_v32 = vld [vmem:[#allocation18 + $0x2e4] ss:$16 sps:$4 sm:$0xff]   ;;  %v9331_v33 = vld [vmem:[#allocation18 + $0x2ec] ss:$16 sps:$4 sm:$0xff]  }
 0xa2c   :  { %5469 = vmatprep.subr.bf16.mxu0 %v9274_v34  ;;  %5551 = vmatprep.subr.bf16.mxu1 %v9277_v36  ;;  %v9326_v34 = vld [vmem:[#allocation18 + $0x2e0] ss:$16 sps:$4 sm:$0xff]   ;;  %v9329_v36 = vld [vmem:[#allocation18 + $0x2e8] ss:$16 sps:$4 sm:$0xff]  }
 0xa2f   :  { %5470 = vmatpush1.bf16.msra.mxu0 %v9272_v8  ;;  %5552 = vmatpush1.bf16.msra.mxu1 %v9275_v37  ;;  %v9334_v8 = vld [vmem:[#allocation18 + $0x304] ss:$16 sps:$4 sm:$0xff]   ;;  %v9337_v37 = vld [vmem:[#allocation18 + $0x30c] ss:$16 sps:$4 sm:$0xff]  }
 0xa30   :  { %5471 = vmatprep.subr.bf16.mxu0 %v9280_v38  ;;  %5553 = vmatprep.subr.bf16.mxu1 %v9283_v39  ;;  %v9332_v38 = vld [vmem:[#allocation18 + $0x300] ss:$16 sps:$4 sm:$0xff]   ;;  %v9335_v39 = vld [vmem:[#allocation18 + $0x308] ss:$16 sps:$4 sm:$0xff]  }
 0xa33   :  { %5472 = vmatpush1.bf16.msra.mxu0 %v9278_v40  ;;  %5554 = vmatpush1.bf16.msra.mxu1 %v9281_v14  ;;  %v9340_v40 = vld [vmem:[#allocation18 + $0x324] ss:$16 sps:$4 sm:$0xff]   ;;  %v9343_v14 = vld [vmem:[#allocation18 + $0x32c] ss:$16 sps:$4 sm:$0xff]  }
 0xa34   :  { %5482 = vmatprep.subr.bf16.mxu0 %v9286_v41  ;;  %5564 = vmatprep.subr.bf16.mxu1 %v9289_v42  ;;  %v9338_v41 = vld [vmem:[#allocation18 + $0x320] ss:$16 sps:$4 sm:$0xff]   ;;  %v9341_v42 = vld [vmem:[#allocation18 + $0x328] ss:$16 sps:$4 sm:$0xff]  }
 0xac9   :  { %v4553_v47 = vpop.f32.mrb[24].mxu0  ;;  %v10551_v48 = vpop.f32.mrb[24].mxu1 }
 0xaca   :  { %v8300_v49 = vadd.f32 %v4553_v47, %v3821_v44  ;;  %v4555_v50 = vpop.f32.mrb[25].mxu0  ;;  %v4637_v51 = vpop.f32.mrb[25].mxu1  ;;  %v9346_v44 = vld [vmem:[#allocation18 + $0x344] ss:$16 sps:$4 sm:$0xff]   ;;  %v9347_v47 = vld [vmem:[#allocation18 + $0x348] ss:$16 sps:$4 sm:$0xff]  }
 0xacb   :  { %v8301_v52 = vadd.f32 %v4555_v50, %v3825_v45  ;;  %v8303_v53 = vadd.f32 %v4637_v51, %v3833_v46  ;;  %v4557_v56 = vpop.f32.mrb[26].mxu0  ;;  %v4639_v57 = vpop.f32.mrb[26].mxu1  ;;  %v9349_v45 = vld [vmem:[#allocation18 + $0x34c] ss:$16 sps:$4 sm:$0xff]   ;;  %v9344_v46 = vld [vmem:[#allocation18 + $0x340] ss:$16 sps:$4 sm:$0xff]  }
 0xacc   :  { %v4642_v58 = vmax.f32 %v8300_v49, 0.0  ;;  %v4558_v59 = vpop.f32.mrb[27].mxu0  ;;  %v4640_v63 = vpop.f32.mrb[27].mxu1  ;;  %v9352_v49 = vld [vmem:[#allocation18 + $0x364] ss:$16 sps:$4 sm:$0xff]  }
 0xacd   :  { %v4643_v30 = vmax.f32 %v8301_v52, 0.0  ;;  %v4645_v2 = vmax.f32 %v8303_v53, 0.0  ;;  %v9355_v50 = vld [vmem:[#allocation18 + $0x36c] ss:$16 sps:$4 sm:$0xff]   ;;  %v9350_v51 = vld [vmem:[#allocation18 + $0x360] ss:$16 sps:$4 sm:$0xff]  }
 0xace   :  { %v4646_v35 = vpack.c.bf16 %v4642_v58, %v4642_v58  ;;  %v9353_v52 = vld [vmem:[#allocation18 + $0x368] ss:$16 sps:$4 sm:$0xff]   ;;  %v9358_v53 = vld [vmem:[#allocation18 + $0x384] ss:$16 sps:$4 sm:$0xff]   ;;  %v9361_v56 = vld [vmem:[#allocation18 + $0x38c] ss:$16 sps:$4 sm:$0xff]  }
 0xacf   :  { %v4647_v3 = vpack.c.bf16 %v4643_v30, %v4643_v30  ;;  %v4649_v10 = vpack.c.bf16 %v4645_v2, %v4645_v2  ;;  %v9356_v57 = vld [vmem:[#allocation18 + $0x380] ss:$16 sps:$4 sm:$0xff]   ;;  %v9359_v58 = vld [vmem:[#allocation18 + $0x388] ss:$16 sps:$4 sm:$0xff]   ;;  %v9364_v59 = vld [vmem:[#allocation18 + $0x3a4] ss:$16 sps:$4 sm:$0xff]  }
 0xad0   :  { %v9367_v63 = vld [vmem:[#allocation18 + $0x3ac] ss:$16 sps:$4 sm:$0xff]   ;;  %v9362_v30 = vld [vmem:[#allocation18 + $0x3a0] ss:$16 sps:$4 sm:$0xff]   ;;  %v9365_v2 = vld [vmem:[#allocation18 + $0x3a8] ss:$16 sps:$4 sm:$0xff]  }
 0xad1   :  { %5473 = vmatprep.mubr.bf16.mxu0 %v4647_v3  ;;  %5555 = vmatprep.mubr.bf16.mxu1 %v4647_v3  ;;  %v3829_v3 = vrot.slane %v10543_v43, %v10512_v9  ;;  %v9382_v43 = vld [vmem:[#allocation19 + $0x4] ss:$8 sps:$4 sm:$0xff]  }
 0xad2   :  { %5474 = vmatmul.mubr.bf16.vlgmr.msra.gmra.mrb[28].mxu0 %v4646_v35  ;;  %5556 = vmatmul.mubr.bf16.vlgmr.msra.gmra.mrb[28].mxu1 %v4646_v35  ;;  %v9368_v35 = vld [vmem:[#allocation18 + $0x3c0] ss:$16 sps:$4 sm:$0xff]  }
 0xad3   :  { %5483 = vmatpush1.bf16.msra.mxu0 %v9284_v4  ;;  %5565 = vmatpush1.bf16.msra.mxu1 %v9287_v5  ;;  %v9370_v4 = vld [vmem:[#allocation18 + $0x3c4] ss:$16 sps:$4 sm:$0xff]   ;;  %v9373_v5 = vld [vmem:[#allocation18 + $0x3cc] ss:$16 sps:$4 sm:$0xff]  }
 0xad4   :  { %5514 = vmatprep.mubr.bf16.mxu0 %v4649_v10  ;;  %5596 = vmatprep.mubr.bf16.mxu1 %v4649_v10  ;;  %v9376_v10 = vld [vmem:[#allocation18 + $0x3e4] ss:$16 sps:$4 sm:$0xff]  }
 0xad5   :  { %5484 = vmatprep.subr.bf16.mxu0 %v9292_v6  ;;  %5566 = vmatprep.subr.bf16.mxu1 %v9295_v7  ;;  %v9371_v6 = vld [vmem:[#allocation18 + $0x3c8] ss:$16 sps:$4 sm:$0xff]   ;;  %v8302_v7 = vadd.f32 %v10551_v48, %v3829_v3  ;;  %v9499_v3 = vld [vmem:[%s10756_s13 + $0x74] ss:$8 sps:$4 sm:$0xff]  }
 0xad6   :  { %v9383_v48 = vld [vmem:[#allocation19 + $0x10] ss:$8 sps:$4 sm:$0xff]  }
 0xad7   :  { %5485 = vmatpush1.bf16.msra.mxu0 %v9290_v11  ;;  %5567 = vmatpush1.bf16.msra.mxu1 %v9293_v12  ;;  %v9379_v11 = vld [vmem:[#allocation18 + $0x3ec] ss:$16 sps:$4 sm:$0xff]   ;;  %v9374_v12 = vld [vmem:[#allocation18 + $0x3e0] ss:$16 sps:$4 sm:$0xff]  }
 0xad8   :  { %5486 = vmatprep.subr.bf16.mxu0 %v9298_v13  ;;  %5568 = vmatprep.subr.bf16.mxu1 %v9301_v15  ;;  %v9377_v13 = vld [vmem:[#allocation18 + $0x3e8] ss:$16 sps:$4 sm:$0xff]   ;;  %v4644_v15 = vmax.f32 %v8302_v7, 0.0 }
 0xad9   :  { %v9503_v7 = vld [vmem:[%s10756_s13 + $0x90] ss:$8 sps:$4 sm:$0xff]  }
 0xadb   :  { %5487 = vmatpush1.bf16.msra.mxu0 %v9296_v16  ;;  %5569 = vmatpush1.bf16.msra.mxu1 %v9299_v17  ;;  %v9380_v16 = vld [vmem:[#allocation19] ss:$8 sps:$4 sm:$0xff]   ;;  %v4648_v17 = vpack.c.bf16 %v4644_v15, %v4644_v15  ;;  %v9514_v15 = vld [vmem:[%s10756_s13 + $0xc4] ss:$8 sps:$4 sm:$0xff]  }
 0xadc   :  { %5488 = vmatprep.subr.bf16.mxu0 %v9304_v61  ;;  %5570 = vmatprep.subr.bf16.mxu1 %v9307_v18  ;;  %v9385_v61 = vld [vmem:[#allocation19 + $0x14] ss:$8 sps:$4 sm:$0xff]   ;;  %v9388_v18 = vld [vmem:[#allocation19 + $0x24] ss:$8 sps:$4 sm:$0xff]  }
 0xadf   :  { %5489 = vmatpush1.bf16.msra.mxu0 %v9302_v19  ;;  %5571 = vmatpush1.bf16.msra.mxu1 %v9305_v20  ;;  %v9386_v19 = vld [vmem:[#allocation19 + $0x20] ss:$8 sps:$4 sm:$0xff]   ;;  %v9391_v20 = vld [vmem:[#allocation19 + $0x34] ss:$8 sps:$4 sm:$0xff]  }
 0xae0   :  { %5490 = vmatprep.subr.bf16.mxu0 %v9310_v21  ;;  %5572 = vmatprep.subr.bf16.mxu1 %v9313_v22  ;;  %v9389_v21 = vld [vmem:[#allocation19 + $0x30] ss:$8 sps:$4 sm:$0xff]   ;;  %v9394_v22 = vld [vmem:[#allocation19 + $0x44] ss:$8 sps:$4 sm:$0xff]  }
 0xae3   :  { %5491 = vmatpush1.bf16.msra.mxu0 %v9308_v23  ;;  %5573 = vmatpush1.bf16.msra.mxu1 %v9311_v54  ;;  %v9392_v23 = vld [vmem:[#allocation19 + $0x40] ss:$8 sps:$4 sm:$0xff]   ;;  %v9397_v54 = vld [vmem:[#allocation19 + $0x54] ss:$8 sps:$4 sm:$0xff]  }
 0xae4   :  { %5492 = vmatprep.subr.bf16.mxu0 %v9316_v24  ;;  %5574 = vmatprep.subr.bf16.mxu1 %v9319_v25  ;;  %v9395_v24 = vld [vmem:[#allocation19 + $0x50] ss:$8 sps:$4 sm:$0xff]   ;;  %v9400_v25 = vld [vmem:[#allocation19 + $0x64] ss:$8 sps:$4 sm:$0xff]  }
 0xae7   :  { %5493 = vmatpush1.bf16.msra.mxu0 %v9314_v26  ;;  %5575 = vmatpush1.bf16.msra.mxu1 %v9317_v27  ;;  %v9398_v26 = vld [vmem:[#allocation19 + $0x60] ss:$8 sps:$4 sm:$0xff]   ;;  %v9403_v27 = vld [vmem:[#allocation19 + $0x74] ss:$8 sps:$4 sm:$0xff]  }
 0xae8   :  { %5494 = vmatprep.subr.bf16.mxu0 %v9322_v60  ;;  %5576 = vmatprep.subr.bf16.mxu1 %v9325_v28  ;;  %v9401_v60 = vld [vmem:[#allocation19 + $0x70] ss:$8 sps:$4 sm:$0xff]   ;;  %v9406_v28 = vld [vmem:[#allocation19 + $0x84] ss:$8 sps:$4 sm:$0xff]  }
 0xaeb   :  { %5495 = vmatpush1.bf16.msra.mxu0 %v9320_v29  ;;  %5577 = vmatpush1.bf16.msra.mxu1 %v9323_v31  ;;  %v9404_v29 = vld [vmem:[#allocation19 + $0x80] ss:$8 sps:$4 sm:$0xff]   ;;  %v9409_v31 = vld [vmem:[#allocation19 + $0x94] ss:$8 sps:$4 sm:$0xff]  }
 0xaec   :  { %5496 = vmatprep.subr.bf16.mxu0 %v9328_v32  ;;  %5578 = vmatprep.subr.bf16.mxu1 %v9331_v33  ;;  %v9407_v32 = vld [vmem:[#allocation19 + $0x90] ss:$8 sps:$4 sm:$0xff]   ;;  %v9412_v33 = vld [vmem:[#allocation19 + $0xa4] ss:$8 sps:$4 sm:$0xff]  }
 0xaef   :  { %5497 = vmatpush1.bf16.msra.mxu0 %v9326_v34  ;;  %5579 = vmatpush1.bf16.msra.mxu1 %v9329_v36  ;;  %v9410_v34 = vld [vmem:[#allocation19 + $0xa0] ss:$8 sps:$4 sm:$0xff]   ;;  %v9415_v36 = vld [vmem:[#allocation19 + $0xb4] ss:$8 sps:$4 sm:$0xff]  }
 0xaf0   :  { %5498 = vmatprep.subr.bf16.mxu0 %v9334_v8  ;;  %5580 = vmatprep.subr.bf16.mxu1 %v9337_v37  ;;  %v9413_v8 = vld [vmem:[#allocation19 + $0xb0] ss:$8 sps:$4 sm:$0xff]   ;;  %v9418_v37 = vld [vmem:[#allocation19 + $0xc4] ss:$8 sps:$4 sm:$0xff]  }
 0xaf3   :  { %5499 = vmatpush1.bf16.msra.mxu0 %v9332_v38  ;;  %5581 = vmatpush1.bf16.msra.mxu1 %v9335_v39  ;;  %v9416_v38 = vld [vmem:[#allocation19 + $0xc0] ss:$8 sps:$4 sm:$0xff]   ;;  %v9421_v39 = vld [vmem:[#allocation19 + $0xd4] ss:$8 sps:$4 sm:$0xff]  }
 0xaf4   :  { %5500 = vmatprep.subr.bf16.mxu0 %v9340_v40  ;;  %5582 = vmatprep.subr.bf16.mxu1 %v9343_v14  ;;  %v9419_v40 = vld [vmem:[#allocation19 + $0xd0] ss:$8 sps:$4 sm:$0xff]   ;;  %v9424_v14 = vld [vmem:[#allocation19 + $0xe4] ss:$8 sps:$4 sm:$0xff]  }
 0xaf7   :  { %5501 = vmatpush1.bf16.msra.mxu0 %v9338_v41  ;;  %5583 = vmatpush1.bf16.msra.mxu1 %v9341_v42  ;;  %v9422_v41 = vld [vmem:[#allocation19 + $0xe0] ss:$8 sps:$4 sm:$0xff]   ;;  %v9427_v42 = vld [vmem:[#allocation19 + $0xf4] ss:$8 sps:$4 sm:$0xff]  }
 0xaf8   :  { %5502 = vmatprep.subr.bf16.mxu0 %v9346_v44  ;;  %5584 = vmatprep.subr.bf16.mxu1 %v9349_v45  ;;  %v9425_v44 = vld [vmem:[#allocation19 + $0xf0] ss:$8 sps:$4 sm:$0xff]   ;;  %v9430_v45 = vld [vmem:[#allocation19 + $0x104] ss:$8 sps:$4 sm:$0xff]  }
 0xafb   :  { %5503 = vmatpush1.bf16.msra.mxu0 %v9344_v46  ;;  %5585 = vmatpush1.bf16.msra.mxu1 %v9347_v47  ;;  %v9476_v46 = vld [vmem:[%s10756_s13] ss:$8 sps:$4 sm:$0xff]   ;;  %v9478_v47 = vld [vmem:[%s10756_s13 + $0x4] ss:$8 sps:$4 sm:$0xff]  }
 0xafc   :  { %5504 = vmatprep.subr.bf16.mxu0 %v9352_v49  ;;  %5586 = vmatprep.subr.bf16.mxu1 %v9355_v50  ;;  %v9481_v49 = vld [vmem:[%s10756_s13 + $0x14] ss:$8 sps:$4 sm:$0xff]   ;;  %v9479_v50 = vld [vmem:[%s10756_s13 + $0x10] ss:$8 sps:$4 sm:$0xff]  }
 0xaff   :  { %5505 = vmatpush1.bf16.msra.mxu0 %v9350_v51  ;;  %5587 = vmatpush1.bf16.msra.mxu1 %v9353_v52  ;;  %v9484_v51 = vld [vmem:[%s10756_s13 + $0x24] ss:$8 sps:$4 sm:$0xff]   ;;  %v9482_v52 = vld [vmem:[%s10756_s13 + $0x20] ss:$8 sps:$4 sm:$0xff]  }
 0xb00   :  { %5506 = vmatprep.subr.bf16.mxu0 %v9358_v53  ;;  %5588 = vmatprep.subr.bf16.mxu1 %v9361_v56  ;;  %v9487_v53 = vld [vmem:[%s10756_s13 + $0x34] ss:$8 sps:$4 sm:$0xff]   ;;  %v9485_v56 = vld [vmem:[%s10756_s13 + $0x30] ss:$8 sps:$4 sm:$0xff]  }
 0xb03   :  { %5507 = vmatpush1.bf16.msra.mxu0 %v9356_v57  ;;  %5589 = vmatpush1.bf16.msra.mxu1 %v9359_v58  ;;  %v9490_v57 = vld [vmem:[%s10756_s13 + $0x44] ss:$8 sps:$4 sm:$0xff]   ;;  %v9488_v58 = vld [vmem:[%s10756_s13 + $0x40] ss:$8 sps:$4 sm:$0xff]  }
 0xb04   :  { %5508 = vmatprep.subr.bf16.mxu0 %v9364_v59  ;;  %5590 = vmatprep.subr.bf16.mxu1 %v9367_v63  ;;  %v9493_v59 = vld [vmem:[%s10756_s13 + $0x54] ss:$8 sps:$4 sm:$0xff]   ;;  %v9491_v63 = vld [vmem:[%s10756_s13 + $0x50] ss:$8 sps:$4 sm:$0xff]  }
 0xb07   :  { %5509 = vmatpush1.bf16.msra.mxu0 %v9362_v30  ;;  %5591 = vmatpush1.bf16.msra.mxu1 %v9365_v2  ;;  %v9496_v30 = vld [vmem:[%s10756_s13 + $0x64] ss:$8 sps:$4 sm:$0xff]   ;;  %v9494_v2 = vld [vmem:[%s10756_s13 + $0x60] ss:$8 sps:$4 sm:$0xff]  }
 0xb08   :  { %5510 = vmatprep.subr.bf16.mxu0 %v9370_v4  ;;  %5592 = vmatprep.subr.bf16.mxu1 %v9373_v5  ;;  %v9497_v4 = vld [vmem:[%s10756_s13 + $0x70] ss:$8 sps:$4 sm:$0xff]   ;;  %v9502_v5 = vld [vmem:[%s10756_s13 + $0x84] ss:$8 sps:$4 sm:$0xff]  }
 0xb0b   :  { %5511 = vmatpush1.bf16.msra.mxu0 %v9368_v35  ;;  %5593 = vmatpush1.bf16.msra.mxu1 %v9371_v6  ;;  %v9500_v35 = vld [vmem:[%s10756_s13 + $0x80] ss:$8 sps:$4 sm:$0xff]   ;;  %v9505_v6 = vld [vmem:[%s10756_s13 + $0x94] ss:$8 sps:$4 sm:$0xff]  }
 0xb0c   :  { %5512 = vmatprep.subr.bf16.mxu0 %v9376_v10  ;;  %5594 = vmatprep.subr.bf16.mxu1 %v9379_v11  ;;  %v9508_v10 = vld [vmem:[%s10756_s13 + $0xa4] ss:$8 sps:$4 sm:$0xff]   ;;  %v9506_v11 = vld [vmem:[%s10756_s13 + $0xa0] ss:$8 sps:$4 sm:$0xff]  }
 0xb0f   :  { %5513 = vmatpush1.bf16.msra.mxu0 %v9374_v12  ;;  %5595 = vmatpush1.bf16.msra.mxu1 %v9377_v13  ;;  %v9511_v12 = vld [vmem:[%s10756_s13 + $0xb4] ss:$8 sps:$4 sm:$0xff]   ;;  %v9509_v13 = vld [vmem:[%s10756_s13 + $0xb0] ss:$8 sps:$4 sm:$0xff]  }
 0xb10   :  { %6010 = vmatprep.subr.bf16.mxu0 %v9382_v43  ;;  %6301 = vmatprep.subr.bf16.mxu1 %v9478_v47  ;;  %v9512_v43 = vld [vmem:[%s10756_s13 + $0xc0] ss:$8 sps:$4 sm:$0xff]  }
 0xb11   :  { %v9446_v47 = vld [vmem:[#allocation19 + $0x160] ss:$8 sps:$4 sm:$0xff]  }
 0xb12   :  { %5515 = vmatmul.mubr.bf16.vlgmr.msra.gmra.mrb[28].mxu0 %v4648_v17  ;;  %5597 = vmatmul.mubr.bf16.vlgmr.msra.gmra.mrb[28].mxu1 %v4648_v17  ;;  %v10637_v17 = vld [vmem:[#allocation28 + $0x22] ss:$8 sm:$0xf] }
 0xb13   :  { %6011 = vmatpush1.bf16.msra.mxu0 %v9380_v16  ;;  %6302 = vmatpush1.bf16.msra.mxu1 %v9476_v46  ;;  %v9517_v16 = vld [vmem:[%s10756_s13 + $0xd4] ss:$8 sps:$4 sm:$0xff]   ;;  %v9448_v46 = vld [vmem:[#allocation19 + $0x164] ss:$8 sps:$4 sm:$0xff]  }
 0xb14   :  { %6012 = vmatprep.subr.bf16.mxu0 %v9385_v61  ;;  %6303 = vmatprep.subr.bf16.mxu1 %v9481_v49  ;;  %v9515_v61 = vld [vmem:[%s10756_s13 + $0xd0] ss:$8 sps:$4 sm:$0xff]   ;;  %v9451_v49 = vld [vmem:[#allocation19 + $0x174] ss:$8 sps:$4 sm:$0xff]  }
 0xb17   :  { %6013 = vmatpush1.bf16.msra.mxu0 %v9383_v48  ;;  %6304 = vmatpush1.bf16.msra.mxu1 %v9479_v50  ;;  %v4784_v48 = vrot.slane %v10637_v17, %v10487_v62  ;;  %v9449_v50 = vld [vmem:[#allocation19 + $0x170] ss:$8 sps:$4 sm:$0xff]  }
 0xb18   :  { %6014 = vmatprep.subr.bf16.mxu0 %v9388_v18  ;;  %6305 = vmatprep.subr.bf16.mxu1 %v9484_v51  ;;  %v4788_v18 = vrot.slane %v10637_v17, %v10490_v1  ;;  %v9454_v51 = vld [vmem:[#allocation19 + $0x184] ss:$8 sps:$4 sm:$0xff]  }
 0xb1b   :  { %6015 = vmatpush1.bf16.msra.mxu0 %v9386_v19  ;;  %6306 = vmatpush1.bf16.msra.mxu1 %v9482_v52  ;;  %v4796_v19 = vrot.slane %v10637_v17, %v10501_v55  ;;  %v9433_v55 = vld [vmem:[#allocation19 + $0x114] ss:$8 sps:$4 sm:$0xff]   ;;  %v9452_v52 = vld [vmem:[#allocation19 + $0x180] ss:$8 sps:$4 sm:$0xff]  }
 0xb1c   :  { %6016 = vmatprep.subr.bf16.mxu0 %v9391_v20  ;;  %6307 = vmatprep.subr.bf16.mxu1 %v9487_v53  ;;  %v9457_v53 = vld [vmem:[#allocation19 + $0x194] ss:$8 sps:$4 sm:$0xff]  }
 0xb1f   :  { %6017 = vmatpush1.bf16.msra.mxu0 %v9389_v21  ;;  %6308 = vmatpush1.bf16.msra.mxu1 %v9485_v56  ;;  %v9455_v56 = vld [vmem:[#allocation19 + $0x190] ss:$8 sps:$4 sm:$0xff]  }
 0xb20   :  { %6018 = vmatprep.subr.bf16.mxu0 %v9394_v22  ;;  %6309 = vmatprep.subr.bf16.mxu1 %v9490_v57  ;;  %v9460_v57 = vld [vmem:[#allocation19 + $0x1a4] ss:$8 sps:$4 sm:$0xff]  }
 0xb23   :  { %6019 = vmatpush1.bf16.msra.mxu0 %v9392_v23  ;;  %6310 = vmatpush1.bf16.msra.mxu1 %v9488_v58  ;;  %v9458_v58 = vld [vmem:[#allocation19 + $0x1a0] ss:$8 sps:$4 sm:$0xff]  }
 0xb24   :  { %6020 = vmatprep.subr.bf16.mxu0 %v9397_v54  ;;  %6311 = vmatprep.subr.bf16.mxu1 %v9493_v59  ;;  %v9463_v59 = vld [vmem:[#allocation19 + $0x1b4] ss:$8 sps:$4 sm:$0xff]  }
 0xb27   :  { %6021 = vmatpush1.bf16.msra.mxu0 %v9395_v24  ;;  %6312 = vmatpush1.bf16.msra.mxu1 %v9491_v63  ;;  %v9461_v63 = vld [vmem:[#allocation19 + $0x1b0] ss:$8 sps:$4 sm:$0xff]  }
 0xb28   :  { %6022 = vmatprep.subr.bf16.mxu0 %v9400_v25  ;;  %6313 = vmatprep.subr.bf16.mxu1 %v9496_v30  ;;  %v9466_v30 = vld [vmem:[#allocation19 + $0x1c4] ss:$8 sps:$4 sm:$0xff]  }
 0xb2b   :  { %6023 = vmatpush1.bf16.msra.mxu0 %v9398_v26  ;;  %6314 = vmatpush1.bf16.msra.mxu1 %v9494_v2  ;;  %v9464_v2 = vld [vmem:[#allocation19 + $0x1c0] ss:$8 sps:$4 sm:$0xff]  }
 0xb2c   :  { %6024 = vmatprep.subr.bf16.mxu0 %v9403_v27  ;;  %6315 = vmatprep.subr.bf16.mxu1 %v9499_v3  ;;  %v9469_v3 = vld [vmem:[#allocation19 + $0x1d4] ss:$8 sps:$4 sm:$0xff]  }
 0xb2f   :  { %6025 = vmatpush1.bf16.msra.mxu0 %v9401_v60  ;;  %6316 = vmatpush1.bf16.msra.mxu1 %v9497_v4  ;;  %v9467_v4 = vld [vmem:[#allocation19 + $0x1d0] ss:$8 sps:$4 sm:$0xff]  }
 0xb30   :  { %6026 = vmatprep.subr.bf16.mxu0 %v9406_v28  ;;  %6317 = vmatprep.subr.bf16.mxu1 %v9502_v5  ;;  %v4792_v5 = vrot.slane %v10637_v17, %v10512_v9  ;;  %v9518_v9 = vld [vmem:[%s10756_s13 + $0xe0] ss:$8 sps:$4 sm:$0xff]   ;;  %v9526_v17 = vld [vmem:[#allocation21 + $0x4] ss:$8 sps:$4 sm:$0xff]  }
 0xb33   :  { %6027 = vmatpush1.bf16.msra.mxu0 %v9404_v29  ;;  %6318 = vmatpush1.bf16.msra.mxu1 %v9500_v35  ;;  %v9472_v35 = vld [vmem:[#allocation19 + $0x1e4] ss:$8 sps:$4 sm:$0xff]  }
 0xb34   :  { %6028 = vmatprep.subr.bf16.mxu0 %v9409_v31  ;;  %6319 = vmatprep.subr.bf16.mxu1 %v9505_v6  ;;  %v9470_v6 = vld [vmem:[#allocation19 + $0x1e0] ss:$8 sps:$4 sm:$0xff]  }
 0xb37   :  { %6029 = vmatpush1.bf16.msra.mxu0 %v9407_v32  ;;  %6320 = vmatpush1.bf16.msra.mxu1 %v9503_v7 }
 0xb38   :  { %6030 = vmatprep.subr.bf16.mxu0 %v9412_v33  ;;  %6321 = vmatprep.subr.bf16.mxu1 %v9508_v10  ;;  %v9475_v10 = vld [vmem:[#allocation19 + $0x1f4] ss:$8 sps:$4 sm:$0xff]  }
 0xb3b   :  { %6031 = vmatpush1.bf16.msra.mxu0 %v9410_v34  ;;  %6322 = vmatpush1.bf16.msra.mxu1 %v9506_v11  ;;  %v9428_v34 = vld [vmem:[#allocation19 + $0x100] ss:$8 sps:$4 sm:$0xff]   ;;  %v9473_v11 = vld [vmem:[#allocation19 + $0x1f0] ss:$8 sps:$4 sm:$0xff]  }
 0xb3c   :  { %6032 = vmatprep.subr.bf16.mxu0 %v9415_v36  ;;  %6323 = vmatprep.subr.bf16.mxu1 %v9511_v12 }
 0xb3f   :  { %6033 = vmatpush1.bf16.msra.mxu0 %v9413_v8  ;;  %6324 = vmatpush1.bf16.msra.mxu1 %v9509_v13 }
 0xb40   :  { %6034 = vmatprep.subr.bf16.mxu0 %v9418_v37  ;;  %6325 = vmatprep.subr.bf16.mxu1 %v9514_v15  ;;  %v9431_v37 = vld [vmem:[#allocation19 + $0x110] ss:$8 sps:$4 sm:$0xff]   ;;  %v9520_v15 = vld [vmem:[%s10756_s13 + $0xe4] ss:$8 sps:$4 sm:$0xff]  }
 0xb43   :  { %6035 = vmatpush1.bf16.msra.mxu0 %v9416_v38  ;;  %6326 = vmatpush1.bf16.msra.mxu1 %v9512_v43  ;;  %v9436_v38 = vld [vmem:[#allocation19 + $0x124] ss:$8 sps:$4 sm:$0xff]   ;;  %v9523_v43 = vld [vmem:[%s10756_s13 + $0xf4] ss:$8 sps:$4 sm:$0xff]  }
 0xb44   :  { %6036 = vmatprep.subr.bf16.mxu0 %v9421_v39  ;;  %6327 = vmatprep.subr.bf16.mxu1 %v9517_v16  ;;  %v9434_v39 = vld [vmem:[#allocation19 + $0x120] ss:$8 sps:$4 sm:$0xff]   ;;  %v9521_v16 = vld [vmem:[%s10756_s13 + $0xf0] ss:$8 sps:$4 sm:$0xff]  }
 0xb47   :  { %6037 = vmatpush1.bf16.msra.mxu0 %v9419_v40  ;;  %6328 = vmatpush1.bf16.msra.mxu1 %v9515_v61  ;;  %v9439_v40 = vld [vmem:[#allocation19 + $0x134] ss:$8 sps:$4 sm:$0xff]   ;;  %v5678_v61 = vld [vmem:[#allocation28 + $0x23] ss:$8 sm:$0x3] }
 0xb48   :  { %6038 = vmatprep.subr.bf16.mxu0 %v9424_v14  ;;  %v9437_v14 = vld [vmem:[#allocation19 + $0x130] ss:$8 sps:$4 sm:$0xff]   ;;  %6329 = vmatprep.subr.bf16.mxu1 %v9520_v15  ;;  %v6129_v15 = vld [vmem:[#allocation28 + $0x24] ss:$8 sm:$0x3] }
 0xb4b   :  { %6039 = vmatpush1.bf16.msra.mxu0 %v9422_v41  ;;  %v9442_v41 = vld [vmem:[#allocation19 + $0x144] ss:$8 sps:$4 sm:$0xff]   ;;  %6330 = vmatpush1.bf16.msra.mxu1 %v9518_v9  ;;  %v6134_v9 = vrot.slane %v6129_v15, %v10487_v62 }
 0xb4c   :  { %6040 = vmatprep.subr.bf16.mxu0 %v9427_v42  ;;  %v9440_v42 = vld [vmem:[#allocation19 + $0x140] ss:$8 sps:$4 sm:$0xff]   ;;  %6331 = vmatprep.subr.bf16.mxu1 %v9523_v43  ;;  %v6138_v43 = vrot.slane %v6129_v15, %v10490_v1 }
 0xb4f   :  { %6041 = vmatpush1.bf16.msra.mxu0 %v9425_v44  ;;  %v9445_v44 = vld [vmem:[#allocation19 + $0x154] ss:$8 sps:$4 sm:$0xff]   ;;  %6332 = vmatpush1.bf16.msra.mxu1 %v9521_v16 }
 0xb50   :  { %6051 = vmatprep.subr.bf16.mxu0 %v9430_v45  ;;  %v9443_v45 = vld [vmem:[#allocation19 + $0x150] ss:$8 sps:$4 sm:$0xff]   ;;  %6551 = vmatprep.subr.bf16.mxu1 %v9526_v17 }
 0xbe5   :  { %v5516_v20 = vpop.f32.mrb[28].mxu0  ;;  %v10648_v21 = vpop.f32.mrb[28].mxu1 }
 0xbe6   :  { %v8304_v22 = vadd.f32 %v5516_v20, %v4784_v48  ;;  %v5518_v23 = vpop.f32.mrb[29].mxu0  ;;  %v5600_v54 = vpop.f32.mrb[29].mxu1  ;;  %v8306_v7 = vadd.f32 %v10648_v21, %v4792_v5  ;;  %v5683_v48 = vrot.slane %v5678_v61, %v10487_v62  ;;  %v9576_v5 = vld [vmem:[#allocation22 + $0x50] sm:$0xff]  }
 0xbe7   :  { %v8305_v24 = vadd.f32 %v5518_v23, %v4788_v18  ;;  %v8307_v25 = vadd.f32 %v5600_v54, %v4796_v19  ;;  %v5520_v26 = vpop.f32.mrb[30].mxu0  ;;  %v5602_v27 = vpop.f32.mrb[30].mxu1  ;;  %v5687_v18 = vrot.slane %v5678_v61, %v10490_v1 }
 0xbe8   :  { %v5605_v60 = vmax.f32 %v8304_v22, 0.0  ;;  %v5521_v28 = vpop.f32.mrb[31].mxu0  ;;  %v5603_v29 = vpop.f32.mrb[31].mxu1  ;;  %v5607_v12 = vmax.f32 %v8306_v7, 0.0  ;;  %v9524_v27 = vld [vmem:[#allocation21] ss:$8 sps:$4 sm:$0xff]  }
 0xbe9   :  { %v5606_v31 = vmax.f32 %v8305_v24, 0.0  ;;  %v5608_v32 = vmax.f32 %v8307_v25, 0.0  ;;  %v9529_v28 = vld [vmem:[#allocation21 + $0x14] ss:$8 sps:$4 sm:$0xff]   ;;  %v9527_v29 = vld [vmem:[#allocation21 + $0x10] ss:$8 sps:$4 sm:$0xff]  }
 0xbea   :  { %v5609_v36 = vpack.c.bf16 %v5605_v60, %v5605_v60  ;;  %v5611_v13 = vpack.c.bf16 %v5607_v12, %v5607_v12  ;;  %v9579_v7 = vld [vmem:[#allocation22 + $0x18] sm:$0xff]   ;;  %v9582_v12 = vld [vmem:[#allocation22 + $0x68] sm:$0xff]  }
 0xbeb   :  { %v5610_v33 = vpack.c.bf16 %v5606_v31, %v5606_v31  ;;  %v5612_v8 = vpack.c.bf16 %v5608_v32, %v5608_v32  ;;  %v9532_v31 = vld [vmem:[#allocation21 + $0x24] ss:$8 sps:$4 sm:$0xff]   ;;  %v9530_v32 = vld [vmem:[#allocation21 + $0x20] ss:$8 sps:$4 sm:$0xff]  }
 0xbed   :  { %6042 = vmatprep.mubr.bf16.mxu0 %v5610_v33  ;;  %v9535_v33 = vld [vmem:[#allocation21 + $0x34] ss:$8 sps:$4 sm:$0xff]  }
 0xbee   :  { %6043 = vmatmul.mubr.bf16.vlgmr.msra.gmra.mrb[32].mxu0 %v5609_v36  ;;  %v9538_v36 = vld [vmem:[#allocation21 + $0x44] ss:$8 sps:$4 sm:$0xff]  }
 0xbef   :  { %6052 = vmatpush1.bf16.msra.mxu0 %v9428_v34  ;;  %6083 = vmatprep.mubr.bf16.mxu0 %v5612_v8  ;;  %v9533_v34 = vld [vmem:[#allocation21 + $0x30] ss:$8 sps:$4 sm:$0xff]   ;;  %v9541_v8 = vld [vmem:[#allocation21 + $0x54] ss:$8 sps:$4 sm:$0xff]  }
 0xbf0   :  { %6053 = vmatprep.subr.bf16.mxu0 %v9433_v55  ;;  %v9536_v55 = vld [vmem:[#allocation21 + $0x40] ss:$8 sps:$4 sm:$0xff]  }
 0xbf3   :  { %6054 = vmatpush1.bf16.msra.mxu0 %v9431_v37  ;;  %v9539_v37 = vld [vmem:[#allocation21 + $0x50] ss:$8 sps:$4 sm:$0xff]  }
 0xbf4   :  { %6055 = vmatprep.subr.bf16.mxu0 %v9436_v38  ;;  %v9544_v38 = vld [vmem:[#allocation21 + $0x64] ss:$8 sps:$4 sm:$0xff]  }
 0xbf7   :  { %6056 = vmatpush1.bf16.msra.mxu0 %v9434_v39  ;;  %v9542_v39 = vld [vmem:[#allocation21 + $0x60] ss:$8 sps:$4 sm:$0xff]  }
 0xbf8   :  { %6057 = vmatprep.subr.bf16.mxu0 %v9439_v40  ;;  %v9547_v40 = vld [vmem:[#allocation21 + $0x74] ss:$8 sps:$4 sm:$0xff]  }
 0xbfb   :  { %6058 = vmatpush1.bf16.msra.mxu0 %v9437_v14  ;;  %v9545_v14 = vld [vmem:[#allocation21 + $0x70] ss:$8 sps:$4 sm:$0xff]  }
 0xbfc   :  { %6059 = vmatprep.subr.bf16.mxu0 %v9442_v41  ;;  %v9550_v41 = vld [vmem:[#allocation21 + $0x84] ss:$8 sps:$4 sm:$0xff]  }
 0xbff   :  { %6060 = vmatpush1.bf16.msra.mxu0 %v9440_v42  ;;  %v9548_v42 = vld [vmem:[#allocation21 + $0x80] ss:$8 sps:$4 sm:$0xff]  }
 0xc00   :  { %6061 = vmatprep.subr.bf16.mxu0 %v9445_v44  ;;  %v9553_v44 = vld [vmem:[#allocation21 + $0x94] ss:$8 sps:$4 sm:$0xff]  }
 0xc03   :  { %6062 = vmatpush1.bf16.msra.mxu0 %v9443_v45  ;;  %v9551_v45 = vld [vmem:[#allocation21 + $0x90] ss:$8 sps:$4 sm:$0xff]  }
 0xc04   :  { %6063 = vmatprep.subr.bf16.mxu0 %v9448_v46  ;;  %v9556_v46 = vld [vmem:[#allocation21 + $0xa4] ss:$8 sps:$4 sm:$0xff]  }
 0xc07   :  { %6064 = vmatpush1.bf16.msra.mxu0 %v9446_v47  ;;  %v9554_v47 = vld [vmem:[#allocation21 + $0xa0] ss:$8 sps:$4 sm:$0xff]  }
 0xc08   :  { %6065 = vmatprep.subr.bf16.mxu0 %v9451_v49  ;;  %v9559_v49 = vld [vmem:[#allocation21 + $0xb4] ss:$8 sps:$4 sm:$0xff]  }
 0xc0b   :  { %6066 = vmatpush1.bf16.msra.mxu0 %v9449_v50  ;;  %v9557_v50 = vld [vmem:[#allocation21 + $0xb0] ss:$8 sps:$4 sm:$0xff]  }
 0xc0c   :  { %6067 = vmatprep.subr.bf16.mxu0 %v9454_v51  ;;  %v9562_v51 = vld [vmem:[#allocation21 + $0xc4] ss:$8 sps:$4 sm:$0xff]  }
 0xc0f   :  { %6068 = vmatpush1.bf16.msra.mxu0 %v9452_v52  ;;  %v9560_v52 = vld [vmem:[#allocation21 + $0xc0] ss:$8 sps:$4 sm:$0xff]  }
 0xc10   :  { %6069 = vmatprep.subr.bf16.mxu0 %v9457_v53  ;;  %v9565_v53 = vld [vmem:[#allocation21 + $0xd4] ss:$8 sps:$4 sm:$0xff]  }
 0xc13   :  { %6070 = vmatpush1.bf16.msra.mxu0 %v9455_v56  ;;  %v9563_v56 = vld [vmem:[#allocation21 + $0xd0] ss:$8 sps:$4 sm:$0xff]  }
 0xc14   :  { %6071 = vmatprep.subr.bf16.mxu0 %v9460_v57  ;;  %v9568_v57 = vld [vmem:[#allocation21 + $0xe4] ss:$8 sps:$4 sm:$0xff]  }
 0xc17   :  { %6072 = vmatpush1.bf16.msra.mxu0 %v9458_v58  ;;  %v9566_v58 = vld [vmem:[#allocation21 + $0xe0] ss:$8 sps:$4 sm:$0xff]  }
 0xc18   :  { %6073 = vmatprep.subr.bf16.mxu0 %v9463_v59  ;;  %v9571_v59 = vld [vmem:[#allocation21 + $0xf4] ss:$8 sps:$4 sm:$0xff]  }
 0xc1b   :  { %6074 = vmatpush1.bf16.msra.mxu0 %v9461_v63  ;;  %v9569_v63 = vld [vmem:[#allocation21 + $0xf0] ss:$8 sps:$4 sm:$0xff]  }
 0xc1c   :  { %6075 = vmatprep.subr.bf16.mxu0 %v9466_v30  ;;  %v9572_v30 = vld [vmem:[#allocation22 + $0x40] sm:$0xff]  }
 0xc1f   :  { %6076 = vmatpush1.bf16.msra.mxu0 %v9464_v2  ;;  %v9573_v2 = vld [vmem:[#allocation22] sm:$0xff]  }
 0xc20   :  { %6077 = vmatprep.subr.bf16.mxu0 %v9469_v3  ;;  %v9574_v3 = vld [vmem:[#allocation22 + $0x48] sm:$0xff]  }
 0xc23   :  { %6078 = vmatpush1.bf16.msra.mxu0 %v9467_v4  ;;  %v9575_v4 = vld [vmem:[#allocation22 + $0x8] sm:$0xff]  }
 0xc24   :  { %6079 = vmatprep.subr.bf16.mxu0 %v9472_v35  ;;  %v9577_v35 = vld [vmem:[#allocation22 + $0x10] sm:$0xff]  }
 0xc27   :  { %6080 = vmatpush1.bf16.msra.mxu0 %v9470_v6  ;;  %v9578_v6 = vld [vmem:[#allocation22 + $0x58] sm:$0xff]  }
 0xc28   :  { %6081 = vmatprep.subr.bf16.mxu0 %v9475_v10  ;;  %v9580_v10 = vld [vmem:[#allocation22 + $0x60] sm:$0xff]  }
 0xc2b   :  { %6082 = vmatpush1.bf16.msra.mxu0 %v9473_v11  ;;  %v9581_v11 = vld [vmem:[#allocation22 + $0x20] sm:$0xff]  }
 0xc2c   :  { %8102 = vmatprep.subr.bf16.mxu0 %v9572_v30 }
 0xc2e   :  { %6084 = vmatmul.mubr.bf16.vlgmr.msra.gmra.mrb[32].mxu0 %v5611_v13  ;;  %v9583_v13 = vld [vmem:[#allocation22 + $0x28] sm:$0xff]  }
 0xc2f   :  { %8103 = vmatpush3.bf16.msra.mxu0 %v9573_v2 }
 0xc30   :  { %8104 = vmatprep.subr.bf16.mxu0 %v9574_v3 }
 0xc33   :  { %8105 = vmatpush3.bf16.msra.mxu0 %v9575_v4  ;;  %v9602_v4 = vld [vmem:[#allocation25 + $0x30] sm:$0xff]  }
 0xc34   :  { %8106 = vmatprep.subr.bf16.mxu0 %v9576_v5  ;;  %v9603_v5 = vld [vmem:[#allocation25 + $0x38] sm:$0xff]  }
 0xc37   :  { %8107 = vmatpush3.bf16.msra.mxu0 %v9577_v35  ;;  %v9604_v35 = vld [vmem:[#allocation27] sm:$0xff]  }
 0xc38   :  { %8108 = vmatprep.subr.bf16.mxu0 %v9578_v6  ;;  %v9605_v6 = vld [vmem:[#allocation27 + $0x8] sm:$0xff]  }
 0xc3b   :  { %8109 = vmatpush3.bf16.msra.mxu0 %v9579_v7  ;;  %v9606_v7 = vld [vmem:[#allocation27 + $0x10] sm:$0xff]  }
 0xc3c   :  { %8110 = vmatprep.subr.bf16.mxu0 %v9580_v10  ;;  %v9607_v10 = vld [vmem:[#allocation27 + $0x18] sm:$0xff]  }
 0xc3f   :  { %8111 = vmatpush3.bf16.msra.mxu0 %v9581_v11  ;;  %v9608_v11 = vld [vmem:[#allocation27 + $0x20] sm:$0xff]  }
 0xc40   :  { %8112 = vmatprep.subr.bf16.mxu0 %v9582_v12  ;;  %v9609_v12 = vld [vmem:[#allocation27 + $0x28] sm:$0xff]  }
 0xc43   :  { %8113 = vmatpush3.bf16.msra.mxu0 %v9583_v13  ;;  %v6783_v13 = vld [vmem:[#allocation28 + $0x27] ss:$0 sm:$0xff] }
 0xd01   :  { %v6085_v19 = vpop.f32.mrb[32].mxu0 }
 0xd02   :  { %v8308_v20 = vadd.f32 %v6085_v19, %v5683_v48  ;;  %v6087_v21 = vpop.f32.mrb[33].mxu0 }
 0xd03   :  { %v8309_v22 = vadd.f32 %v6087_v21, %v5687_v18  ;;  %v6089_v23 = vpop.f32.mrb[34].mxu0 }
 0xd04   :  { %v6092_v54 = vmax.f32 %v8308_v20, 0.0  ;;  %v6090_v24 = vpop.f32.mrb[35].mxu0 }
 0xd05   :  { %v6093_v25 = vmax.f32 %v8309_v22, 0.0  ;;  %v9585_v24 = vld [vmem:[#allocation22 + $0x30] sm:$0xff]  }
 0xd06   :  { %v6094_v60 = vpack.c.bf16 %v6092_v54, %v6092_v54  ;;  %v9584_v54 = vld [vmem:[#allocation22 + $0x70] sm:$0xff]  }
 0xd07   :  { %v6095_v26 = vpack.c.bf16 %v6093_v25, %v6093_v25  ;;  %8114 = vmatprep.subr.bf16.mxu0 %v9584_v54  ;;  %v9586_v25 = vld [vmem:[#allocation22 + $0x78] sm:$0xff]   ;;  %v9616_v54 = vld [vmem:[%s10762_s19 + $0x20] sm:$0xff]  }
 0xd08   :  { %8115 = vmatpush3.bf16.msra.mxu0 %v9585_v24  ;;  %v9617_v24 = vld [vmem:[%s10762_s19 + $0x28] sm:$0xff]  }
 0xd09   :  { %6333 = vmatprep.mubr.bf16.mxu1 %v6095_v26  ;;  %v9587_v26 = vld [vmem:[#allocation22 + $0x38] sm:$0xff]   ;;  %8116 = vmatprep.subr.bf16.mxu0 %v9586_v25  ;;  %v6890_v25 = vld [vmem:[#allocation28 + $0x40] ss:$0 sm:$0xff] }
 0xd0a   :  { %6334 = vmatmul.mubr.bf16.vlgmr.msra.gmra.mrb[32].mxu1 %v6094_v60  ;;  %v9589_v60 = vld [vmem:[#allocation24 + $0x8] sm:$0xff]  }
 0xd0b   :  { %6552 = vmatpush1.bf16.msra.mxu1 %v9524_v27  ;;  %v9588_v27 = vld [vmem:[#allocation24] sm:$0xff]  }
 0xd0c   :  { %6553 = vmatprep.subr.bf16.mxu1 %v9529_v28  ;;  %8117 = vmatpush3.bf16.msra.mxu0 %v9587_v26  ;;  %v9590_v28 = vld [vmem:[#allocation24 + $0x10] sm:$0xff]  }
 0xd0d   :  { %8232 = vmatprep.subr.bf16.mxu0 %v10062_v0 }
 0xd0f   :  { %6554 = vmatpush1.bf16.msra.mxu1 %v9527_v29  ;;  %v9591_v29 = vld [vmem:[#allocation24 + $0x18] sm:$0xff]  }
 0xd10   :  { %6555 = vmatprep.subr.bf16.mxu1 %v9532_v31  ;;  %v9592_v31 = vld [vmem:[#allocation24 + $0x20] sm:$0xff]  }
 0xd13   :  { %6556 = vmatpush1.bf16.msra.mxu1 %v9530_v32  ;;  %v9593_v32 = vld [vmem:[#allocation24 + $0x28] sm:$0xff]  }
 0xd14   :  { %6557 = vmatprep.subr.bf16.mxu1 %v9535_v33  ;;  %v6379_v33 = vld [vmem:[#allocation28 + $0x25] ss:$8 sm:$0x3] }
 0xd17   :  { %6558 = vmatpush1.bf16.msra.mxu1 %v9533_v34  ;;  %v6384_v34 = vrot.slane %v6379_v33, %v10487_v62 }
 0xd18   :  { %6559 = vmatprep.subr.bf16.mxu1 %v9538_v36  ;;  %v6388_v36 = vrot.slane %v6379_v33, %v10490_v1  ;;  %v9595_v1 = vld [vmem:[#allocation24 + $0x38] sm:$0xff]   ;;  %v9618_v33 = vld [vmem:[%s10762_s19 + $0x30] sm:$0xff]  }
 0xd1b   :  { %6560 = vmatpush1.bf16.msra.mxu1 %v9536_v55 }
 0xd1c   :  { %6561 = vmatprep.subr.bf16.mxu1 %v9541_v8 }
 0xd1f   :  { %6562 = vmatpush1.bf16.msra.mxu1 %v9539_v37 }
 0xd20   :  { %6563 = vmatprep.subr.bf16.mxu1 %v9544_v38 }
 0xd23   :  { %6564 = vmatpush1.bf16.msra.mxu1 %v9542_v39 }
 0xd24   :  { %6565 = vmatprep.subr.bf16.mxu1 %v9547_v40 }
 0xd27   :  { %6566 = vmatpush1.bf16.msra.mxu1 %v9545_v14 }
 0xd28   :  { %6567 = vmatprep.subr.bf16.mxu1 %v9550_v41 }
 0xd2b   :  { %6568 = vmatpush1.bf16.msra.mxu1 %v9548_v42 }
 0xd2c   :  { %6569 = vmatprep.subr.bf16.mxu1 %v9553_v44 }
 0xd2f   :  { %6570 = vmatpush1.bf16.msra.mxu1 %v9551_v45  ;;  %v9594_v45 = vld [vmem:[#allocation24 + $0x30] sm:$0xff]  }
 0xd30   :  { %6571 = vmatprep.subr.bf16.mxu1 %v9556_v46  ;;  %v9596_v46 = vld [vmem:[#allocation25] sm:$0xff]  }
 0xd33   :  { %6572 = vmatpush1.bf16.msra.mxu1 %v9554_v47  ;;  %v9597_v47 = vld [vmem:[#allocation25 + $0x8] sm:$0xff]  }
 0xd34   :  { %6573 = vmatprep.subr.bf16.mxu1 %v9559_v49  ;;  %v9598_v49 = vld [vmem:[#allocation25 + $0x10] sm:$0xff]  }
 0xd37   :  { %6574 = vmatpush1.bf16.msra.mxu1 %v9557_v50  ;;  %v9599_v50 = vld [vmem:[#allocation25 + $0x18] sm:$0xff]  }
 0xd38   :  { %6575 = vmatprep.subr.bf16.mxu1 %v9562_v51  ;;  %v9600_v51 = vld [vmem:[#allocation25 + $0x20] sm:$0xff]  }
 0xd3b   :  { %6576 = vmatpush1.bf16.msra.mxu1 %v9560_v52  ;;  %v9601_v52 = vld [vmem:[#allocation25 + $0x28] sm:$0xff]  }
 0xd3c   :  { %6577 = vmatprep.subr.bf16.mxu1 %v9565_v53 }
 0xd3f   :  { %6578 = vmatpush1.bf16.msra.mxu1 %v9563_v56  ;;  %v6628_v56 = vld [vmem:[#allocation28 + $0x26] ss:$0 sm:$0xff] }
 0xd40   :  { %6579 = vmatprep.subr.bf16.mxu1 %v9568_v57 }
 0xd43   :  { %6580 = vmatpush1.bf16.msra.mxu1 %v9566_v58 }
 0xd44   :  { %6581 = vmatprep.subr.bf16.mxu1 %v9571_v59 }
 0xd47   :  { %6582 = vmatpush1.bf16.msra.mxu1 %v9569_v63 }
 0xd48   :  { %8212 = vmatprep.subr.bf16.mxu1 %v10062_v0 }
 0xddd   :  { %v6335_v16 = vpop.f32.mrb[32].mxu1 }
 0xdde   :  { %v6336_v17 = vadd.f32 %v6335_v16, %v6134_v9  ;;  %v6337_v61 = vpop.f32.mrb[33].mxu1 }
 0xddf   :  { %v6338_v48 = vadd.f32 %v6337_v61, %v6138_v43  ;;  %v6339_v18 = vpop.f32.mrb[34].mxu1 }
 0xde0   :  { %v6342_v19 = vmax.f32 %v6336_v17, 0.0  ;;  %v6340_v20 = vpop.f32.mrb[35].mxu1  ;;  %v9610_v18 = vld [vmem:[#allocation27 + $0x30] sm:$0xff]  }
 0xde1   :  { %v6343_v21 = vmax.f32 %v6338_v48, 0.0  ;;  %v9612_v20 = vld [vmem:[%s10762_s19] sm:$0xff]  }
 0xde2   :  { %v6344_v23 = vpack.c.bf16 %v6342_v19, %v6342_v19  ;;  %v9611_v19 = vld [vmem:[#allocation27 + $0x38] sm:$0xff]  }
 0xde3   :  { %v6345_v22 = vpack.c.bf16 %v6343_v21, %v6343_v21  ;;  %v9613_v21 = vld [vmem:[%s10762_s19 + $0x8] sm:$0xff]  }
 0xde5   :  { %6583 = vmatprep.mubr.bf16.mxu1 %v6345_v22  ;;  %v9614_v22 = vld [vmem:[%s10762_s19 + $0x10] sm:$0xff]  }
 0xde6   :  { %6584 = vmatmul.mubr.bf16.vlgmr.msra.gmra.mrb[36].mxu1 %v6344_v23  ;;  %v9615_v23 = vld [vmem:[%s10762_s19 + $0x18] sm:$0xff]  }
 0xde7   :  { %8228 = vmatprep.mubr.msk.bf16.mxu1 %vm10063_vm0, %v10062_v0  ;;  %8213 = vmatpush3.bf16.msra.mxu1 %v9588_v27 }
 0xde8   :  { %8214 = vmatprep.subr.bf16.mxu1 %v10062_v0 }
 0xdeb   :  { %8215 = vmatpush3.bf16.msra.mxu1 %v9589_v60 }
 0xdec   :  { %8216 = vmatprep.subr.bf16.mxu1 %v10062_v0 }
 0xdef   :  { %8217 = vmatpush3.bf16.msra.mxu1 %v9590_v28 }
 0xdf0   :  { %8218 = vmatprep.subr.bf16.mxu1 %v10062_v0 }
 0xdf3   :  { %8219 = vmatpush3.bf16.msra.mxu1 %v9591_v29 }
 0xdf4   :  { %8220 = vmatprep.subr.bf16.mxu1 %v10062_v0 }
 0xdf7   :  { %8221 = vmatpush3.bf16.msra.mxu1 %v9592_v31 }
 0xdf8   :  { %8222 = vmatprep.subr.bf16.mxu1 %v10062_v0 }
 0xdfb   :  { %8223 = vmatpush3.bf16.msra.mxu1 %v9593_v32 }
 0xdfc   :  { %8224 = vmatprep.subr.bf16.mxu1 %v10062_v0 }
 0xdff   :  { %8225 = vmatpush3.bf16.msra.mxu1 %v9594_v45 }
 0xe00   :  { %8226 = vmatprep.subr.bf16.mxu1 %v10062_v0 }
 0xe03   :  { %8227 = vmatpush3.bf16.msra.mxu1 %v9595_v1 }
 0xe04   :  { %8252 = vmatprep.subr.bf16.mxu1 %v10062_v0 }
 0xeb9   :  { %v6585_v55 = vpop.f32.mrb[36].mxu1 }
 0xeba   :  { %v6586_v8 = vadd.f32 %v6585_v55, %v6384_v34  ;;  %v6587_v37 = vpop.f32.mrb[37].mxu1  ;;  %v9619_v34 = vld [vmem:[%s10762_s19 + $0x38] sm:$0xff]  }
 0xebb   :  { %v6588_v38 = vadd.f32 %v6587_v37, %v6388_v36  ;;  %v6589_v39 = vpop.f32.mrb[38].mxu1  ;;  %v6997_v36 = vld [vmem:[#allocation28 + $0x41] ss:$0 sm:$0xff] }
 0xebc   :  { %v6592_v40 = vmax.f32 %v6586_v8, 0.0  ;;  %v6590_v14 = vpop.f32.mrb[39].mxu1 }
 0xebd   :  { %v6593_v41 = vmax.f32 %v6588_v38, 0.0 }
 0xebe   :  { %v6594_v44 = vpack.c.bf16 %v6592_v40, %v6592_v40 }
 0xebf   :  { %v6595_v42 = vpack.c.bf16 %v6593_v41, %v6593_v41  ;;  %v7194_v41 = vld [vmem:[%s10794_s12] sm:$0x1] }
 0xec1   :  { %6757 = vmatprep.mubr.bf16.mxu0 %v6595_v42  ;;  %v7195_v42 = vunpack.c.l.bf16 %v7194_v41 }
 0xec2   :  { %6758 = vmatmul.mubr.bf16.vlgmr.msra.gmra.mrb[36].mxu0 %v6594_v44 }
 0xec3   :  { %8248 = vmatprep.mubr.msk.bf16.mxu0 %vm10063_vm0, %v10062_v0  ;;  %8233 = vmatpush3.bf16.msra.mxu0 %v9596_v46  ;;  %v7199_v46 = vrot.slane %v7195_v42, %v10487_v62 }
 0xec4   :  { %8234 = vmatprep.subr.bf16.mxu0 %v10062_v0 }
 0xec7   :  { %8235 = vmatpush3.bf16.msra.mxu0 %v9597_v47 }
 0xec8   :  { %8236 = vmatprep.subr.bf16.mxu0 %v10062_v0 }
 0xecb   :  { %8237 = vmatpush3.bf16.msra.mxu0 %v9598_v49 }
 0xecc   :  { %8238 = vmatprep.subr.bf16.mxu0 %v10062_v0 }
 0xecf   :  { %8239 = vmatpush3.bf16.msra.mxu0 %v9599_v50 }
 0xed0   :  { %8240 = vmatprep.subr.bf16.mxu0 %v10062_v0 }
 0xed3   :  { %8241 = vmatpush3.bf16.msra.mxu0 %v9600_v51 }
 0xed4   :  { %8242 = vmatprep.subr.bf16.mxu0 %v10062_v0 }
 0xed7   :  { %8243 = vmatpush3.bf16.msra.mxu0 %v9601_v52 }
 0xed8   :  { %8244 = vmatprep.subr.bf16.mxu0 %v10062_v0 }
 0xedb   :  { %8245 = vmatpush3.bf16.msra.mxu0 %v9602_v4 }
 0xedc   :  { %8246 = vmatprep.subr.bf16.mxu0 %v10062_v0 }
 0xedf   :  { %8247 = vmatpush3.bf16.msra.mxu0 %v9603_v5 }
 0xee0   :  { %8272 = vmatprep.subr.bf16.mxu0 %v10062_v0 }
 0xf95   :  { %v8118_v53 = vpop.f32.mrb[36].mxu0 }
 0xf96   :  { %v8119_v57 = vpop.f32.mrb[37].mxu0 }
 0xf97   :  { %v8120_v58 = vadd.f32 %v8119_v57, %v8118_v53  ;;  %v8121_v59 = vpop.f32.mrb[38].mxu0  ;;  %v7204_v53 = vld [vmem:[#allocation28 + $0x43] ss:$0 sm:$0xff] }
 0xf98   :  { %v8122_v63 = vpop.f32.mrb[39].mxu0 }
 0xf99   :  { %v6760_v30 = vadd.f32 %v8120_v58, %v6628_v56 }
 0xf9b   :  { %v6765_v2 = vmax.f32 %v6760_v30, 0.0 }
 0xf9d   :  { %v6766_v3 = vpack.c.bf16 %v6765_v2, %v6765_v2 }
 0xf9f   :  { %8229 = vmatmul.mubr.bf16.vlgmr.msra.gmra.mrb[40].mxu1 %v6766_v3 }
 0xfa0   :  { %8268 = vmatprep.mubr.msk.bf16.mxu1 %vm10063_vm0, %v10062_v0  ;;  %8253 = vmatpush3.bf16.msra.mxu1 %v9604_v35 }
 0xfa1   :  { %8254 = vmatprep.subr.bf16.mxu1 %v10062_v0 }
 0xfa4   :  { %8255 = vmatpush3.bf16.msra.mxu1 %v9605_v6 }
 0xfa5   :  { %8256 = vmatprep.subr.bf16.mxu1 %v10062_v0 }
 0xfa8   :  { %8257 = vmatpush3.bf16.msra.mxu1 %v9606_v7 }
 0xfa9   :  { %8258 = vmatprep.subr.bf16.mxu1 %v10062_v0 }
 0xfac   :  { %8259 = vmatpush3.bf16.msra.mxu1 %v9607_v10 }
 0xfad   :  { %8260 = vmatprep.subr.bf16.mxu1 %v10062_v0 }
 0xfb0   :  { %8261 = vmatpush3.bf16.msra.mxu1 %v9608_v11 }
 0xfb1   :  { %8262 = vmatprep.subr.bf16.mxu1 %v10062_v0 }
 0xfb4   :  { %8263 = vmatpush3.bf16.msra.mxu1 %v9609_v12 }
 0xfb5   :  { %8264 = vmatprep.subr.bf16.mxu1 %v10062_v0 }
 0xfb8   :  { %8265 = vmatpush3.bf16.msra.mxu1 %v9610_v18 }
 0xfb9   :  { %8266 = vmatprep.subr.bf16.mxu1 %v10062_v0 }
 0xfbc   :  { %8267 = vmatpush3.bf16.msra.mxu1 %v9611_v19 }
0x1072   :  { %v6866_v15 = vpop.f32.mrb[40].mxu1 }
0x1073   :  { %v6867_v9 = vadd.f32 %v6866_v15, %v6783_v13  ;;  %v8230_v43 = vpop.f32.mrb[41].mxu1 }
0x1074   :  { %v6869_v16 = vpop.f32.mrb[42].mxu1 }
0x1075   :  { %v6872_v17 = vmax.f32 %v6867_v9, 0.0  ;;  %v8231_v61 = vpop.f32.mrb[43].mxu1 }
0x1077   :  { %v6873_v48 = vpack.c.bf16 %v6872_v17, %v6872_v17 }
0x1079   :  { %8249 = vmatmul.mubr.bf16.vlgmr.msra.gmra.mrb[40].mxu0 %v6873_v48 }
0x107a   :  { %8288 = vmatprep.mubr.msk.bf16.mxu0 %vm10063_vm0, %v10062_v0  ;;  %8273 = vmatpush3.bf16.msra.mxu0 %v9612_v20 }
0x107b   :  { %8274 = vmatprep.subr.bf16.mxu0 %v10062_v0 }
0x107e   :  { %8275 = vmatpush3.bf16.msra.mxu0 %v9613_v21 }
0x107f   :  { %8276 = vmatprep.subr.bf16.mxu0 %v10062_v0 }
0x1082   :  { %8277 = vmatpush3.bf16.msra.mxu0 %v9614_v22 }
0x1083   :  { %8278 = vmatprep.subr.bf16.mxu0 %v10062_v0 }
0x1086   :  { %8279 = vmatpush3.bf16.msra.mxu0 %v9615_v23 }
0x1087   :  { %8280 = vmatprep.subr.bf16.mxu0 %v10062_v0 }
0x108a   :  { %8281 = vmatpush3.bf16.msra.mxu0 %v9616_v54 }
0x108b   :  { %8282 = vmatprep.subr.bf16.mxu0 %v10062_v0 }
0x108e   :  { %8283 = vmatpush3.bf16.msra.mxu0 %v9617_v24 }
0x108f   :  { %8284 = vmatprep.subr.bf16.mxu0 %v10062_v0 }
0x1092   :  { %8285 = vmatpush3.bf16.msra.mxu0 %v9618_v33 }
0x1093   :  { %8286 = vmatprep.subr.bf16.mxu0 %v10062_v0  ;;  %v7104_v0 = vld [vmem:[#allocation28 + $0x42] ss:$0 sm:$0xff] }
0x1096   :  { %8287 = vmatpush3.bf16.msra.mxu0 %v9619_v34 }
0x114c   :  { %v6973_v26 = vpop.f32.mrb[40].mxu0 }
0x114d   :  { %v6974_v27 = vadd.f32 %v6973_v26, %v6890_v25  ;;  %v8250_v60 = vpop.f32.mrb[41].mxu0 }
0x114e   :  { %v6976_v28 = vpop.f32.mrb[42].mxu0 }
0x114f   :  { %v6979_v29 = vmax.f32 %v6974_v27, 0.0  ;;  %v8251_v31 = vpop.f32.mrb[43].mxu0 }
0x1151   :  { %v6980_v32 = vpack.c.bf16 %v6979_v29, %v6979_v29 }
0x1153   :  { %8269 = vmatmul.mubr.bf16.vlgmr.msra.gmra.mrb[44].mxu1 %v6980_v32 }
0x1226   :  { %v7080_v55 = vpop.f32.mrb[44].mxu1 }
0x1227   :  { %v7081_v8 = vadd.f32 %v7080_v55, %v6997_v36  ;;  %v8270_v37 = vpop.f32.mrb[45].mxu1 }
0x1228   :  { %v7083_v38 = vpop.f32.mrb[46].mxu1 }
0x1229   :  { %v7086_v39 = vmax.f32 %v7081_v8, 0.0  ;;  %v8271_v40 = vpop.f32.mrb[47].mxu1 }
0x122b   :  { %v7087_v14 = vpack.c.bf16 %v7086_v39, %v7086_v39 }
0x122d   :  { %8289 = vmatmul.mubr.bf16.vlgmr.msra.gmra.mrb[44].mxu0 %v7087_v14 }
0x1300   :  { %v7187_v44 = vpop.f32.mrb[44].mxu0 }
0x1301   :  { %v7188_v45 = vadd.f32 %v7187_v44, %v7104_v0  ;;  %v8290_v1 = vpop.f32.mrb[45].mxu0 }
0x1302   :  { %v7190_v47 = vpop.f32.mrb[46].mxu0 }
0x1303   :  { %v7193_v49 = vmax.f32 %v7188_v45, 0.0  ;;  %v8291_v50 = vpop.f32.mrb[47].mxu0 }
0x1305   :  { %v7200_v51 = vmul.f32 %v7199_v46, %v7193_v49 }
0x1307   :  { %v7201_v52 = vsel %vm350_vm1, %v7200_v51, 0.0 }
0x1308   :  { %7202 = vadd.xlane.f32.xlu0 %v7201_v52 }
0x1395   :  { %v7203_v56 = vpop.xlane.xlu0 %7202 }
0x1396   :  { %v7205_v57 = vadd.f32 %v7204_v53, %v7203_v56 }
0x1398   :  { %7208 = vperm.xlu0 %8375, %v7205_v57  }
0x1417   :  { %v7209_v58 = vpop.permute.xlu0 %7208 }
0x1418   :  { %7211 = vst [vmem:[%s10795_s0] sm:$0xff] %v7209_v58 }
0x1419   :  { %7216 = vsyncpa [#allocation3], 1 }
0x141a   :  { %7217 = vsyncpa [#allocation5], 1 }
0x141b   :  { %7218 = vsyncpa [#allocation8], 1 }
0x141c   :  { %7219 = vsyncpa [#allocation11], 1 }
0x141d   :  { %7220 = vsyncpa [#allocation14], 1 }
0x141e   :  { %7221 = vsyncpa [#allocation17], 1 }
0x141f   :  { %7222 = vsyncpa [#allocation20], 1 }
0x1420   :  { %7223 = vsyncpa [#allocation23], 1 }
0x1421   :  { %7224 = vsyncpa [#allocation26], 1 }
0x1422   :  { %7225 = vsyncpa [#allocation29], 1 }

</bundles_post_ra>
